<compile_context>
chip_gen: v5e
topology: v5e:2x2
jax: 0.10.0
libtpu: 0.0.40
codegen_flags: <defaults>
</compile_context>

<pallas_src>
import functools

import jax
import jax.numpy as jnp
from jax.experimental import pallas as pl
from jax.experimental.pallas import tpu as pltpu

LN_EPS = 1e-5


def _layer_norm(u, gamma, beta, eps=LN_EPS):
    mu = jnp.mean(u, axis=-1, keepdims=True)
    var = jnp.mean((u - mu) ** 2, axis=-1, keepdims=True)
    return (u - mu) * jax.lax.rsqrt(var + eps) * gamma + beta


# ----------------------------- Pallas kernel ------------------------------- #
def fwl_fast_kernel(h_ref, lab_ref, wht_ref, rows_ref, cat_ref, swt_ref,
                    et_ref, obias_ref, loss_ref, *, feat):
    f32, bf16 = jnp.float32, jnp.bfloat16
    F_ = feat

    # Grid-invariant row vectors, stacked into one [5, F] operand (one DMA and
    # one padded (8,128) tile instead of five).
    bias = rows_ref[0:1, :]          # b_lin + b_hidden (fused host-side)
    b_p = rows_ref[1:2, :]
    gamma = rows_ref[2:3, :]
    beta = rows_ref[3:4, :]
    s_b = rows_ref[4:5, :]

    h = h_ref[...]                                                     # [TN, D] bf16

    # v_t = relu(hidden_layer(h_t) + hidden_bias)
    z = jnp.dot(h, wht_ref[...], preferred_element_type=f32) + bias
    v = jnp.maximum(z, 0.0)                                            # [TN, F] f32
    v16 = v.astype(bf16)

    # One fused same-LHS matmul against [F, 2F+1] = [ W_p^T | grad_W_p | grad_b_p ]:
    #   big[:, :F]   = v @ W_p^T
    #   big[:, F:2F] = g = v @ grad_W_p
    #   big[:, 2F]   = s = v . grad_b_p
    big = jnp.dot(v16, cat_ref[...], preferred_element_type=f32)       # [TN, 2F+1]
    u_wp = big[:, :F_]
    g = big[:, F_:2 * F_]
    s = big[:, 2 * F_:2 * F_ + 1]

    # Fast-weight correction, kept in f32 (product of already-rounded factors).
    corr = jnp.dot(v * g, swt_ref[...], preferred_element_type=f32)    # [TN, F]

    # u = v W_p^T - v*((v*g) @ S_W^T) + b_p - S_b * v * (v . grad_b_p)
    u = u_wp - v * corr + b_p - s_b * v * s

    o = _layer_norm(u, gamma, beta)                                    # [TN, F] f32

    # fast logits + per-token cross entropy (reduction='none'), f32 softmax math.
    logits = (jnp.dot(o.astype(bf16), et_ref[...], preferred_element_type=f32)
              + obias_ref[...])                                        # [TN, V]
    m = jnp.max(logits, axis=-1, keepdims=True)
    lse = m + jnp.log(jnp.sum(jnp.exp(logits - m), axis=-1, keepdims=True))
    vocab_iota = jax.lax.broadcasted_iota(jnp.int32, logits.shape, 1)
    # TODO(synk): out-of-range labels (e.g. ignore_index=-100) are not masked and
    # would yield loss = lse; the reference F.cross_entropy here uses no ignore_index.
    picked = jnp.sum(jnp.where(vocab_iota == lab_ref[...], logits, 0.0),
                     axis=-1, keepdims=True)

    # Plain [TN, 1] column store: only TN*4 bytes per step, the masked 1-lane vst
    # is near-free (no O(TN^2) relayout).
    loss_ref[...] = lse - picked


# ------------------------------ host wrapper ------------------------------- #
def _min_blocks_for_device():
    # v7x has 2 TensorCores per chip: keep >= 2 parallel token blocks so both
    # cores get work. Single-TC chips (v5e/v6e) take one maximal tile instead
    # (a second grid step there is pure ~0.35us overhead).
    try:
        kind = jax.devices()[0].device_kind.lower()
    except Exception:
        return 1
    return 2 if "v7" in kind else 1


def _pick_token_tile(n, d, f, v, min_blocks=1, vmem_budget=12 << 20):
    # Largest tile dividing N that fits a conservative VMEM estimate; per-step
    # fixed overhead (~0.35us) dominates small tiles, so bigger is better.
    candidates = (2048, 1024, 512, 256, 128, 64, 32, 16, 8)

    def fits(tn):
        io = 2 * (tn * d * 2 + tn * 4 + tn * 4)          # double-buffered h/labels/loss
        tmp = tn * v * 4 + tn * (2 * f + 1) * 4 + 4 * tn * f * 4   # logits + intermediates
        return io + tmp <= vmem_budget

    for c in candidates:
        if n % c == 0 and n // c >= min_blocks and fits(c):
            return c
    for c in candidates:
        if n % c == 0 and fits(c):
            return c
    return n


def fwl_fast_loss(h, labels, params, grad_Wp, grad_bp, E, out_bias, *, token_tile=None):
    B, S, D = h.shape
    F_ = params["W_p"].shape[0]
    V = E.shape[0]
    N = B * S
    if token_tile is None:
        TN = _pick_token_tile(N, D, F_, V, min_blocks=_min_blocks_for_device())
    else:
        TN = token_tile
    assert N % TN == 0

    f32, bf16 = jnp.float32, jnp.bfloat16

    # Host-side layout prep: transpose weights once, fuse hidden biases, fuse the
    # three same-LHS operands, stack the row vectors, cast MXU operands to bf16.
    h2 = h.reshape(N, D).astype(bf16)
    lab2 = labels.reshape(N, 1).astype(jnp.int32)
    wh_t = params["W_h"].T.astype(bf16)                              # [D, F]
    rows = jnp.stack([
        params["b_lin"] + params["b_hidden"],                        # fused hidden bias
        params["b_p"],
        params["gamma"],
        params["beta"],
        params["S_b"],
    ], axis=0).astype(f32)                                           # [5, F]
    cat = jnp.concatenate([
        params["W_p"].T,                                             # [F, F]
        grad_Wp,                                                     # [F, F]
        grad_bp.reshape(F_, 1),                                      # [F, 1]
    ], axis=1).astype(bf16)                                          # [F, 2F+1]
    sw_t = params["S_W"].T.astype(f32)                               # [F, F] (f32 path)
    e_t = E.T.astype(bf16)                                           # [F, V]
    obias = out_bias.reshape(1, V).astype(f32)

    args = (h2, lab2, wh_t, rows, cat, sw_t, e_t, obias)

    full = lambda shape: pl.BlockSpec(shape, lambda i: (0, 0))
    # TODO(synk): for real model sizes (large F/V), give the invariant weight specs
    # pipeline_mode=pl.Buffered(1) (or stage them once via manual DMA), pad F to a
    # multiple of 128 for lane occupancy, add a vocab grid axis with online
    # logsumexp, and set vmem_limit_bytes explicitly (v7x has only 64 MiB VMEM).
    in_specs = [
        pl.BlockSpec((TN, D), lambda i: (i, 0)),        # h tokens
        pl.BlockSpec((TN, 1), lambda i: (i, 0)),        # labels
        full((D, F_)),                                  # W_h^T
        full((5, F_)),                                  # stacked row vectors
        full((F_, 2 * F_ + 1)),                         # [W_p^T | grad_W_p | grad_b_p]
        full((F_, F_)),                                 # S_W^T (f32)
        full((F_, V)),                                  # E^T
        full((1, V)),                                   # output bias
    ]

    out = pl.pallas_call(
        functools.partial(fwl_fast_kernel, feat=F_),
        out_shape=jax.ShapeDtypeStruct((N, 1), f32),
        grid_spec=pltpu.PrefetchScalarGridSpec(
            num_scalar_prefetch=0,
            grid=(N // TN,),
            in_specs=in_specs,
            out_specs=pl.BlockSpec((TN, 1), lambda i: (i, 0))),
        compiler_params=pltpu.CompilerParams(
            dimension_semantics=("parallel",)),
    )(*args)
    return out.reshape(B, S)


# --------------------- slow-path loss (for the gradients) ------------------ #
def slow_loss_sum(grad_params, static, h, labels):
    """Pure-JAX slow path; gradients of its sum feed the fast-weight kernel."""
    W_h, b_hidden, W_p, b_p = grad_params
    b_lin, gamma, beta, E, out_bias = static
    z = h @ W_h.T + b_lin + b_hidden
    v = jax.nn.relu(z)
    u = v @ W_p.T + b_p
    o = _layer_norm(u, gamma, beta)
    logits = o @ E.T + out_bias
    lse = jax.nn.logsumexp(logits, axis=-1)
    picked = jnp.take_along_axis(logits, labels[..., None], axis=-1)[..., 0]
    return jnp.sum(lse - picked)


# -------------- literal per-token reference for the fast loss -------------- #
def fwl_fast_loss_ref(h, labels, params, grad_Wp, grad_bp, E, out_bias):
    v = jax.nn.relu(h @ params["W_h"].T + params["b_lin"] + params["b_hidden"])

    def per_token(v_t):
        outer = jnp.outer(v_t, v_t)                                    # v v^T
        fast_W = params["W_p"] - params["S_W"] * (outer @ grad_Wp)
        fast_b = params["b_p"] - params["S_b"] * (outer @ grad_bp)
        return fast_W @ v_t + fast_b

    u = jax.vmap(jax.vmap(per_token))(v)
    o = _layer_norm(u, params["gamma"], params["beta"])
    logits = o @ E.T + out_bias
    lse = jax.nn.logsumexp(logits, axis=-1)
    picked = jnp.take_along_axis(logits, labels[..., None], axis=-1)[..., 0]
    return lse - picked


# ----------------------------------- main ---------------------------------- #
if __name__ == "__main__":
    key = jax.random.PRNGKey(0)
    B, S, D, V = 2, 128, 32, 256
    F_ = D  # logits = o @ embedding_matrix.T forces fwl_dim == hidden_dim

    ks = jax.random.split(key, 8)
    E = jax.random.normal(ks[0], (V, D), jnp.float32) * 0.1             # input embeddings
    out_bias = jnp.zeros((V,), jnp.float32)                              # lm_head.bias
    W_t = jax.random.normal(ks[1], (D, D), jnp.float32) / jnp.sqrt(D)
    b_t = jnp.zeros((D,), jnp.float32)

    params = dict(
        W_h=jax.random.normal(ks[2], (F_, D), jnp.float32) / jnp.sqrt(D),
        b_lin=jax.random.normal(ks[3], (F_,), jnp.float32) * 0.01,       # hidden_layer.bias
        b_hidden=jnp.zeros((F_,), jnp.float32),                          # hidden_bias param
        W_p=jax.random.normal(ks[4], (F_, F_), jnp.float32) / jnp.sqrt(F_),
        b_p=jnp.zeros((F_,), jnp.float32),                               # projection_bias
        gamma=jnp.ones((F_,), jnp.float32),                              # LayerNorm weight
        beta=jnp.zeros((F_,), jnp.float32),                              # LayerNorm bias
        S_W=jnp.ones((F_, F_), jnp.float32),                             # step_size_projection_layer
        S_b=jnp.ones((F_,), jnp.float32),                                # step_size_projection_bias
    )

    input_ids = jax.random.randint(ks[5], (B, S), 0, V)
    labels = jax.random.randint(ks[6], (B, S), 0, V)

    # TODO(synk): AutoModelForCausalLM.from_pretrained has no Pallas equivalent;
    # synthetic stand-in transformer: h = tanh(embed[input_ids] @ W_t + b_t).
    h = jnp.tanh(E[input_ids] @ W_t + b_t)

    # torch.autograd.grad(loss.sum(), ...) equivalent — plain-JAX autodiff glue.
    grads = jax.grad(slow_loss_sum, argnums=0)(
        (params["W_h"], params["b_hidden"], params["W_p"], params["b_p"]),
        (params["b_lin"], params["gamma"], params["beta"], E, out_bias),
        h, labels)
    gW_h, gb_hidden, gW_p, gb_p = grads  # only projection grads feed the fast loop

    fast_loss = fwl_fast_loss(h, labels, params, gW_p, gb_p, E, out_bias)
    fast_loss = jax.block_until_ready(fast_loss)

    assert fast_loss.shape == (B, S)
    assert bool(jnp.all(jnp.isfinite(fast_loss)))

    # Numerical check of the algebraic expansion vs the literal per-token loop
    # (loose tolerance: kernel runs its matmuls in bf16 with f32 accumulation).
    ref = fwl_fast_loss_ref(h, labels, params, gW_p, gb_p, E, out_bias)
    assert float(jnp.max(jnp.abs(fast_loss - ref))) < 0.15

    print("KERNEL_OK")
</pallas_src>

<mosaic_0001>
module attributes {stable_mosaic.version = 11 : i64} {
  func.func @fwl_fast_kernel(%arg0: i32, %arg1: memref<256x32xbf16, #tpu.memory_space<vmem>>, %arg2: memref<256x1xi32, #tpu.memory_space<vmem>>, %arg3: memref<32x32xbf16, #tpu.memory_space<vmem>>, %arg4: memref<5x32xf32, #tpu.memory_space<vmem>>, %arg5: memref<32x65xbf16, #tpu.memory_space<vmem>>, %arg6: memref<32x32xf32, #tpu.memory_space<vmem>>, %arg7: memref<32x256xbf16, #tpu.memory_space<vmem>>, %arg8: memref<1x256xf32, #tpu.memory_space<vmem>>, %arg9: memref<256x1xf32, #tpu.memory_space<vmem>>) attributes {dimension_semantics = [#tpu.dimension_semantics<parallel>], iteration_bounds = array<i64: 1>, scalar_prefetch = 0 : i64, scratch_operands = 0 : i64, tpu.core_type = #tpu.core_type<tc>, window_params = [{transform_indices = @transform_0, window_bounds = array<i64: 256, 32>}, {transform_indices = @transform_1, window_bounds = array<i64: 256, 1>}, {pipeline_mode = #tpu.pipeline_mode<synchronous>, transform_indices = @transform_2, window_bounds = array<i64: 32, 32>}, {pipeline_mode = #tpu.pipeline_mode<synchronous>, transform_indices = @transform_3, window_bounds = array<i64: 5, 32>}, {pipeline_mode = #tpu.pipeline_mode<synchronous>, transform_indices = @transform_4, window_bounds = array<i64: 32, 65>}, {pipeline_mode = #tpu.pipeline_mode<synchronous>, transform_indices = @transform_5, window_bounds = array<i64: 32, 32>}, {pipeline_mode = #tpu.pipeline_mode<synchronous>, transform_indices = @transform_6, window_bounds = array<i64: 32, 256>}, {pipeline_mode = #tpu.pipeline_mode<synchronous>, transform_indices = @transform_7, window_bounds = array<i64: 1, 256>}, {transform_indices = @transform_8, window_bounds = array<i64: 256, 1>}]} {
    %c0 = arith.constant 0 : index
    %c0_0 = arith.constant 0 : index
    %0 = vector.load %arg4[%c0, %c0_0] : memref<5x32xf32, #tpu.memory_space<vmem>>, vector<1x32xf32>
    %c1 = arith.constant 1 : index
    %c0_1 = arith.constant 0 : index
    %1 = vector.load %arg4[%c1, %c0_1] : memref<5x32xf32, #tpu.memory_space<vmem>>, vector<1x32xf32>
    %c2 = arith.constant 2 : index
    %c0_2 = arith.constant 0 : index
    %2 = vector.load %arg4[%c2, %c0_2] : memref<5x32xf32, #tpu.memory_space<vmem>>, vector<1x32xf32>
    %c3 = arith.constant 3 : index
    %c0_3 = arith.constant 0 : index
    %3 = vector.load %arg4[%c3, %c0_3] : memref<5x32xf32, #tpu.memory_space<vmem>>, vector<1x32xf32>
    %c4 = arith.constant 4 : index
    %c0_4 = arith.constant 0 : index
    %4 = vector.load %arg4[%c4, %c0_4] : memref<5x32xf32, #tpu.memory_space<vmem>>, vector<1x32xf32>
    %c0_5 = arith.constant 0 : index
    %c0_6 = arith.constant 0 : index
    %5 = vector.load %arg1[%c0_5, %c0_6] : memref<256x32xbf16, #tpu.memory_space<vmem>>, vector<256x32xbf16>
    %c0_7 = arith.constant 0 : index
    %c0_8 = arith.constant 0 : index
    %6 = vector.load %arg3[%c0_7, %c0_8] : memref<32x32xbf16, #tpu.memory_space<vmem>>, vector<32x32xbf16>
    %cst = arith.constant dense<0.000000e+00> : vector<256x32xf32>
    %7 = tpu.matmul %5, %6, %cst {dimension_numbers = #tpu.dot_dimension_numbers<[1], [0], [0], [1], [0, 0, 1, 1], [], []>} : vector<256x32xbf16>, vector<32x32xbf16>, vector<256x32xf32> -> vector<256x32xf32>
    %8 = vector.broadcast %0 : vector<1x32xf32> to vector<256x32xf32>
    %9 = arith.addf %7, %8 : vector<256x32xf32>
    %cst_9 = arith.constant 0.000000e+00 : f32
    %10 = vector.broadcast %cst_9 : f32 to vector<256x32xf32>
    %11 = arith.maximumf %9, %10 : vector<256x32xf32>
    %12 = arith.truncf %11 : vector<256x32xf32> to vector<256x32xbf16>
    %c0_10 = arith.constant 0 : index
    %c0_11 = arith.constant 0 : index
    %13 = vector.load %arg5[%c0_10, %c0_11] : memref<32x65xbf16, #tpu.memory_space<vmem>>, vector<32x65xbf16>
    %cst_12 = arith.constant dense<0.000000e+00> : vector<256x65xf32>
    %14 = tpu.matmul %12, %13, %cst_12 {dimension_numbers = #tpu.dot_dimension_numbers<[1], [0], [0], [1], [0, 0, 1, 1], [], []>} : vector<256x32xbf16>, vector<32x65xbf16>, vector<256x65xf32> -> vector<256x65xf32>
    %15 = vector.extract_strided_slice %14 {offsets = [0, 0], sizes = [256, 32], strides = [1, 1]} : vector<256x65xf32> to vector<256x32xf32>
    %16 = vector.extract_strided_slice %14 {offsets = [0, 32], sizes = [256, 32], strides = [1, 1]} : vector<256x65xf32> to vector<256x32xf32>
    %17 = vector.extract_strided_slice %14 {offsets = [0, 64], sizes = [256, 1], strides = [1, 1]} : vector<256x65xf32> to vector<256x1xf32>
    %18 = arith.mulf %11, %16 : vector<256x32xf32>
    %c0_13 = arith.constant 0 : index
    %c0_14 = arith.constant 0 : index
    %19 = vector.load %arg6[%c0_13, %c0_14] : memref<32x32xf32, #tpu.memory_space<vmem>>, vector<32x32xf32>
    %cst_15 = arith.constant dense<0.000000e+00> : vector<256x32xf32>
    %20 = tpu.matmul %18, %19, %cst_15 {dimension_numbers = #tpu.dot_dimension_numbers<[1], [0], [0], [1], [0, 0, 1, 1], [], []>} : vector<256x32xf32>, vector<32x32xf32>, vector<256x32xf32> -> vector<256x32xf32>
    %21 = arith.mulf %11, %20 : vector<256x32xf32>
    %22 = arith.subf %15, %21 : vector<256x32xf32>
    %23 = vector.broadcast %1 : vector<1x32xf32> to vector<256x32xf32>
    %24 = arith.addf %22, %23 : vector<256x32xf32>
    %25 = vector.broadcast %4 : vector<1x32xf32> to vector<256x32xf32>
    %26 = arith.mulf %25, %11 : vector<256x32xf32>
    %27 = vector.broadcast %17 : vector<256x1xf32> to vector<256x32xf32>
    %28 = arith.mulf %26, %27 : vector<256x32xf32>
    %29 = arith.subf %24, %28 : vector<256x32xf32>
    %cst_16 = arith.constant dense<0.000000e+00> : vector<256xf32>
    %30 = vector.multi_reduction <add>, %29, %cst_16 [1] : vector<256x32xf32> to vector<256xf32>
    %31 = vector.shape_cast %30 : vector<256xf32> to vector<256x1xf32>
    %cst_17 = arith.constant 3.200000e+01 : f32
    %32 = vector.broadcast %cst_17 : f32 to vector<256x1xf32>
    %33 = arith.divf %31, %32 : vector<256x1xf32>
    %34 = vector.broadcast %33 : vector<256x1xf32> to vector<256x32xf32>
    %35 = arith.subf %29, %34 : vector<256x32xf32>
    %36 = arith.mulf %35, %35 : vector<256x32xf32>
    %cst_18 = arith.constant dense<0.000000e+00> : vector<256xf32>
    %37 = vector.multi_reduction <add>, %36, %cst_18 [1] : vector<256x32xf32> to vector<256xf32>
    %38 = vector.shape_cast %37 : vector<256xf32> to vector<256x1xf32>
    %cst_19 = arith.constant 3.200000e+01 : f32
    %39 = vector.broadcast %cst_19 : f32 to vector<256x1xf32>
    %40 = arith.divf %38, %39 : vector<256x1xf32>
    %41 = vector.broadcast %33 : vector<256x1xf32> to vector<256x32xf32>
    %42 = arith.subf %29, %41 : vector<256x32xf32>
    %cst_20 = arith.constant 9.99999974E-6 : f32
    %43 = vector.broadcast %cst_20 : f32 to vector<256x1xf32>
    %44 = arith.addf %40, %43 : vector<256x1xf32>
    %45 = math.rsqrt %44 : vector<256x1xf32>
    %46 = vector.broadcast %45 : vector<256x1xf32> to vector<256x32xf32>
    %47 = arith.mulf %42, %46 : vector<256x32xf32>
    %48 = vector.broadcast %2 : vector<1x32xf32> to vector<256x32xf32>
    %49 = arith.mulf %47, %48 : vector<256x32xf32>
    %50 = vector.broadcast %3 : vector<1x32xf32> to vector<256x32xf32>
    %51 = arith.addf %49, %50 : vector<256x32xf32>
    %52 = arith.truncf %51 : vector<256x32xf32> to vector<256x32xbf16>
    %c0_21 = arith.constant 0 : index
    %c0_22 = arith.constant 0 : index
    %53 = vector.load %arg7[%c0_21, %c0_22] : memref<32x256xbf16, #tpu.memory_space<vmem>>, vector<32x256xbf16>
    %cst_23 = arith.constant dense<0.000000e+00> : vector<256x256xf32>
    %54 = tpu.matmul %52, %53, %cst_23 {dimension_numbers = #tpu.dot_dimension_numbers<[1], [0], [0], [1], [0, 0, 1, 1], [], []>} : vector<256x32xbf16>, vector<32x256xbf16>, vector<256x256xf32> -> vector<256x256xf32>
    %c0_24 = arith.constant 0 : index
    %c0_25 = arith.constant 0 : index
    %55 = vector.load %arg8[%c0_24, %c0_25] : memref<1x256xf32, #tpu.memory_space<vmem>>, vector<1x256xf32>
    %56 = vector.broadcast %55 : vector<1x256xf32> to vector<256x256xf32>
    %57 = arith.addf %54, %56 : vector<256x256xf32>
    %cst_26 = arith.constant dense<0xFF800000> : vector<256xf32>
    %58 = vector.multi_reduction <maximumf>, %57, %cst_26 [1] : vector<256x256xf32> to vector<256xf32>
    %59 = vector.shape_cast %58 : vector<256xf32> to vector<256x1xf32>
    %60 = vector.broadcast %59 : vector<256x1xf32> to vector<256x256xf32>
    %61 = arith.subf %57, %60 : vector<256x256xf32>
    %62 = math.exp %61 : vector<256x256xf32>
    %cst_27 = arith.constant dense<0.000000e+00> : vector<256xf32>
    %63 = vector.multi_reduction <add>, %62, %cst_27 [1] : vector<256x256xf32> to vector<256xf32>
    %64 = vector.shape_cast %63 : vector<256xf32> to vector<256x1xf32>
    %65 = math.log %64 : vector<256x1xf32>
    %66 = arith.addf %59, %65 : vector<256x1xf32>
    %67 = tpu.iota {dimensions = array<i32: 1>} : vector<256x256xi32>
    %c0_28 = arith.constant 0 : index
    %c0_29 = arith.constant 0 : index
    %68 = vector.load %arg2[%c0_28, %c0_29] : memref<256x1xi32, #tpu.memory_space<vmem>>, vector<256x1xi32>
    %69 = vector.broadcast %68 : vector<256x1xi32> to vector<256x256xi32>
    %70 = arith.cmpi eq, %67, %69 : vector<256x256xi32>
    %cst_30 = arith.constant 0.000000e+00 : f32
    %71 = vector.broadcast %cst_30 : f32 to vector<256x256xf32>
    %72 = arith.select %70, %57, %71 : vector<256x256xi1>, vector<256x256xf32>
    %cst_31 = arith.constant dense<0.000000e+00> : vector<256xf32>
    %73 = vector.multi_reduction <add>, %72, %cst_31 [1] : vector<256x256xf32> to vector<256xf32>
    %74 = vector.shape_cast %73 : vector<256xf32> to vector<256x1xf32>
    %75 = arith.subf %66, %74 : vector<256x1xf32>
    %c0_32 = arith.constant 0 : index
    %c0_33 = arith.constant 0 : index
    %76 = vector.load %arg9[%c0_32, %c0_33] : memref<256x1xf32, #tpu.memory_space<vmem>>, vector<256x1xf32>
    tpu.vector_store %arg9[%c0_32, %c0_33], %75 {strides = array<i32>} : memref<256x1xf32, #tpu.memory_space<vmem>>, vector<256x1xf32>,
    return
  }
  func.func @transform_0(%arg0: i32) -> (i32, i32) {
    %c0_i32 = arith.constant 0 : i32
    %c0_i32_0 = arith.constant 0 : i32
    return %arg0, %c0_i32 : i32, i32
  }
  func.func @transform_1(%arg0: i32) -> (i32, i32) {
    %c0_i32 = arith.constant 0 : i32
    %c0_i32_0 = arith.constant 0 : i32
    return %arg0, %c0_i32 : i32, i32
  }
  func.func @transform_2(%arg0: i32) -> (i32, i32) {
    %c0_i32 = arith.constant 0 : i32
    %c0_i32_0 = arith.constant 0 : i32
    %c0_i32_1 = arith.constant 0 : i32
    return %c0_i32, %c0_i32_0 : i32, i32
  }
  func.func @transform_3(%arg0: i32) -> (i32, i32) {
    %c0_i32 = arith.constant 0 : i32
    %c0_i32_0 = arith.constant 0 : i32
    %c0_i32_1 = arith.constant 0 : i32
    return %c0_i32, %c0_i32_0 : i32, i32
  }
  func.func @transform_4(%arg0: i32) -> (i32, i32) {
    %c0_i32 = arith.constant 0 : i32
    %c0_i32_0 = arith.constant 0 : i32
    %c0_i32_1 = arith.constant 0 : i32
    return %c0_i32, %c0_i32_0 : i32, i32
  }
  func.func @transform_5(%arg0: i32) -> (i32, i32) {
    %c0_i32 = arith.constant 0 : i32
    %c0_i32_0 = arith.constant 0 : i32
    %c0_i32_1 = arith.constant 0 : i32
    return %c0_i32, %c0_i32_0 : i32, i32
  }
  func.func @transform_6(%arg0: i32) -> (i32, i32) {
    %c0_i32 = arith.constant 0 : i32
    %c0_i32_0 = arith.constant 0 : i32
    %c0_i32_1 = arith.constant 0 : i32
    return %c0_i32, %c0_i32_0 : i32, i32
  }
  func.func @transform_7(%arg0: i32) -> (i32, i32) {
    %c0_i32 = arith.constant 0 : i32
    %c0_i32_0 = arith.constant 0 : i32
    %c0_i32_1 = arith.constant 0 : i32
    return %c0_i32, %c0_i32_0 : i32, i32
  }
  func.func @transform_8(%arg0: i32) -> (i32, i32) {
    %c0_i32 = arith.constant 0 : i32
    %c0_i32_0 = arith.constant 0 : i32
    return %arg0, %c0_i32 : i32, i32
  }
}

</mosaic_0001>

<bundles_post_ra>
// kernel: tpu_custom_call.1
= control target key start
LH: loop header
LB: loop body
LE: loop exit
PB: predicated region body
PF: predicated region fallthrough
CT: control target
= control target key end

     0   :  { %vm164_vm0 = vcmask 261120   ;;  %v6416_v19 = vmov 0   ;;  %s3653_s19 = smov 96   ;;  %s6407_s2 = inlined_call_operand.vmem [shape: bf16[32,32], index: 2, kind: input, shape index: {}]   ;;  %s6408_s3 = inlined_call_operand.vmem [shape: f32[5,32], index: 3, kind: input, shape index: {}]   ;;  %s6409_s0 = inlined_call_operand.vmem [shape: bf16[256,32], index: 0, kind: input, shape index: {}]   ;;  %s6410_s4 = inlined_call_operand.vmem [shape: bf16[32,65], index: 4, kind: input, shape index: {}]   ;;  %s6411_s1 = inlined_call_operand.vmem [shape: s32[256,1], index: 1, kind: input, shape index: {}]   ;;  %s6412_s5 = inlined_call_operand.vmem [shape: f32[32,32], index: 5, kind: input, shape index: {}]   ;;  %s6413_s6 = inlined_call_operand.vmem [shape: bf16[32,256], index: 6, kind: input, shape index: {}]   ;;  %s6414_s7 = inlined_call_operand.vmem [shape: f32[1,256], index: 7, kind: input, shape index: {}]   ;;  %s6415_s8 = inlined_call_operand.vmem [shape: f32[256,1], index: 8, kind: output, shape index: {}]  }
   0x1   :  { %v3360_v0 = vld [vmem:[%s6407_s2 + $0x8] sm:$0xff]  ;;  %v3359_v1 = vld [vmem:[%s6407_s2] sm:$0xff]  ;;  %v3345_v6 = vld [vmem:[%s6409_s0 + $0x10] sm:$0xff]  ;;  %3378 = vset.pattern.permute.xlu1 %v6416_v19  ;;  %3377 = vset.pattern.permute.xlu0 %v6416_v19 }
   0x2   :  { %219 = vmatpush.bf16.msra.mxu0 %v3360_v0  ;;  %3367 = vmatpush.bf16.msra.mxu1 %v3360_v0  ;;  %v3343_v2 = vld [vmem:[%s6409_s0] sm:$0xff]  ;;  %v3344_v3 = vld [vmem:[%s6409_s0 + $0x8] sm:$0xff]  ;;  %v3346_v10 = vld [vmem:[%s6409_s0 + $0x18] sm:$0xff] }
   0x3   :  { %3368 = vmatpush.bf16.msra.mxu2 %v3360_v0  ;;  %3369 = vmatpush.bf16.msra.mxu3 %v3360_v0  ;;  %v3347_v4 = vld [vmem:[%s6409_s0 + $0x20] sm:$0xff]  ;;  %v3362_v5 = vld [vmem:[%s6410_s4 + $0x8] sm:$0xff]  ;;  %v3349_v11 = vld [vmem:[%s6409_s0 + $0x30] sm:$0xff] }
   0x4   :  { %v3348_v7 = vld [vmem:[%s6409_s0 + $0x28] sm:$0xff]  ;;  %v3361_v8 = vld [vmem:[%s6410_s4] sm:$0xff]  ;;  %v3350_v12 = vld [vmem:[%s6409_s0 + $0x38] sm:$0xff]  ;;  %3379 = vset.pattern.permute.xlu2 %v6416_v19 }
   0x5   :  { %v3351_v9 = vld [vmem:[%s6409_s0 + $0x40] sm:$0xff]  ;;  %v3352_v13 = vld [vmem:[%s6409_s0 + $0x48] sm:$0xff]  ;;  %v3353_v14 = vld [vmem:[%s6409_s0 + $0x50] sm:$0xff] }
   0x6   :  { %220 = vmatpush.bf16.msra.mxu0 %v3359_v1  ;;  %3370 = vmatpush.bf16.msra.mxu1 %v3359_v1  ;;  %v3759_v16 = vld [vmem:[%s6408_s3] ss:$0 sm:$0xff]  ;;  %v3354_v17 = vld [vmem:[%s6409_s0 + $0x58] sm:$0xff]  ;;  %v2731_v18 = vld [vmem:[%s6411_s1 + $0x8] sm:$0xff] }
   0x7   :  { %3371 = vmatpush.bf16.msra.mxu2 %v3359_v1  ;;  %3372 = vmatpush.bf16.msra.mxu3 %v3359_v1  ;;  %v2733_v26 = vld [vmem:[%s6411_s1 + $0x18] sm:$0xff]  ;;  %v2730_v27 = vld [vmem:[%s6411_s1] sm:$0xff]  ;;  %v2735_v30 = vld [vmem:[%s6411_s1 + $0x28] sm:$0xff] }
   0x8   :  { %2766 = vperm.xlu1 %3378, %v2731_v18   ;;  %2763 = vperm.xlu0 %3377, %v2730_v27   ;;  %v3355_v29 = vld [vmem:[%s6409_s0 + $0x60] sm:$0xff]  ;;  %v2737_v31 = vld [vmem:[%s6411_s1 + $0x38] sm:$0xff]  ;;  %v2740_v39 = vld [vmem:[%s6411_s1 + $0x50] sm:$0xff] }
   0x9   :  { %3223 = vmatmul.msk.bf16.vlgmr.msra.gmra.mxu0 %vm164_vm0, %v3343_v2  ;;  %3227 = vmatmul.msk.bf16.vlgmr.msra.gmra.mxu1 %vm164_vm0, %v3347_v4  ;;  %v2738_v38 = vld [vmem:[%s6411_s1 + $0x40] sm:$0xff]  ;;  %v2732_v41 = vld [vmem:[%s6411_s1 + $0x10] sm:$0xff]  ;;  %v3356_v42 = vld [vmem:[%s6409_s0 + $0x68] sm:$0xff] }
   0xa   :  { %420 = vmatpush.bf16.msrb.mxu1 %v3362_v5  ;;  %3231 = vmatmul.msk.bf16.vlgmr.msra.gmra.mxu2 %vm164_vm0, %v3351_v9  ;;  %v2741_v43 = vld [vmem:[%s6411_s1 + $0x58] sm:$0xff]  ;;  %v2743_v44 = vld [vmem:[%s6411_s1 + $0x68] sm:$0xff]  ;;  %v2734_v45 = vld [vmem:[%s6411_s1 + $0x20] sm:$0xff] }
   0xb   :  { %3235 = vmatmul.msk.bf16.vlgmr.msra.gmra.mxu3 %vm164_vm0, %v3355_v29  ;;  %2769 = vperm.xlu2 %3379, %v2732_v41   ;;  %v2744_v53 = vld [vmem:[%s6411_s1 + $0x70] sm:$0xff]  ;;  %v2746_v54 = vld [vmem:[%s6411_s1 + $0x80] sm:$0xff]  ;;  %v2747_v58 = vld [vmem:[%s6411_s1 + $0x88] sm:$0xff]  ;;  %v3652_v29 = vmov 64  }
   0xc   :  { %v2736_v56 = vld [vmem:[%s6411_s1 + $0x30] sm:$0xff]  ;;  %v2749_v59 = vld [vmem:[%s6411_s1 + $0x98] sm:$0xff]  ;;  %v2739_v61 = vld [vmem:[%s6411_s1 + $0x48] sm:$0xff] }
   0xd   :  { %v3357_v57 = vld [vmem:[%s6409_s0 + $0x70] sm:$0xff]  ;;  %v2750_v4 = vld [vmem:[%s6411_s1 + $0xa0] sm:$0xff] }
   0xe   :  { %421 = vmatpush.bf16.msrb.mxu1 %v3361_v8  ;;  %v2752_v5 = vld [vmem:[%s6411_s1 + $0xb0] sm:$0xff]  ;;  %v3358_v8 = vld [vmem:[%s6409_s0 + $0x78] sm:$0xff] }
  0x10   :  { %2772 = vperm.xlu1 %3378, %v2733_v26   ;;  %2784 = vperm.xlu0 %3377, %v2737_v31  }
  0x13   :  { %2775 = vperm.xlu2 %3379, %v2734_v45  }
  0x18   :  { %2778 = vperm.xlu1 %3378, %v2735_v30   ;;  %2793 = vperm.xlu0 %3377, %v2740_v39  }
  0x19   :  { %3224 = vmatmul.msk.bf16.gmra.mxu0 %vm164_vm0, %v3344_v3  ;;  %3228 = vmatmul.msk.bf16.gmra.mxu1 %vm164_vm0, %v3348_v7  ;;  %v2742_v7 = vld [vmem:[%s6411_s1 + $0x60] sm:$0xff] }
  0x1a   :  { %3232 = vmatmul.msk.bf16.gmra.mxu2 %vm164_vm0, %v3352_v13 }
  0x1b   :  { %3236 = vmatmul.msk.bf16.gmra.mxu3 %vm164_vm0, %v3356_v42  ;;  %2781 = vperm.xlu2 %3379, %v2736_v56  }
  0x20   :  { %2787 = vperm.xlu1 %3378, %v2738_v38   ;;  %2802 = vperm.xlu0 %3377, %v2743_v44  }
  0x23   :  { %2790 = vperm.xlu2 %3379, %v2739_v61  }
  0x28   :  { %2796 = vperm.xlu1 %3378, %v2741_v43   ;;  %2811 = vperm.xlu0 %3377, %v2746_v54  }
  0x29   :  { %3225 = vmatmul.msk.bf16.gmra.mxu0 %vm164_vm0, %v3345_v6  ;;  %3229 = vmatmul.msk.bf16.gmra.mxu1 %vm164_vm0, %v3349_v11  ;;  %v2745_v11 = vld [vmem:[%s6411_s1 + $0x78] sm:$0xff] }
  0x2a   :  { %3233 = vmatmul.msk.bf16.gmra.mxu2 %vm164_vm0, %v3353_v14 }
  0x2b   :  { %3237 = vmatmul.msk.bf16.gmra.mxu3 %vm164_vm0, %v3357_v57  ;;  %2799 = vperm.xlu2 %3379, %v2742_v7  }
  0x30   :  { %2805 = vperm.xlu1 %3378, %v2744_v53   ;;  %2820 = vperm.xlu0 %3377, %v2749_v59  }
  0x33   :  { %2808 = vperm.xlu2 %3379, %v2745_v11   ;;  %v666_v11 = vld [vmem:[%s6412_s5 + $0x18] sm:$0xff] }
  0x34   :  { %775 = vmatpush.msrb.mxu2 %v666_v11 }
  0x38   :  { %2814 = vperm.xlu1 %3378, %v2747_v58   ;;  %2829 = vperm.xlu0 %3377, %v2752_v5  }
  0x39   :  { %3226 = vmatmul.msk.bf16.gmra.mxu0 %vm164_vm0, %v3346_v10  ;;  %3230 = vmatmul.msk.bf16.gmra.mxu1 %vm164_vm0, %v3350_v12 }
  0x3a   :  { %3234 = vmatmul.msk.bf16.gmra.mxu2 %vm164_vm0, %v3354_v17  ;;  %v2748_v17 = vld [vmem:[%s6411_s1 + $0x90] sm:$0xff] }
  0x3b   :  { %3238 = vmatmul.msk.bf16.gmra.mxu3 %vm164_vm0, %v3358_v8  ;;  %2817 = vperm.xlu2 %3379, %v2748_v17  }
  0x40   :  { %2823 = vperm.xlu1 %3378, %v2750_v4   ;;  %3381 = vset.pattern.permute.xlu0 %v3652_v29 }
  0x48   :  { %3382 = vset.pattern.permute.xlu1 %v3652_v29 }
  0x86   :  { %v222_v15 = vpop.f32.mrf.mxu0  ;;  %v242_v51 = vpop.f32.mrf.mxu1 }
  0x87   :  { %v223_v20 = vadd.f32 %v3759_v16, %v222_v15  ;;  %v243_v9 = vadd.f32 %v3759_v16, %v242_v51 }
  0x89   :  { %v3773_v23 = vmax.f32 %v223_v20, 0.0  ;;  %v3885_v12 = vmax.f32 %v243_v9, 0.0 }
  0x8e   :  { %v224_v21 = vpop.f32.mrf.mxu0  ;;  %v244_v60 = vpop.f32.mrf.mxu1 }
  0x8f   :  { %v225_v22 = vadd.f32 %v3759_v16, %v224_v21  ;;  %v245_v10 = vadd.f32 %v3759_v16, %v244_v60 }
  0x91   :  { %v3775_v24 = vmax.f32 %v225_v22, 0.0  ;;  %v3887_v13 = vmax.f32 %v245_v10, 0.0  ;;  %v2751_v22 = vld [vmem:[%s6411_s1 + $0xa8] sm:$0xff]  ;;  %v282_v10 = vpop.f32.mrf.mxu3 }
  0x92   :  { %2826 = vperm.xlu2 %3379, %v2751_v22  }
  0x93   :  { %v334_v25 = vpack.c.bf16 %v3775_v24, %v3773_v23  ;;  %v338_v15 = vpack.c.bf16 %v3887_v13, %v3885_v12 }
  0x95   :  { %3247 = vmatmul.msk.bf16.vlgmr.msrb.gmra.mxu1 %vm164_vm0, %v334_v25 }
  0x96   :  { %v227_v28 = vpop.f32.mrf.mxu0  ;;  %v247_v6 = vpop.f32.mrf.mxu1 }
  0x97   :  { %v228_v32 = vadd.f32 %v3759_v16, %v227_v28  ;;  %v248_v20 = vadd.f32 %v3759_v16, %v247_v6 }
  0x99   :  { %v3798_v35 = vmax.f32 %v228_v32, 0.0  ;;  %v3900_v25 = vmax.f32 %v248_v20, 0.0 }
  0x9a   :  { %3380 = vset.pattern.permute.xlu2 %v3652_v29 }
  0x9e   :  { %v229_v33 = vpop.f32.mrf.mxu0  ;;  %v249_v14 = vpop.f32.mrf.mxu1 }
  0x9f   :  { %v230_v34 = vadd.f32 %v3759_v16, %v229_v33  ;;  %v250_v21 = vadd.f32 %v3759_v16, %v249_v14 }
  0xa1   :  { %v3800_v36 = vmax.f32 %v230_v34, 0.0  ;;  %v3902_v26 = vmax.f32 %v250_v21, 0.0  ;;  %v284_v21 = vpop.f32.mrf.mxu3 }
  0xa3   :  { %v335_v37 = vpack.c.bf16 %v3800_v36, %v3798_v35  ;;  %v339_v27 = vpack.c.bf16 %v3902_v26, %v3900_v25 }
  0xa5   :  { %3248 = vmatmul.msk.bf16.gmra.mxu1 %vm164_vm0, %v335_v37  ;;  %v262_v37 = vpop.f32.mrf.mxu2 }
  0xa6   :  { %v232_v40 = vpop.f32.mrf.mxu0  ;;  %v252_v18 = vpop.f32.mrf.mxu1 }
  0xa7   :  { %v233_v46 = vadd.f32 %v3759_v16, %v232_v40  ;;  %v253_v30 = vadd.f32 %v3759_v16, %v252_v18 }
  0xa9   :  { %v3829_v49 = vmax.f32 %v233_v46, 0.0  ;;  %v3909_v33 = vmax.f32 %v253_v30, 0.0  ;;  %v665_v30 = vld [vmem:[%s6412_s5 + $0x10] sm:$0xff] }
  0xaa   :  { %776 = vmatpush.msrb.mxu2 %v665_v30 }
  0xad   :  { %v264_v42 = vpop.f32.mrf.mxu2 }
  0xae   :  { %v234_v47 = vpop.f32.mrf.mxu0  ;;  %v254_v28 = vpop.f32.mrf.mxu1 }
  0xaf   :  { %v235_v48 = vadd.f32 %v3759_v16, %v234_v47  ;;  %v255_v31 = vadd.f32 %v3759_v16, %v254_v28  ;;  %v263_v47 = vadd.f32 %v3759_v16, %v262_v37  ;;  %v3990_v28 = vpop.permute.xlu0 %2763  ;;  %v4003_v37 = vpop.permute.xlu1 %2766 }
  0xb0   :  { %6498 = vst [vmem:[#allocation8_spill] sm:$0xff] %v3990_v28 }
  0xb1   :  { %v3831_v50 = vmax.f32 %v235_v48, 0.0  ;;  %v3911_v34 = vmax.f32 %v255_v31, 0.0  ;;  %v265_v48 = vadd.f32 %v3759_v16, %v264_v42  ;;  %v3927_v51 = vmax.f32 %v263_v47, 0.0  ;;  %6499 = vst [vmem:[#allocation9_spill] sm:$0xff] %v4003_v37 }
  0xb2   :  { %v285_v42 = vadd.f32 %v3759_v16, %v284_v21 }
  0xb3   :  { %v336_v52 = vpack.c.bf16 %v3831_v50, %v3829_v49  ;;  %6492 = vst [vmem:[#allocation2_spill] sm:$0xff] %v3911_v34  ;;  %v340_v38 = vpack.c.bf16 %v3911_v34, %v3909_v33 }
  0xb4   :  { %6495 = vst [vmem:[#allocation5_spill] sm:$0xff] %v3927_v51 }
  0xb5   :  { %3249 = vmatmul.msk.bf16.gmra.mxu1 %vm164_vm0, %v336_v52  ;;  %v267_v46 = vpop.f32.mrf.mxu2  ;;  %v3929_v52 = vmax.f32 %v265_v48, 0.0 }
  0xb6   :  { %v237_v55 = vpop.f32.mrf.mxu0  ;;  %v257_v32 = vpop.f32.mrf.mxu1  ;;  %v268_v58 = vadd.f32 %v3759_v16, %v267_v46  ;;  %v4018_v46 = vmax.f32 %v285_v42, 0.0 }
  0xb7   :  { %v238_v62 = vadd.f32 %v3759_v16, %v237_v55  ;;  %v258_v40 = vadd.f32 %v3759_v16, %v257_v32  ;;  %6496 = vst [vmem:[#allocation6_spill] sm:$0xff] %v3929_v52  ;;  %v342_v55 = vpack.c.bf16 %v3929_v52, %v3927_v51  ;;  %v287_v32 = vpop.f32.mrf.mxu3  ;;  %v4020_v48 = vpop.permute.xlu1 %2772 }
  0xb8   :  { %v3945_v60 = vmax.f32 %v268_v58, 0.0  ;;  %6502 = vst [vmem:[#allocation12_spill] sm:$0xff] %v4020_v48 }
  0xb9   :  { %v3860_v1 = vmax.f32 %v238_v62, 0.0  ;;  %v3918_v43 = vmax.f32 %v258_v40, 0.0  ;;  %v4009_v40 = vpop.permute.xlu0 %2784 }
  0xba   :  { %6497 = vst [vmem:[#allocation7_spill] sm:$0xff] %v3945_v60 }
  0xbb   :  { %6493 = vst [vmem:[#allocation3_spill] sm:$0xff] %v3918_v43 }
  0xbc   :  { %6501 = vst [vmem:[#allocation11_spill] sm:$0xff] %v4009_v40 }
  0xbd   :  { %v269_v53 = vpop.f32.mrf.mxu2 }
  0xbe   :  { %v239_v63 = vpop.f32.mrf.mxu0  ;;  %v259_v39 = vpop.f32.mrf.mxu1  ;;  %v270_v59 = vadd.f32 %v3759_v16, %v269_v53 }
  0xbf   :  { %v240_v0 = vadd.f32 %v3759_v16, %v239_v63  ;;  %v260_v41 = vadd.f32 %v3759_v16, %v259_v39  ;;  %v289_v47 = vpop.f32.mrf.mxu3 }
  0xc0   :  { %v3947_v61 = vmax.f32 %v270_v59, 0.0 }
  0xc1   :  { %v3862_v2 = vmax.f32 %v240_v0, 0.0  ;;  %v3920_v44 = vmax.f32 %v260_v41, 0.0  ;;  %v283_v41 = vadd.f32 %v3759_v16, %v282_v10  ;;  %v4034_v59 = vpop.permute.xlu0 %2793 }
  0xc2   :  { %v343_v63 = vpack.c.bf16 %v3947_v61, %v3945_v60  ;;  %6504 = vst [vmem:[#allocation14_spill] sm:$0xff] %v4034_v59 }
  0xc3   :  { %v337_v3 = vpack.c.bf16 %v3862_v2, %v3860_v1  ;;  %6494 = vst [vmem:[#allocation4_spill] sm:$0xff] %v3920_v44  ;;  %v341_v45 = vpack.c.bf16 %v3920_v44, %v3918_v43 }
  0xc5   :  { %3250 = vmatmul.msk.bf16.gmra.mxu1 %vm164_vm0, %v337_v3  ;;  %v272_v57 = vpop.f32.mrf.mxu2 }
  0xc6   :  { %v273_v4 = vadd.f32 %v3759_v16, %v272_v57 }
  0xc8   :  { %v3963_v7 = vmax.f32 %v273_v4, 0.0  ;;  %v4039_v4 = vpop.permute.xlu1 %2778 }
  0xc9   :  { %6505 = vst [vmem:[#allocation15_spill] sm:$0xff] %v4039_v4  ;;  %v4048_v11 = vpop.permute.xlu0 %2802 }
  0xca   :  { %6507 = vst [vmem:[#allocation17_spill] sm:$0xff] %v4048_v11 }
  0xcd   :  { %v274_v0 = vpop.f32.mrf.mxu2 }
  0xce   :  { %v275_v5 = vadd.f32 %v3759_v16, %v274_v0  ;;  %v292_v0 = vpop.f32.mrf.mxu3 }
  0xd0   :  { %v3965_v8 = vmax.f32 %v275_v5, 0.0  ;;  %v288_v5 = vadd.f32 %v3759_v16, %v287_v32 }
  0xd2   :  { %v344_v14 = vpack.c.bf16 %v3965_v8, %v3963_v7 }
  0xd5   :  { %3251 = vmatmul.msk.bf16.gmra.mxu1 %vm164_vm0, %v338_v15  ;;  %v277_v6 = vpop.f32.mrf.mxu2 }
  0xd6   :  { %v278_v18 = vadd.f32 %v3759_v16, %v277_v6  ;;  %v290_v6 = vadd.f32 %v3759_v16, %v289_v47  ;;  %v294_v30 = vpop.f32.mrf.mxu3  ;;  %v293_v47 = vadd.f32 %v3759_v16, %v292_v0 }
  0xd8   :  { %v3986_v22 = vmax.f32 %v278_v18, 0.0 }
  0xdd   :  { %v279_v15 = vpop.f32.mrf.mxu2 }
  0xde   :  { %v280_v20 = vadd.f32 %v3759_v16, %v279_v15  ;;  %v4052_v15 = vmax.f32 %v290_v6, 0.0  ;;  %v4080_v6 = vmax.f32 %v293_v47, 0.0 }
  0xe5   :  { %3252 = vmatmul.msk.bf16.gmra.mxu1 %vm164_vm0, %v339_v27  ;;  %v3988_v27 = vmax.f32 %v280_v20, 0.0  ;;  %v663_v20 = vld [vmem:[%s6412_s5] sm:$0xff] }
  0xe7   :  { %v345_v31 = vpack.c.bf16 %v3988_v27, %v3986_v22 }
  0xf5   :  { %3253 = vmatmul.msk.bf16.gmra.mxu1 %vm164_vm0, %v340_v38  ;;  %v4005_v38 = vpop.permute.xlu2 %2769 }
  0xf6   :  { %6500 = vst [vmem:[#allocation10_spill] sm:$0xff] %v4005_v38 }
  0xfd   :  { %v4027_v57 = vpop.permute.xlu2 %2775 }
  0xfe   :  { %6503 = vst [vmem:[#allocation13_spill] sm:$0xff] %v4027_v57 }
 0x105   :  { %3254 = vmatmul.msk.bf16.gmra.mxu1 %vm164_vm0, %v341_v45  ;;  %v4016_v45 = vmax.f32 %v283_v41, 0.0  ;;  %v4046_v10 = vpop.permute.xlu2 %2781  ;;  %v4069_v41 = vpop.permute.xlu0 %2811 }
 0x106   :  { %6506 = vst [vmem:[#allocation16_spill] sm:$0xff] %v4046_v10 }
 0x107   :  { %v346_v58 = vpack.c.bf16 %v4018_v46, %v4016_v45  ;;  %6510 = vst [vmem:[#allocation20_spill] sm:$0xff] %v4069_v41 }
 0x10d   :  { %v4067_v32 = vpop.permute.xlu2 %2790  ;;  %v4088_v41 = vpop.permute.xlu0 %2820 }
 0x10e   :  { %6509 = vst [vmem:[#allocation19_spill] sm:$0xff] %v4067_v32 }
 0x10f   :  { %6513 = vst [vmem:[#allocation23_spill] sm:$0xff] %v4088_v41 }
 0x112   :  { %v3931_v54 = vpop.f32.mrf.mxu1 }
 0x113   :  { %1007 = vperm.xlu2 %3380, %v3931_v54   ;;  %535 = vrot.lane.b32.xlu0 %v3931_v54, %s3653_s19 }
 0x115   :  { %3255 = vmatmul.msk.bf16.gmra.mxu1 %vm164_vm0, %v342_v55  ;;  %v664_v55 = vld [vmem:[%s6412_s5 + $0x8] sm:$0xff] }
 0x116   :  { %777 = vmatpush.msrb.mxu2 %v664_v55  ;;  %v295_v55 = vadd.f32 %v3759_v16, %v294_v30 }
 0x118   :  { %778 = vmatpush.msrb.mxu2 %v663_v20  ;;  %v4082_v20 = vmax.f32 %v295_v55, 0.0 }
 0x11a   :  { %v3939_v56 = vpop.f32.mrf.mxu1  ;;  %v348_v0 = vpack.c.bf16 %v4082_v20, %v4080_v6 }
 0x11b   :  { %537 = vrot.lane.b32.xlu0 %v3939_v56, %s3653_s19 }
 0x122   :  { %v3949_v62 = vpop.f32.mrf.mxu1 }
 0x123   :  { %1011 = vperm.xlu0 %3381, %v3939_v56   ;;  %539 = vrot.lane.b32.xlu1 %v3949_v62, %s3653_s19 }
 0x125   :  { %3256 = vmatmul.msk.bf16.gmra.mxu1 %vm164_vm0, %v343_v63 }
 0x12a   :  { %v3957_v3 = vpop.f32.mrf.mxu1 }
 0x12b   :  { %1015 = vperm.xlu1 %3382, %v3949_v62   ;;  %1019 = vperm.xlu2 %3380, %v3957_v3  }
 0x132   :  { %v3967_v9 = vpop.f32.mrf.mxu1 }
 0x133   :  { %541 = vrot.lane.b32.xlu1 %v3957_v3, %s3653_s19  ;;  %543 = vrot.lane.b32.xlu2 %v3967_v9, %s3653_s19 }
 0x135   :  { %3257 = vmatmul.msk.bf16.gmra.mxu1 %vm164_vm0, %v344_v14  ;;  %v4050_v14 = vmax.f32 %v288_v5, 0.0 }
 0x137   :  { %v347_v21 = vpack.c.bf16 %v4052_v15, %v4050_v14 }
 0x13a   :  { %v3979_v17 = vpop.f32.mrf.mxu1 }
 0x13b   :  { %1023 = vperm.xlu1 %3382, %v3967_v9   ;;  %545 = vrot.lane.b32.xlu2 %v3979_v17, %s3653_s19 }
 0x142   :  { %v3992_v29 = vpop.f32.mrf.mxu1 }
 0x143   :  { %1027 = vperm.xlu2 %3380, %v3979_v17   ;;  %547 = vrot.lane.b32.xlu0 %v3992_v29, %s3653_s19 }
 0x145   :  { %3258 = vmatmul.msk.bf16.gmra.mxu1 %vm164_vm0, %v345_v31  ;;  %v4064_v31 = vpop.permute.xlu1 %2787 }
 0x146   :  { %6508 = vst [vmem:[#allocation18_spill] sm:$0xff] %v4064_v31 }
 0x14a   :  { %v4007_v39 = vpop.f32.mrf.mxu1 }
 0x14b   :  { %1031 = vperm.xlu0 %3381, %v3992_v29   ;;  %549 = vrot.lane.b32.xlu1 %v4007_v39, %s3653_s19 }
 0x14d   :  { %v4078_v5 = vpop.permute.xlu1 %2796 }
 0x14e   :  { %6511 = vst [vmem:[#allocation21_spill] sm:$0xff] %v4078_v5  ;;  %v4107_v5 = vpop.permute.xlu0 %2829 }
 0x14f   :  { %6517 = vst [vmem:[#allocation27_spill] sm:$0xff] %v4107_v5 }
 0x152   :  { %v4022_v53 = vpop.f32.mrf.mxu1 }
 0x153   :  { %1035 = vperm.xlu1 %3382, %v4007_v39   ;;  %551 = vrot.lane.b32.xlu2 %v4022_v53, %s3653_s19 }
 0x155   :  { %3259 = vmatmul.msk.bf16.gmra.mxu1 %vm164_vm0, %v346_v58  ;;  %v297_v58 = vpop.f32.mrf.mxu3  ;;  %v4096_v47 = vpop.permute.xlu1 %2805 }
 0x156   :  { %6514 = vst [vmem:[#allocation24_spill] sm:$0xff] %v4096_v47 }
 0x15a   :  { %v4037_v63 = vpop.f32.mrf.mxu1 }
 0x15b   :  { %1039 = vperm.xlu2 %3380, %v4022_v53   ;;  %553 = vrot.lane.b32.xlu0 %v4037_v63, %s3653_s19 }
 0x15d   :  { %v299_v30 = vpop.f32.mrf.mxu3  ;;  %v4115_v32 = vpop.permute.xlu1 %2814 }
 0x15e   :  { %v300_v41 = vadd.f32 %v3759_v16, %v299_v30  ;;  %6521 = vst [vmem:[#allocation31_spill] sm:$0xff] %v4115_v32 }
 0x162   :  { %v4054_v18 = vpop.f32.mrf.mxu1 }
 0x163   :  { %1043 = vperm.xlu0 %3381, %v4037_v63   ;;  %555 = vrot.lane.b32.xlu1 %v4054_v18, %s3653_s19 }
 0x165   :  { %3260 = vmatmul.msk.bf16.gmra.mxu1 %vm164_vm0, %v347_v21  ;;  %v4084_v21 = vpop.permute.xlu2 %2799  ;;  %v4132_v5 = vpop.permute.xlu1 %2823 }
 0x166   :  { %6512 = vst [vmem:[#allocation22_spill] sm:$0xff] %v4084_v21  ;;  %v298_v21 = vadd.f32 %v3759_v16, %v297_v58 }
 0x167   :  { %6524 = vst [vmem:[#allocation34_spill] sm:$0xff] %v4132_v5 }
 0x168   :  { %v4109_v59 = vmax.f32 %v298_v21, 0.0 }
 0x16a   :  { %v4071_v42 = vpop.f32.mrf.mxu1  ;;  %6518 = vst [vmem:[#allocation28_spill] sm:$0xff] %v4109_v59 }
 0x16b   :  { %1047 = vperm.xlu1 %3382, %v4054_v18   ;;  %557 = vrot.lane.b32.xlu2 %v4071_v42, %s3653_s19 }
 0x16d   :  { %v4100_v11 = vpop.permute.xlu2 %2808 }
 0x16e   :  { %6516 = vst [vmem:[#allocation26_spill] sm:$0xff] %v4100_v11 }
 0x172   :  { %v4086_v19 = vpop.f32.mrf.mxu1 }
 0x173   :  { %1051 = vperm.xlu2 %3380, %v4071_v42   ;;  %559 = vrot.lane.b32.xlu0 %v4086_v19, %s3653_s19 }
 0x175   :  { %3261 = vmatmul.msk.bf16.gmra.mxu1 %vm164_vm0, %v348_v0  ;;  %v4111_v0 = vmax.f32 %v300_v41, 0.0  ;;  %v4122_v58 = vpop.permute.xlu2 %2817 }
 0x176   :  { %6522 = vst [vmem:[#allocation32_spill] sm:$0xff] %v4122_v58 }
 0x177   :  { %6519 = vst [vmem:[#allocation29_spill] sm:$0xff] %v4111_v0  ;;  %v349_v16 = vpack.c.bf16 %v4111_v0, %v4109_v59 }
 0x17a   :  { %v4098_v55 = vpop.f32.mrf.mxu1 }
 0x17b   :  { %6515 = vst [vmem:[#allocation25_spill] sm:$0xff] %v4098_v55  ;;  %1055 = vperm.xlu0 %3381, %v4086_v19   ;;  %561 = vrot.lane.b32.xlu1 %v4098_v55, %s3653_s19 }
 0x17d   :  { %v4135_v58 = vpop.permute.xlu2 %2826 }
 0x17e   :  { %6525 = vst [vmem:[#allocation35_spill] sm:$0xff] %v4135_v58 }
 0x182   :  { %v4113_v47 = vpop.f32.mrf.mxu1 }
 0x183   :  { %6520 = vst [vmem:[#allocation30_spill] sm:$0xff] %v4113_v47  ;;  %1059 = vperm.xlu1 %3382, %v4098_v55   ;;  %563 = vrot.lane.b32.xlu2 %v4113_v47, %s3653_s19 }
 0x185   :  { %v536_v30 = vpop.permute.xlu0 %535  ;;  %3262 = vmatmul.msk.bf16.gmra.mxu1 %vm164_vm0, %v349_v16  ;;  %v4144_v31 = vpop.permute.xlu2 %1007 }
 0x186   :  { %v631_v41 = vmul.f32 %v536_v30, %v3773_v23 }
 0x188   :  { %3263 = vmatmul.msk.f32.vlgmr.msrb.gmra.mxu2 %vm164_vm0, %v631_v41 }
 0x18a   :  { %v4127_v21 = vpop.f32.mrf.mxu1 }
 0x18b   :  { %6523 = vst [vmem:[#allocation33_spill] sm:$0xff] %v4127_v21  ;;  %1063 = vperm.xlu2 %3380, %v4113_v47   ;;  %565 = vrot.lane.b32.xlu0 %v4127_v21, %s3653_s19 }
 0x18d   :  { %v538_v32 = vpop.permute.xlu0 %537 }
 0x18e   :  { %v632_v11 = vmul.f32 %v538_v32, %v3775_v24  ;;  %v4154_v32 = vpop.permute.xlu2 %1019 }
 0x190   :  { %3264 = vmatmul.msk.f32.gmra.mxu2 %vm164_vm0, %v632_v11 }
 0x192   :  { %v4138_v16 = vpop.f32.mrf.mxu1 }
 0x193   :  { %6526 = vst [vmem:[#allocation36_spill] sm:$0xff] %v4138_v16  ;;  %1067 = vperm.xlu0 %3381, %v4127_v21   ;;  %567 = vrot.lane.b32.xlu1 %v4138_v16, %s3653_s19 }
 0x195   :  { %v540_v30 = vpop.permute.xlu1 %539  ;;  %v4172_v57 = vpop.permute.xlu0 %1011 }
 0x196   :  { %v633_v41 = vmul.f32 %v540_v30, %v3798_v35  ;;  %v544_v10 = vpop.permute.xlu2 %543 }
 0x197   :  { %v635_v48 = vmul.f32 %v544_v10, %v3829_v49 }
 0x198   :  { %3265 = vmatmul.msk.f32.gmra.mxu2 %vm164_vm0, %v633_v41 }
 0x19a   :  { %v4147_v5 = vpop.f32.mrf.mxu1 }
 0x19b   :  { %6527 = vst [vmem:[#allocation37_spill] sm:$0xff] %v4147_v5  ;;  %1071 = vperm.xlu1 %3382, %v4138_v16   ;;  %569 = vrot.lane.b32.xlu2 %v4147_v5, %s3653_s19 }
 0x19d   :  { %v4152_v11 = vpop.permute.xlu1 %1015 }
 0x19e   :  { %v546_v28 = vpop.permute.xlu2 %545 }
 0x1a2   :  { %v4156_v58 = vpop.f32.mrf.mxu1 }
 0x1a3   :  { %6528 = vst [vmem:[#allocation38_spill] sm:$0xff] %v4156_v58  ;;  %1075 = vperm.xlu2 %3380, %v4147_v5   ;;  %571 = vrot.lane.b32.xlu0 %v4156_v58, %s3653_s19 }
 0x1a5   :  { %v542_v30 = vpop.permute.xlu1 %541 }
 0x1a6   :  { %v634_v41 = vmul.f32 %v542_v30, %v3800_v36  ;;  %v636_v30 = vmul.f32 %v546_v28, %v3831_v50 }
 0x1a8   :  { %3266 = vmatmul.msk.f32.gmra.mxu2 %vm164_vm0, %v634_v41 }
 0x1aa   :  { %v4163_v40 = vpop.f32.mrf.mxu1 }
 0x1ab   :  { %6529 = vst [vmem:[#allocation39_spill] sm:$0xff] %v4163_v40  ;;  %1079 = vperm.xlu0 %3381, %v4156_v58   ;;  %573 = vrot.lane.b32.xlu1 %v4163_v40, %s3653_s19 }
 0x1ad   :  { %v4181_v38 = vpop.permute.xlu1 %1023 }
 0x1b0   :  { %3267 = vmatmul.msk.f32.gmra.mxu2 %vm164_vm0, %v635_v48 }
 0x1b2   :  { %v4170_v4 = vpop.f32.mrf.mxu1 }
 0x1b3   :  { %6530 = vst [vmem:[#allocation40_spill] sm:$0xff] %v4170_v4  ;;  %1083 = vperm.xlu1 %3382, %v4163_v40   ;;  %575 = vrot.lane.b32.xlu2 %v4170_v4, %s3653_s19  ;;  %v4190_v40 = vpop.permute.xlu2 %1027 }
 0x1b5   :  { %v548_v10 = vpop.permute.xlu0 %547 }
 0x1b6   :  { %v637_v48 = vmul.f32 %v548_v10, %v3860_v1 }
 0x1b8   :  { %3268 = vmatmul.msk.f32.gmra.mxu2 %vm164_vm0, %v636_v30 }
 0x1ba   :  { %v4179_v41 = vpop.f32.mrf.mxu1 }
 0x1bb   :  { %6531 = vst [vmem:[#allocation41_spill] sm:$0xff] %v4179_v41  ;;  %1087 = vperm.xlu2 %3380, %v4170_v4   ;;  %577 = vrot.lane.b32.xlu0 %v4179_v41, %s3653_s19  ;;  %v552_v58 = vpop.permute.xlu2 %551 }
 0x1bd   :  { %v550_v28 = vpop.permute.xlu1 %549  ;;  %v4199_v10 = vpop.permute.xlu0 %1031 }
 0x1be   :  { %v638_v30 = vmul.f32 %v550_v28, %v3862_v2 }
 0x1c0   :  { %3269 = vmatmul.msk.f32.gmra.mxu2 %vm164_vm0, %v637_v48  ;;  %v639_v48 = vmul.f32 %v552_v58, %v3885_v12 }
 0x1c2   :  { %v4188_v37 = vpop.f32.mrf.mxu1 }
 0x1c3   :  { %6532 = vst [vmem:[#allocation42_spill] sm:$0xff] %v4188_v37  ;;  %1091 = vperm.xlu0 %3381, %v4179_v41   ;;  %579 = vrot.lane.b32.xlu1 %v4188_v37, %s3653_s19  ;;  %v4217_v16 = vpop.permute.xlu2 %1039 }
 0x1c5   :  { %v4208_v5 = vpop.permute.xlu1 %1035 }
 0x1c8   :  { %3270 = vmatmul.msk.f32.gmra.mxu2 %vm164_vm0, %v638_v30 }
 0x1ca   :  { %v4197_v4 = vpop.f32.mrf.mxu1 }
 0x1cb   :  { %6533 = vst [vmem:[#allocation43_spill] sm:$0xff] %v4197_v4  ;;  %1095 = vperm.xlu1 %3382, %v4188_v37   ;;  %581 = vrot.lane.b32.xlu2 %v4197_v4, %s3653_s19  ;;  %v558_v21 = vpop.permute.xlu2 %557 }
 0x1cd   :  { %v554_v28 = vpop.permute.xlu0 %553 }
 0x1ce   :  { %v640_v30 = vmul.f32 %v554_v28, %v3887_v13 }
 0x1d0   :  { %3271 = vmatmul.msk.f32.gmra.mxu2 %vm164_vm0, %v639_v48 }
 0x1d2   :  { %v4206_v41 = vpop.f32.mrf.mxu1 }
 0x1d3   :  { %6534 = vst [vmem:[#allocation44_spill] sm:$0xff] %v4206_v41  ;;  %1099 = vperm.xlu2 %3380, %v4197_v4   ;;  %583 = vrot.lane.b32.xlu0 %v4206_v41, %s3653_s19  ;;  %v4244_v0 = vpop.permute.xlu2 %1051 }
 0x1d5   :  { %v556_v58 = vpop.permute.xlu1 %555  ;;  %v4226_v28 = vpop.permute.xlu0 %1043 }
 0x1d6   :  { %v641_v48 = vmul.f32 %v556_v58, %v3900_v25 }
 0x1d8   :  { %3272 = vmatmul.msk.f32.gmra.mxu2 %vm164_vm0, %v640_v30  ;;  %v642_v30 = vmul.f32 %v558_v21, %v3902_v26 }
 0x1da   :  { %v4215_v37 = vpop.f32.mrf.mxu1 }
 0x1db   :  { %6535 = vst [vmem:[#allocation45_spill] sm:$0xff] %v4215_v37  ;;  %1103 = vperm.xlu0 %3381, %v4206_v41   ;;  %585 = vrot.lane.b32.xlu1 %v4215_v37, %s3653_s19 }
 0x1dd   :  { %v4235_v47 = vpop.permute.xlu1 %1047  ;;  %v564_v55 = vpop.permute.xlu2 %563 }
 0x1e0   :  { %3273 = vmatmul.msk.f32.gmra.mxu2 %vm164_vm0, %v641_v48 }
 0x1e2   :  { %v4224_v4 = vpop.f32.mrf.mxu1 }
 0x1e3   :  { %6536 = vst [vmem:[#allocation46_spill] sm:$0xff] %v4224_v4  ;;  %1107 = vperm.xlu1 %3382, %v4215_v37   ;;  %587 = vrot.lane.b32.xlu2 %v4224_v4, %s3653_s19 }
 0x1e5   :  { %v560_v58 = vpop.permute.xlu0 %559 }
 0x1e6   :  { %v643_v48 = vmul.f32 %v560_v58, %v3909_v33 }
 0x1e8   :  { %3274 = vmatmul.msk.f32.gmra.mxu2 %vm164_vm0, %v642_v30 }
 0x1ea   :  { %v4233_v41 = vpop.f32.mrf.mxu1 }
 0x1eb   :  { %6537 = vst [vmem:[#allocation47_spill] sm:$0xff] %v4233_v41  ;;  %1111 = vperm.xlu2 %3380, %v4224_v4   ;;  %589 = vrot.lane.b32.xlu0 %v4233_v41, %s3653_s19 }
 0x1ed   :  { %v562_v21 = vpop.permute.xlu1 %561  ;;  %v4253_v58 = vpop.permute.xlu0 %1055 }
 0x1ee   :  { %v644_v30 = vmul.f32 %v562_v21, %v3911_v34  ;;  %6540 = vst [vmem:[#allocation50_spill] sm:$0xff] %v4253_v58  ;;  %v4271_v34 = vpop.permute.xlu2 %1063 }
 0x1ef   :  { %6544 = vst [vmem:[#allocation54_spill] sm:$0xff] %v4271_v34 }
 0x1f0   :  { %3275 = vmatmul.msk.f32.gmra.mxu2 %vm164_vm0, %v643_v48  ;;  %v645_v48 = vmul.f32 %v564_v55, %v3918_v43 }
 0x1f2   :  { %v4242_v37 = vpop.f32.mrf.mxu1 }
 0x1f3   :  { %6538 = vst [vmem:[#allocation48_spill] sm:$0xff] %v4242_v37  ;;  %1115 = vperm.xlu0 %3381, %v4233_v41   ;;  %591 = vrot.lane.b32.xlu1 %v4242_v37, %s3653_s19 }
 0x1f5   :  { %v4262_v59 = vpop.permute.xlu1 %1059 }
 0x1f6   :  { %6542 = vst [vmem:[#allocation52_spill] sm:$0xff] %v4262_v59 }
 0x1f8   :  { %3276 = vmatmul.msk.f32.gmra.mxu2 %vm164_vm0, %v644_v30 }
 0x1fa   :  { %v4251_v4 = vpop.f32.mrf.mxu1 }
 0x1fb   :  { %6539 = vst [vmem:[#allocation49_spill] sm:$0xff] %v4251_v4  ;;  %1119 = vperm.xlu1 %3382, %v4242_v37   ;;  %593 = vrot.lane.b32.xlu2 %v4251_v4, %s3653_s19 }
 0x1fd   :  { %v566_v21 = vpop.permute.xlu0 %565 }
 0x1fe   :  { %v646_v30 = vmul.f32 %v566_v21, %v3920_v44  ;;  %v570_v21 = vpop.permute.xlu2 %569 }
 0x200   :  { %3277 = vmatmul.msk.f32.gmra.mxu2 %vm164_vm0, %v645_v48  ;;  %v6545_v48 = vmov 0  }
 0x202   :  { %v4260_v41 = vpop.f32.mrf.mxu1 }
 0x203   :  { %6541 = vst [vmem:[#allocation51_spill] sm:$0xff] %v4260_v41  ;;  %1123 = vperm.xlu2 %3380, %v4251_v4   ;;  %595 = vrot.lane.b32.xlu0 %v4260_v41, %s3653_s19 }
 0x205   :  { %v568_v55 = vpop.permute.xlu1 %567  ;;  %v4279_v44 = vpop.permute.xlu0 %1067 }
 0x206   :  { %v647_v4 = vmul.f32 %v568_v55, %v3927_v51  ;;  %6546 = vst [vmem:[#allocation55_spill] sm:$0xff] %v4279_v44 }
 0x208   :  { %3278 = vmatmul.msk.f32.gmra.mxu2 %vm164_vm0, %v646_v30  ;;  %v648_v30 = vmul.f32 %v570_v21, %v3929_v52  ;;  %v4299_v21 = vld [vmem:[%s6408_s3 + $0x1] ss:$0 sm:$0xff] }
 0x20a   :  { %v4269_v37 = vpop.f32.mrf.mxu1 }
 0x20b   :  { %6543 = vst [vmem:[#allocation53_spill] sm:$0xff] %v4269_v37  ;;  %1127 = vperm.xlu0 %3381, %v4260_v41   ;;  %597 = vrot.lane.b32.xlu1 %v4269_v37, %s3653_s19  ;;  %v780_v43 = vpop.f32.mrf.mxu2 }
 0x20c   :  { %3384 = vset.pattern.permute.xlu2 %v6545_v48  ;;  %v876_v34 = vmul.f32 %v780_v43, %v3773_v23  ;;  %v4302_v43 = vpop.permute.xlu2 %1075 }
 0x20d   :  { %v4286_v59 = vpop.permute.xlu1 %1071  ;;  %6548 = vst [vmem:[#allocation57_spill] sm:$0xff] %v4302_v43 }
 0x20e   :  { %6547 = vst [vmem:[#allocation56_spill] sm:$0xff] %v4286_v59  ;;  %v908_v51 = vsub.f32 %v3931_v54, %v876_v34 }
 0x210   :  { %3279 = vmatmul.msk.f32.gmra.mxu2 %vm164_vm0, %v647_v4 }
 0x213   :  { %1131 = vperm.xlu1 %3382, %v4269_v37   ;;  %3385 = vset.pattern.permute.xlu0 %v6545_v48  ;;  %v783_v41 = vpop.f32.mrf.mxu2  ;;  %v4293_v37 = vld [vmem:[%s6408_s3 + $0x4] ss:$0 sm:$0xff] }
 0x214   :  { %v877_v52 = vmul.f32 %v783_v41, %v3775_v24 }
 0x215   :  { %v572_v55 = vpop.permute.xlu0 %571 }
 0x216   :  { %v649_v4 = vmul.f32 %v572_v55, %v3945_v60  ;;  %v941_v60 = vadd.f32 %v4299_v21, %v908_v51  ;;  %v909_v44 = vsub.f32 %v3939_v56, %v877_v52  ;;  %v975_v51 = vmul.f32 %v4293_v37, %v3775_v24 }
 0x217   :  { %v977_v52 = vmul.f32 %v4293_v37, %v3800_v36 }
 0x218   :  { %3280 = vmatmul.msk.f32.gmra.mxu2 %vm164_vm0, %v648_v30  ;;  %v1135_v56 = vmul.f32 %v4172_v57, %v975_v51 }
 0x21b   :  { %3383 = vset.pattern.permute.xlu1 %v6545_v48  ;;  %v974_v48 = vmul.f32 %v4293_v37, %v3773_v23  ;;  %v786_v30 = vpop.f32.mrf.mxu2 }
 0x21d   :  { %v574_v55 = vpop.permute.xlu1 %573  ;;  %v1134_v34 = vmul.f32 %v4144_v31, %v974_v48  ;;  %v4314_v43 = vpop.permute.xlu0 %1079  ;;  %v878_v31 = vmul.f32 %v786_v30, %v3798_v35 }
 0x21e   :  { %v650_v54 = vmul.f32 %v574_v55, %v3947_v61 }
 0x21f   :  { %v4310_v59 = vsub.f32 %v941_v60, %v1134_v34  ;;  %v942_v60 = vadd.f32 %v4299_v21, %v909_v44  ;;  %v1137_v34 = vmul.f32 %v4154_v32, %v977_v52  ;;  %v910_v24 = vsub.f32 %v3949_v62, %v878_v31 }
 0x220   :  { %3281 = vmatmul.msk.f32.gmra.mxu2 %vm164_vm0, %v649_v4  ;;  %v576_v4 = vpop.permute.xlu2 %575  ;;  %v978_v31 = vmul.f32 %v4293_v37, %v3829_v49 }
 0x221   :  { %v1198_v58 = vsel %vm164_vm0, %v4310_v59, 0.0  ;;  %v651_v48 = vmul.f32 %v576_v4, %v3963_v7 }
 0x225   :  { %v4334_v44 = vpop.permute.xlu1 %1083 }
 0x228   :  { %3282 = vmatmul.msk.f32.gmra.mxu2 %vm164_vm0, %v650_v54 }
 0x22b   :  { %v789_v23 = vpop.f32.mrf.mxu2 }
 0x22c   :  { %v879_v41 = vmul.f32 %v789_v23, %v3800_v36  ;;  %1199 = vadd.xlane.f32.xlu2 %v1198_v58  ;;  %v4332_v58 = vsub.f32 %v942_v60, %v1135_v56  ;;  %v976_v36 = vmul.f32 %v4293_v37, %v3798_v35  ;;  %v943_v23 = vadd.f32 %v4299_v21, %v910_v24 }
 0x22d   :  { %v578_v57 = vpop.permute.xlu0 %577  ;;  %v1138_v60 = vmul.f32 %v4181_v38, %v978_v31  ;;  %v979_v38 = vmul.f32 %v4293_v37, %v3831_v50 }
 0x22e   :  { %v911_v55 = vsub.f32 %v3957_v3, %v879_v41  ;;  %v1201_v32 = vsel %vm164_vm0, %v4332_v58, 0.0  ;;  %v1136_v51 = vmul.f32 %v4152_v11, %v976_v36  ;;  %v652_v35 = vmul.f32 %v578_v57, %v3965_v8 }
 0x22f   :  { %v1139_v57 = vmul.f32 %v4190_v40, %v979_v38 }
 0x230   :  { %3283 = vmatmul.msk.f32.gmra.mxu2 %vm164_vm0, %v651_v48  ;;  %v944_v30 = vadd.f32 %v4299_v21, %v911_v55  ;;  %v4354_v56 = vsub.f32 %v943_v23, %v1136_v51  ;;  %v4356_v48 = vpop.permute.xlu2 %1087 }
 0x232   :  { %v4336_v54 = vsub.f32 %v944_v30, %v1137_v34 }
 0x233   :  { %v792_v4 = vpop.f32.mrf.mxu2 }
 0x234   :  { %v880_v3 = vmul.f32 %v792_v4, %v3829_v49  ;;  %v1207_v62 = vsel %vm164_vm0, %v4336_v54, 0.0 }
 0x235   :  { %1208 = vadd.xlane.f32.xlu2 %v1207_v62  ;;  %1202 = vadd.xlane.f32.xlu0 %v1201_v32  ;;  %v580_v11 = vpop.permute.xlu1 %579  ;;  %v4374_v32 = vpop.permute.xlu0 %1091 }
 0x236   :  { %v912_v41 = vsub.f32 %v3967_v9, %v880_v3  ;;  %v1204_v9 = vsel %vm164_vm0, %v4354_v56, 0.0  ;;  %v653_v30 = vmul.f32 %v580_v11, %v3986_v22 }
 0x238   :  { %3284 = vmatmul.msk.f32.gmra.mxu2 %vm164_vm0, %v652_v35  ;;  %v945_v52 = vadd.f32 %v4299_v21, %v912_v41  ;;  %v582_v3 = vpop.permute.xlu2 %581 }
 0x239   :  { %v654_v40 = vmul.f32 %v582_v3, %v3988_v27 }
 0x23a   :  { %v4358_v55 = vsub.f32 %v945_v52, %v1138_v60 }
 0x23b   :  { %v795_v34 = vpop.f32.mrf.mxu2 }
 0x23c   :  { %v881_v49 = vmul.f32 %v795_v34, %v3831_v50  ;;  %v1210_v24 = vsel %vm164_vm0, %v4358_v55, 0.0 }
 0x23d   :  { %1211 = vadd.xlane.f32.xlu2 %v1210_v24  ;;  %1205 = vadd.xlane.f32.xlu1 %v1204_v9  ;;  %v4386_v60 = vpop.permute.xlu1 %1095 }
 0x23e   :  { %v913_v36 = vsub.f32 %v3979_v17, %v881_v49  ;;  %v980_v17 = vmul.f32 %v4293_v37, %v3860_v1 }
 0x240   :  { %3285 = vmatmul.msk.f32.gmra.mxu2 %vm164_vm0, %v653_v30  ;;  %v946_v4 = vadd.f32 %v4299_v21, %v913_v36  ;;  %v1140_v35 = vmul.f32 %v4199_v10, %v980_v17  ;;  %v4400_v30 = vpop.permute.xlu2 %1099 }
 0x242   :  { %v4372_v62 = vsub.f32 %v946_v4, %v1139_v57 }
 0x243   :  { %v798_v23 = vpop.f32.mrf.mxu2 }
 0x244   :  { %v882_v51 = vmul.f32 %v798_v23, %v3860_v1  ;;  %v1213_v50 = vsel %vm164_vm0, %v4372_v62, 0.0 }
 0x245   :  { %1214 = vadd.xlane.f32.xlu0 %v1213_v50  ;;  %v584_v11 = vpop.permute.xlu0 %583 }
 0x246   :  { %v914_v31 = vsub.f32 %v3992_v29, %v882_v51  ;;  %v981_v29 = vmul.f32 %v4293_v37, %v3862_v2  ;;  %v655_v10 = vmul.f32 %v584_v11, %v4016_v45 }
 0x248   :  { %3286 = vmatmul.msk.f32.gmra.mxu2 %vm164_vm0, %v654_v40  ;;  %v947_v41 = vadd.f32 %v4299_v21, %v914_v31  ;;  %v1141_v9 = vmul.f32 %v4208_v5, %v981_v29  ;;  %v588_v17 = vpop.permute.xlu2 %587 }
 0x24a   :  { %v4388_v52 = vsub.f32 %v947_v41, %v1140_v35 }
 0x24b   :  { %v801_v34 = vpop.f32.mrf.mxu2 }
 0x24c   :  { %v883_v49 = vmul.f32 %v801_v34, %v3862_v2  ;;  %v1216_v1 = vsel %vm164_vm0, %v4388_v52, 0.0 }
 0x24d   :  { %1217 = vadd.xlane.f32.xlu1 %v1216_v1  ;;  %v586_v57 = vpop.permute.xlu1 %585  ;;  %v4416_v31 = vpop.permute.xlu0 %1103 }
 0x24e   :  { %v915_v24 = vsub.f32 %v4007_v39, %v883_v49  ;;  %v982_v39 = vmul.f32 %v4293_v37, %v3885_v12  ;;  %v656_v5 = vmul.f32 %v586_v57, %v4018_v46 }
 0x250   :  { %3287 = vmatmul.msk.f32.gmra.mxu2 %vm164_vm0, %v655_v10  ;;  %v948_v38 = vadd.f32 %v4299_v21, %v915_v24  ;;  %v1142_v51 = vmul.f32 %v4217_v16, %v982_v39  ;;  %v657_v16 = vmul.f32 %v588_v17, %v4050_v14 }
 0x252   :  { %v4402_v36 = vsub.f32 %v948_v38, %v1141_v9 }
 0x253   :  { %v804_v4 = vpop.f32.mrf.mxu2 }
 0x254   :  { %v884_v3 = vmul.f32 %v804_v4, %v3885_v12  ;;  %v1219_v2 = vsel %vm164_vm0, %v4402_v36, 0.0 }
 0x255   :  { %1220 = vadd.xlane.f32.xlu2 %v1219_v2  ;;  %v4428_v1 = vpop.permute.xlu1 %1107 }
 0x256   :  { %v916_v23 = vsub.f32 %v4022_v53, %v884_v3  ;;  %v983_v53 = vmul.f32 %v4293_v37, %v3887_v13  ;;  %v4442_v3 = vpop.permute.xlu2 %1111 }
 0x258   :  { %3288 = vmatmul.msk.f32.gmra.mxu2 %vm164_vm0, %v656_v5  ;;  %v949_v50 = vadd.f32 %v4299_v21, %v916_v23  ;;  %v1143_v34 = vmul.f32 %v4226_v28, %v983_v53 }
 0x25a   :  { %v4414_v40 = vsub.f32 %v949_v50, %v1142_v51 }
 0x25b   :  { %v807_v35 = vpop.f32.mrf.mxu2 }
 0x25c   :  { %v885_v41 = vmul.f32 %v807_v35, %v3887_v13  ;;  %v1222_v12 = vsel %vm164_vm0, %v4414_v40, 0.0 }
 0x25d   :  { %1223 = vadd.xlane.f32.xlu0 %v1222_v12  ;;  %v590_v10 = vpop.permute.xlu0 %589 }
 0x25e   :  { %v917_v11 = vsub.f32 %v4037_v63, %v885_v41  ;;  %v984_v63 = vmul.f32 %v4293_v37, %v3900_v25  ;;  %v658_v28 = vmul.f32 %v590_v10, %v4052_v15  ;;  %v594_v35 = vpop.permute.xlu2 %593 }
 0x260   :  { %3289 = vmatmul.msk.f32.gmra.mxu2 %vm164_vm0, %v657_v16  ;;  %v950_v49 = vadd.f32 %v4299_v21, %v917_v11  ;;  %v1144_v57 = vmul.f32 %v4235_v47, %v984_v63 }
 0x262   :  { %v4430_v29 = vsub.f32 %v950_v49, %v1143_v34  ;;  %v6549_v34 = vld [vmem:[#allocation50_spill] sm:$0xff] }
 0x263   :  { %v810_v24 = vpop.f32.mrf.mxu2 }
 0x264   :  { %v886_v9 = vmul.f32 %v810_v24, %v3900_v25  ;;  %v1225_v13 = vsel %vm164_vm0, %v4430_v29, 0.0 }
 0x265   :  { %1226 = vadd.xlane.f32.xlu1 %v1225_v13  ;;  %v592_v39 = vpop.permute.xlu1 %591  ;;  %v4458_v12 = vpop.permute.xlu0 %1115 }
 0x266   :  { %v918_v38 = vsub.f32 %v4054_v18, %v886_v9  ;;  %v985_v18 = vmul.f32 %v4293_v37, %v3902_v26  ;;  %v659_v47 = vmul.f32 %v592_v39, %v4080_v6  ;;  %v6552_v39 = vld [vmem:[#allocation25_spill] sm:$0xff] }
 0x268   :  { %3290 = vmatmul.msk.f32.gmra.mxu2 %vm164_vm0, %v658_v28  ;;  %v951_v4 = vadd.f32 %v4299_v21, %v918_v38  ;;  %v1145_v50 = vmul.f32 %v4244_v0, %v985_v18  ;;  %v660_v0 = vmul.f32 %v594_v35, %v4082_v20  ;;  %v6550_v28 = vld [vmem:[#allocation2_spill] sm:$0xff] }
 0x26a   :  { %v4444_v2 = vsub.f32 %v951_v4, %v1144_v57  ;;  %v6551_v57 = vld [vmem:[#allocation28_spill] sm:$0xff] }
 0x26b   :  { %v813_v5 = vpop.f32.mrf.mxu2 }
 0x26c   :  { %v887_v23 = vmul.f32 %v813_v5, %v3902_v26  ;;  %v1228_v25 = vsel %vm164_vm0, %v4444_v2, 0.0 }
 0x26d   :  { %1229 = vadd.xlane.f32.xlu2 %v1228_v25  ;;  %v4470_v24 = vpop.permute.xlu1 %1119 }
 0x26e   :  { %v919_v51 = vsub.f32 %v4071_v42, %v887_v23  ;;  %v986_v42 = vmul.f32 %v4293_v37, %v3909_v33  ;;  %v6553_v23 = vld [vmem:[#allocation52_spill] sm:$0xff] }
 0x270   :  { %3291 = vmatmul.msk.f32.gmra.mxu2 %vm164_vm0, %v659_v47  ;;  %v952_v17 = vadd.f32 %v4299_v21, %v919_v51  ;;  %v1146_v49 = vmul.f32 %v6549_v34, %v986_v42  ;;  %v6555_v42 = vld [vmem:[#allocation29_spill] sm:$0xff] }
 0x272   :  { %v4456_v41 = vsub.f32 %v952_v17, %v1145_v50  ;;  %v6554_v17 = vld [vmem:[#allocation3_spill] sm:$0xff] }
 0x273   :  { %v816_v53 = vpop.f32.mrf.mxu2 }
 0x274   :  { %v888_v16 = vmul.f32 %v816_v53, %v3909_v33  ;;  %v1231_v26 = vsel %vm164_vm0, %v4456_v41, 0.0 }
 0x275   :  { %1232 = vadd.xlane.f32.xlu0 %v1231_v26  ;;  %v596_v13 = vpop.permute.xlu0 %595  ;;  %v988_v26 = vmul.f32 %v4293_v37, %v6554_v17 }
 0x276   :  { %v920_v11 = vsub.f32 %v4086_v19, %v888_v16  ;;  %v987_v19 = vmul.f32 %v4293_v37, %v6550_v28  ;;  %v661_v4 = vmul.f32 %v596_v13, %v6551_v57  ;;  %v3654_v16 = vmov 32.0  }
 0x277   :  { %3391 = vrcp.f32 %v3654_v16  ;;  %v6561_v16 = vld [vmem:[#allocation5_spill] sm:$0xff] }
 0x278   :  { %3292 = vmatmul.msk.f32.gmra.mxu2 %vm164_vm0, %v660_v0  ;;  %v953_v10 = vadd.f32 %v4299_v21, %v920_v11  ;;  %v1147_v25 = vmul.f32 %v6553_v23, %v987_v19  ;;  %v6556_v11 = vld [vmem:[#allocation30_spill] sm:$0xff]  ;;  %v6559_v23 = vld [vmem:[#allocation33_spill] sm:$0xff] }
 0x27a   :  { %v4472_v9 = vsub.f32 %v953_v10, %v1146_v49  ;;  %v6557_v49 = vld [vmem:[#allocation54_spill] sm:$0xff] }
 0x27b   :  { %v819_v63 = vpop.f32.mrf.mxu2  ;;  %v1148_v10 = vmul.f32 %v6557_v49, %v988_v26  ;;  %v6562_v49 = vld [vmem:[#allocation36_spill] sm:$0xff] }
 0x27c   :  { %v889_v38 = vmul.f32 %v819_v63, %v6550_v28  ;;  %v1234_v33 = vsel %vm164_vm0, %v4472_v9, 0.0 }
 0x27d   :  { %1235 = vadd.xlane.f32.xlu1 %v1234_v33  ;;  %v598_v51 = vpop.permute.xlu1 %597  ;;  %v3392_v63 = vpop.eup %3391  ;;  %v6558_v33 = vld [vmem:[#allocation4_spill] sm:$0xff] }
 0x27e   :  { %v921_v5 = vsub.f32 %v6552_v39, %v889_v38  ;;  %v662_v0 = vmul.f32 %v598_v51, %v6555_v42  ;;  %v1295_v39 = vmul.f32 32.0, %v3392_v63  ;;  %vm1299_vm1 = vweird.f32 %v3392_v63 }
 0x280   :  { %3293 = vmatmul.msk.f32.gmra.mxu2 %vm164_vm0, %v661_v4  ;;  %v954_v18 = vadd.f32 %v4299_v21, %v921_v5  ;;  %v989_v5 = vmul.f32 %v4293_v37, %v6558_v33 }
 0x282   :  { %v4484_v47 = vsub.f32 %v954_v18, %v1147_v25  ;;  %v6560_v18 = vld [vmem:[#allocation55_spill] sm:$0xff] }
 0x283   :  { %v822_v50 = vpop.f32.mrf.mxu2  ;;  %v1149_v51 = vmul.f32 %v6560_v18, %v989_v5  ;;  %v6564_v18 = vld [vmem:[#allocation6_spill] sm:$0xff] }
 0x284   :  { %v890_v35 = vmul.f32 %v822_v50, %v6554_v17  ;;  %v1237_v53 = vsel %vm164_vm0, %v4484_v47, 0.0  ;;  %v1296_v17 = vsub.f32 1.0, %v1295_v39 }
 0x285   :  { %1238 = vadd.xlane.f32.xlu2 %v1237_v53 }
 0x286   :  { %v922_v34 = vsub.f32 %v6556_v11, %v890_v35  ;;  %v1297_v11 = vmul.f32 %v3392_v63, %v1296_v17  ;;  %v4525_v17 = vpop.permute.xlu0 %1127 }
 0x288   :  { %3294 = vmatmul.msk.f32.gmra.mxu2 %vm164_vm0, %v662_v0  ;;  %v955_v13 = vadd.f32 %v4299_v21, %v922_v34  ;;  %v990_v34 = vmul.f32 %v4293_v37, %v6561_v16 }
 0x28a   :  { %v4496_v28 = vsub.f32 %v955_v13, %v1148_v10  ;;  %v4514_v13 = vpop.permute.xlu2 %1123 }
 0x28b   :  { %v825_v38 = vpop.f32.mrf.mxu2 }
 0x28c   :  { %v891_v19 = vmul.f32 %v825_v38, %v6558_v33  ;;  %v1240_v4 = vsel %vm164_vm0, %v4496_v28, 0.0  ;;  %v6563_v38 = vld [vmem:[#allocation56_spill] sm:$0xff] }
 0x28d   :  { %1241 = vadd.xlane.f32.xlu0 %v1240_v4  ;;  %v1150_v33 = vmul.f32 %v6563_v38, %v990_v34  ;;  %v1298_v4 = vadd.f32 %v3392_v63, %v1297_v11  ;;  %v4538_v38 = vpop.permute.xlu1 %1131 }
 0x28e   :  { %v923_v25 = vsub.f32 %v6559_v23, %v891_v19 }
 0x290   :  { %v956_v50 = vadd.f32 %v4299_v21, %v923_v25  ;;  %v4522_v25 = vsel %vm1299_vm1, %v3392_v63, %v1298_v4  ;;  %v991_v63 = vmul.f32 %v4293_v37, %v6564_v18  ;;  %v6567_v4 = vld [vmem:[#allocation57_spill] sm:$0xff] }
 0x292   :  { %v4506_v35 = vsub.f32 %v956_v50, %v1149_v51 }
 0x293   :  { %v828_v53 = vpop.f32.mrf.mxu2 }
 0x294   :  { %v892_v26 = vmul.f32 %v828_v53, %v6561_v16  ;;  %v1243_v0 = vsel %vm164_vm0, %v4506_v35, 0.0  ;;  %v6565_v16 = vld [vmem:[#allocation37_spill] sm:$0xff] }
 0x295   :  { %1244 = vadd.xlane.f32.xlu1 %v1243_v0 }
 0x296   :  { %v924_v10 = vsub.f32 %v6562_v49, %v892_v26 }
 0x298   :  { %v957_v19 = vadd.f32 %v4299_v21, %v924_v10 }
 0x29a   :  { %v4518_v39 = vsub.f32 %v957_v19, %v1150_v33  ;;  %v6566_v33 = vld [vmem:[#allocation7_spill] sm:$0xff] }
 0x29b   :  { %v831_v5 = vpop.f32.mrf.mxu2 }
 0x29c   :  { %v1246_v23 = vsel %vm164_vm0, %v4518_v39, 0.0  ;;  %v893_v51 = vmul.f32 %v831_v5, %v6564_v18  ;;  %v1151_v5 = vmul.f32 %v6567_v4, %v991_v63  ;;  %v6568_v18 = vld [vmem:[#allocation38_spill] sm:$0xff]  ;;  %v992_v4 = vmul.f32 %v4293_v37, %v6566_v33 }
 0x29d   :  { %1247 = vadd.xlane.f32.xlu2 %v1246_v23 }
 0x29e   :  { %v925_v26 = vsub.f32 %v6565_v16, %v893_v51 }
 0x29f   :  { %v1200_v50 = vpop.xlane.xlu2 %1199 }
 0x2a0   :  { %v1301_v53 = vmul.f32 %v4522_v25, %v1200_v50  ;;  %v958_v10 = vadd.f32 %v4299_v21, %v925_v26 }
 0x2a2   :  { %v4530_v0 = vsub.f32 %v4310_v59, %v1301_v53  ;;  %v4544_v53 = vsub.f32 %v958_v10, %v1151_v5 }
 0x2a3   :  { %v834_v11 = vpop.f32.mrf.mxu2 }
 0x2a4   :  { %v1365_v34 = vmul.f32 %v4530_v0, %v4530_v0  ;;  %v894_v19 = vmul.f32 %v834_v11, %v6566_v33  ;;  %v1249_v63 = vsel %vm164_vm0, %v4544_v53, 0.0 }
 0x2a6   :  { %v1397_v49 = vsel %vm164_vm0, %v1365_v34, 0.0  ;;  %v926_v16 = vsub.f32 %v6568_v18, %v894_v19 }
 0x2a7   :  { %1398 = vadd.xlane.f32.xlu0 %v1397_v49 }
 0x2a8   :  { %v1209_v59 = vpop.xlane.xlu2 %1208  ;;  %v1203_v23 = vpop.xlane.xlu0 %1202 }
 0x2a9   :  { %v1302_v51 = vmul.f32 %v4522_v25, %v1203_v23  ;;  %v1304_v50 = vmul.f32 %v4522_v25, %v1209_v59  ;;  %v1152_v23 = vmul.f32 %v4314_v43, %v992_v4  ;;  %v994_v4 = vmul.f32 %v4293_v37, %v3963_v7 }
 0x2ab   :  { %v4548_v34 = vsub.f32 %v4332_v58, %v1302_v51  ;;  %v837_v26 = vpop.f32.mrf.mxu2  ;;  %v4553_v49 = vsub.f32 %v4336_v54, %v1304_v50  ;;  %v959_v58 = vadd.f32 %v4299_v21, %v926_v16  ;;  %v6569_v50 = vld [vmem:[#allocation39_spill] sm:$0xff] }
 0x2ac   :  { %v895_v10 = vmul.f32 %v837_v26, %v3947_v61 }
 0x2ad   :  { %v1366_v11 = vmul.f32 %v4548_v34, %v4548_v34  ;;  %v1368_v51 = vmul.f32 %v4553_v49, %v4553_v49 }
 0x2ae   :  { %v927_v18 = vsub.f32 %v6569_v50, %v895_v10  ;;  %v6570_v10 = vld [vmem:[#allocation40_spill] sm:$0xff] }
 0x2af   :  { %1250 = vadd.xlane.f32.xlu0 %v1249_v63  ;;  %v1400_v19 = vsel %vm164_vm0, %v1366_v11, 0.0  ;;  %v4571_v63 = vsub.f32 %v959_v58, %v1152_v23 }
 0x2b0   :  { %v1212_v5 = vpop.xlane.xlu2 %1211  ;;  %1401 = vadd.xlane.f32.xlu1 %v1400_v19  ;;  %v1206_v59 = vpop.xlane.xlu1 %1205  ;;  %v993_v19 = vmul.f32 %v4293_v37, %v3947_v61 }
 0x2b1   :  { %v1303_v54 = vmul.f32 %v4522_v25, %v1206_v59  ;;  %v1305_v33 = vmul.f32 %v4522_v25, %v1212_v5  ;;  %v1406_v5 = vsel %vm164_vm0, %v1368_v51, 0.0  ;;  %v1252_v58 = vsel %vm164_vm0, %v4571_v63, 0.0 }
 0x2b2   :  { %v1153_v51 = vmul.f32 %v4334_v44, %v993_v19  ;;  %v995_v44 = vmul.f32 %v4293_v37, %v3965_v8 }
 0x2b3   :  { %v4569_v26 = vsub.f32 %v4354_v56, %v1303_v54  ;;  %v840_v11 = vpop.f32.mrf.mxu2  ;;  %v4583_v56 = vsub.f32 %v4358_v55, %v1305_v33  ;;  %v960_v54 = vadd.f32 %v4299_v21, %v927_v18 }
 0x2b4   :  { %v896_v16 = vmul.f32 %v840_v11, %v3963_v7  ;;  %v1154_v7 = vmul.f32 %v4356_v48, %v994_v4  ;;  %v6571_v48 = vld [vmem:[#allocation41_spill] sm:$0xff] }
 0x2b5   :  { %v1367_v43 = vmul.f32 %v4569_v26, %v4569_v26 }
 0x2b6   :  { %v928_v59 = vsub.f32 %v6570_v10, %v896_v16  ;;  %v1369_v16 = vmul.f32 %v4583_v56, %v4583_v56 }
 0x2b7   :  { %1407 = vadd.xlane.f32.xlu0 %v1406_v5  ;;  %v1403_v23 = vsel %vm164_vm0, %v1367_v43, 0.0  ;;  %v4597_v43 = vsub.f32 %v960_v54, %v1153_v51  ;;  %v1155_v54 = vmul.f32 %v4374_v32, %v995_v44  ;;  %v996_v32 = vmul.f32 %v4293_v37, %v3986_v22 }
 0x2b8   :  { %v1215_v50 = vpop.xlane.xlu0 %1214  ;;  %1253 = vadd.xlane.f32.xlu1 %v1252_v58  ;;  %1404 = vadd.xlane.f32.xlu2 %v1403_v23  ;;  %v961_v61 = vadd.f32 %v4299_v21, %v928_v59  ;;  %v1409_v59 = vsel %vm164_vm0, %v1369_v16, 0.0 }
 0x2b9   :  { %v1306_v55 = vmul.f32 %v4522_v25, %v1215_v50  ;;  %v1255_v5 = vsel %vm164_vm0, %v4597_v43, 0.0  ;;  %v1156_v44 = vmul.f32 %v4386_v60, %v996_v32 }
 0x2ba   :  { %v4592_v11 = vsub.f32 %v961_v61, %v1154_v7 }
 0x2bb   :  { %v843_v33 = vpop.f32.mrf.mxu2  ;;  %v4606_v19 = vsub.f32 %v4372_v62, %v1306_v55 }
 0x2bc   :  { %v897_v18 = vmul.f32 %v843_v33, %v3965_v8  ;;  %v1258_v10 = vsel %vm164_vm0, %v4592_v11, 0.0  ;;  %v6572_v33 = vld [vmem:[#allocation42_spill] sm:$0xff] }
 0x2bd   :  { %v1370_v61 = vmul.f32 %v4606_v19, %v4606_v19 }
 0x2be   :  { %v929_v4 = vsub.f32 %v6571_v48, %v897_v18 }
 0x2bf   :  { %1259 = vadd.xlane.f32.xlu0 %v1258_v10  ;;  %v1412_v18 = vsel %vm164_vm0, %v1370_v61, 0.0 }
 0x2c0   :  { %1410 = vadd.xlane.f32.xlu1 %v1409_v59  ;;  %1256 = vadd.xlane.f32.xlu2 %v1255_v5  ;;  %v1218_v58 = vpop.xlane.xlu1 %1217  ;;  %v962_v23 = vadd.f32 %v4299_v21, %v929_v4 }
 0x2c1   :  { %v1307_v7 = vmul.f32 %v4522_v25, %v1218_v58 }
 0x2c2   :  { %v4617_v50 = vsub.f32 %v962_v23, %v1155_v54 }
 0x2c3   :  { %v4615_v8 = vsub.f32 %v4388_v52, %v1307_v7  ;;  %v846_v62 = vpop.f32.mrf.mxu2  ;;  %v997_v7 = vmul.f32 %v4293_v37, %v3988_v27 }
 0x2c4   :  { %v898_v51 = vmul.f32 %v846_v62, %v3986_v22  ;;  %v1261_v52 = vsel %vm164_vm0, %v4617_v50, 0.0  ;;  %v6573_v62 = vld [vmem:[#allocation43_spill] sm:$0xff] }
 0x2c5   :  { %v1371_v55 = vmul.f32 %v4615_v8, %v4615_v8 }
 0x2c6   :  { %v930_v16 = vsub.f32 %v6572_v33, %v898_v51 }
 0x2c7   :  { %v1415_v48 = vsel %vm164_vm0, %v1371_v55, 0.0 }
 0x2c8   :  { %v1221_v4 = vpop.xlane.xlu2 %1220  ;;  %1262 = vadd.xlane.f32.xlu1 %v1261_v52  ;;  %1413 = vadd.xlane.f32.xlu2 %v1412_v18  ;;  %v963_v10 = vadd.f32 %v4299_v21, %v930_v16 }
 0x2c9   :  { %v1308_v59 = vmul.f32 %v4522_v25, %v1221_v4  ;;  %1416 = vadd.xlane.f32.xlu0 %v1415_v48  ;;  %v2754_v4 = vld [vmem:[%s6411_s1 + $0xc0] sm:$0xff] }
 0x2ca   :  { %v4637_v58 = vsub.f32 %v963_v10, %v1156_v44  ;;  %v2753_v10 = vld [vmem:[%s6411_s1 + $0xb8] sm:$0xff] }
 0x2cb   :  { %v4635_v5 = vsub.f32 %v4402_v36, %v1308_v59  ;;  %v849_v22 = vpop.f32.mrf.mxu2  ;;  %v1157_v36 = vmul.f32 %v4400_v30, %v997_v7 }
 0x2cc   :  { %v899_v23 = vmul.f32 %v849_v22, %v3988_v27  ;;  %v1264_v51 = vsel %vm164_vm0, %v4637_v58, 0.0 }
 0x2cd   :  { %v1372_v54 = vmul.f32 %v4635_v5, %v4635_v5 }
 0x2ce   :  { %v931_v61 = vsub.f32 %v6573_v62, %v899_v23  ;;  %v6574_v62 = vld [vmem:[#allocation44_spill] sm:$0xff] }
 0x2cf   :  { %v1418_v60 = vsel %vm164_vm0, %v1372_v54, 0.0 }
 0x2d0   :  { %1419 = vadd.xlane.f32.xlu1 %v1418_v60  ;;  %1265 = vadd.xlane.f32.xlu2 %v1264_v51  ;;  %v964_v55 = vadd.f32 %v4299_v21, %v931_v61  ;;  %v1224_v23 = vpop.xlane.xlu0 %1223 }
 0x2d1   :  { %v1309_v7 = vmul.f32 %v4522_v25, %v1224_v23 }
 0x2d2   :  { %v4650_v33 = vsub.f32 %v964_v55, %v1157_v36  ;;  %v998_v55 = vmul.f32 %v4293_v37, %v4016_v45 }
 0x2d3   :  { %v852_v30 = vpop.f32.mrf.mxu2  ;;  %v4674_v51 = vsub.f32 %v4414_v40, %v1309_v7 }
 0x2d4   :  { %v1267_v16 = vsel %vm164_vm0, %v4650_v33, 0.0  ;;  %v900_v54 = vmul.f32 %v852_v30, %v4016_v45  ;;  %v6575_v30 = vld [vmem:[#allocation45_spill] sm:$0xff]  ;;  %v999_v45 = vmul.f32 %v4293_v37, %v4018_v46 }
 0x2d5   :  { %1268 = vadd.xlane.f32.xlu0 %v1267_v16 }
 0x2d6   :  { %v932_v61 = vsub.f32 %v6574_v62, %v900_v54  ;;  %v1159_v62 = vmul.f32 %v4428_v1, %v999_v45  ;;  %v3305_v45 = vld [vmem:[%s6413_s6 + $0x10] sm:$0xf] }
 0x2d8   :  { %v1227_v27 = vpop.xlane.xlu1 %1226 }
 0x2d9   :  { %v1310_v32 = vmul.f32 %v4522_v25, %v1227_v27  ;;  %v965_v27 = vadd.f32 %v4299_v21, %v932_v61 }
 0x2db   :  { %v4656_v52 = vsub.f32 %v4430_v29, %v1310_v32  ;;  %v855_v44 = vpop.f32.mrf.mxu2  ;;  %v2755_v29 = vld [vmem:[%s6411_s1 + $0xc8] sm:$0xff] }
 0x2dc   :  { %v901_v36 = vmul.f32 %v855_v44, %v4018_v46 }
 0x2dd   :  { %v1374_v18 = vmul.f32 %v4656_v52, %v4656_v52 }
 0x2df   :  { %v1424_v48 = vsel %vm164_vm0, %v1374_v18, 0.0  ;;  %v1158_v18 = vmul.f32 %v4416_v31, %v998_v55  ;;  %v6576_v31 = vld [vmem:[#allocation46_spill] sm:$0xff] }
 0x2e0   :  { %1425 = vadd.xlane.f32.xlu0 %v1424_v48  ;;  %v1230_v32 = vpop.xlane.xlu2 %1229  ;;  %v933_v48 = vsub.f32 %v6575_v30, %v901_v36 }
 0x2e1   :  { %v1311_v40 = vmul.f32 %v4522_v25, %v1230_v32 }
 0x2e2   :  { %v966_v54 = vadd.f32 %v4299_v21, %v933_v48 }
 0x2e3   :  { %v858_v59 = vpop.f32.mrf.mxu2  ;;  %v4695_v61 = vsub.f32 %v4444_v2, %v1311_v40  ;;  %v6577_v2 = vld [vmem:[#allocation47_spill] sm:$0xff] }
 0x2e4   :  { %v4703_v32 = vsub.f32 %v966_v54, %v1159_v62 }
 0x2e8   :  { %2835 = vperm.xlu2 %3384, %v2754_v4   ;;  %v1233_v16 = vpop.xlane.xlu0 %1232  ;;  %v1373_v4 = vmul.f32 %v4674_v51, %v4674_v51 }
 0x2e9   :  { %2832 = vperm.xlu1 %3383, %v2753_v10   ;;  %v902_v10 = vmul.f32 %v858_v59, %v4050_v14 }
 0x2ea   :  { %v1421_v23 = vsel %vm164_vm0, %v1373_v4, 0.0 }
 0x2eb   :  { %v861_v22 = vpop.f32.mrf.mxu2  ;;  %v934_v7 = vsub.f32 %v6576_v31, %v902_v10 }
 0x2ec   :  { %v903_v59 = vmul.f32 %v861_v22, %v4052_v15  ;;  %v1375_v22 = vmul.f32 %v4695_v61, %v4695_v61 }
 0x2ed   :  { %v967_v1 = vadd.f32 %v4299_v21, %v934_v7 }
 0x2ee   :  { %v935_v30 = vsub.f32 %v6577_v2, %v903_v59  ;;  %v1427_v31 = vsel %vm164_vm0, %v1375_v22, 0.0  ;;  %v3307_v59 = vld [vmem:[%s6413_s6 + $0x18] sm:$0xf0] }
 0x2f0   :  { %v1236_v55 = vpop.xlane.xlu1 %1235  ;;  %v968_v7 = vadd.f32 %v4299_v21, %v935_v30 }
 0x2f1   :  { %v1313_v40 = vmul.f32 %v4522_v25, %v1236_v55 }
 0x2f3   :  { %v864_v60 = vpop.f32.mrf.mxu2  ;;  %v4743_v30 = vsub.f32 %v4472_v9, %v1313_v40  ;;  %v3364_v9 = vld [vmem:[%s6413_s6 + $0x4] sm:$0xf0] }
 0x2f4   :  { %2838 = vperm.xlu0 %3385, %v2755_v29   ;;  %v4686_v29 = vsub.f32 %v965_v27, %v1158_v18  ;;  %v1312_v27 = vmul.f32 %v4522_v25, %v1233_v16  ;;  %v1000_v18 = vmul.f32 %v4293_v37, %v4050_v14  ;;  %v904_v10 = vmul.f32 %v864_v60, %v4080_v6 }
 0x2f5   :  { %v1273_v16 = vsel %vm164_vm0, %v4703_v32, 0.0  ;;  %v1001_v60 = vmul.f32 %v4293_v37, %v4052_v15  ;;  %v6578_v15 = vld [vmem:[#allocation48_spill] sm:$0xff] }
 0x2f6   :  { %v1270_v46 = vsel %vm164_vm0, %v4686_v29, 0.0  ;;  %v1160_v48 = vmul.f32 %v4442_v3, %v1000_v18  ;;  %v4713_v4 = vsub.f32 %v4456_v41, %v1312_v27  ;;  %v3366_v3 = vld [vmem:[%s6413_s6 + $0x14] sm:$0xf0]  ;;  %v3365_v41 = vld [vmem:[%s6413_s6 + $0x14] sm:$0xf]  ;;  %v936_v2 = vsub.f32 %v6578_v15, %v904_v10 }
 0x2f7   :  { %v3306_v62 = vor.u32 %v3366_v3, %v3305_v45  ;;  %v3310_v18 = vor.u32 %v3365_v41, %v3307_v59  ;;  %v3297_v10 = vld [vmem:[%s6413_s6] sm:$0xf]  ;;  %v3299_v41 = vld [vmem:[%s6413_s6 + $0x8] sm:$0xf0] }
 0x2f8   :  { %v4719_v14 = vsub.f32 %v967_v1, %v1160_v48  ;;  %v1161_v1 = vmul.f32 %v4458_v12, %v1001_v60  ;;  %v1376_v22 = vmul.f32 %v4713_v4, %v4713_v4  ;;  %v3298_v40 = vor.u32 %v3364_v9, %v3297_v10 }
 0x2f9   :  { %2075 = vmatpush.bf16.msrb.mxu3 %v3306_v62  ;;  %2164 = vmatpush.bf16.msrb.mxu0 %v3310_v18  ;;  %v1002_v60 = vmul.f32 %v4293_v37, %v4080_v6  ;;  %v6579_v62 = vld [vmem:[#allocation49_spill] sm:$0xff] }
 0x2fa   :  { %v1276_v45 = vsel %vm164_vm0, %v4719_v14, 0.0  ;;  %v4751_v12 = vsub.f32 %v968_v7, %v1161_v1 }
 0x2fb   :  { %v867_v44 = vpop.f32.mrf.mxu2  ;;  %v1162_v18 = vmul.f32 %v4470_v24, %v1002_v60 }
 0x2fc   :  { %v905_v48 = vmul.f32 %v867_v44, %v4082_v20  ;;  %v3363_v44 = vld [vmem:[%s6413_s6 + $0x4] sm:$0xf]  ;;  %v1279_v15 = vsel %vm164_vm0, %v4751_v12, 0.0 }
 0x2fd   :  { %v3302_v7 = vor.u32 %v3363_v44, %v3299_v41  ;;  %2076 = vmatpush.bf16.msrb.mxu3 %v3298_v40 }
 0x2fe   :  { %v937_v59 = vsub.f32 %v6579_v62, %v905_v48  ;;  %v1004_v62 = vmul.f32 %v4293_v37, %v6551_v57 }
 0x2ff   :  { %2165 = vmatpush.bf16.msrb.mxu0 %v3302_v7 }
 0x300   :  { %v4698_v36 = vpop.xlane.xlu0 %1241  ;;  %v970_v40 = vadd.f32 %v4299_v21, %v937_v59 }
 0x308   :  { %v1245_v55 = vpop.xlane.xlu1 %1244 }
 0x311   :  { %1422 = vadd.xlane.f32.xlu2 %v1421_v23  ;;  %v870_v23 = vpop.f32.mrf.mxu2 }
 0x313   :  { %1271 = vadd.xlane.f32.xlu1 %v1270_v46  ;;  %v1239_v46 = vpop.xlane.xlu2 %1238 }
 0x314   :  { %v1314_v3 = vmul.f32 %v4522_v25, %v1239_v46  ;;  %v906_v46 = vmul.f32 %v870_v23, %v6551_v57  ;;  %v6581_v57 = vld [vmem:[#allocation53_spill] sm:$0xff] }
 0x316   :  { %v4776_v1 = vsub.f32 %v4484_v47, %v1314_v3  ;;  %v1003_v47 = vmul.f32 %v4293_v37, %v4082_v20  ;;  %v6580_v3 = vld [vmem:[#allocation51_spill] sm:$0xff]  ;;  %v1316_v20 = vmul.f32 %v4522_v25, %v1245_v55 }
 0x317   :  { %v938_v9 = vsub.f32 %v6580_v3, %v906_v46 }
 0x318   :  { %v1378_v60 = vmul.f32 %v4776_v1, %v4776_v1 }
 0x319   :  { %1274 = vadd.xlane.f32.xlu2 %v1273_v16  ;;  %v873_v48 = vpop.f32.mrf.mxu2 }
 0x31a   :  { %v1399_v54 = vpop.xlane.xlu0 %1398  ;;  %v907_v7 = vmul.f32 %v873_v48, %v6555_v42 }
 0x31b   :  { %v1493_v27 = vmul.f32 %v1399_v54, %v4522_v25  ;;  %1428 = vadd.xlane.f32.xlu1 %v1427_v31  ;;  %v1430_v54 = vsel %vm164_vm0, %v1376_v22, 0.0  ;;  %v969_v31 = vadd.f32 %v4299_v21, %v936_v2  ;;  %v1315_v2 = vmul.f32 %v4522_v25, %v4698_v36  ;;  %v1248_v23 = vpop.xlane.xlu2 %1247 }
 0x31d   :  { %v4746_v16 = vadd.f32 1e-05, %v1493_v27  ;;  %v1377_v27 = vmul.f32 %v4743_v30, %v4743_v30  ;;  %v4785_v10 = vsub.f32 %v969_v31, %v1162_v18  ;;  %v4799_v31 = vsub.f32 %v4496_v28, %v1315_v2 }
 0x31e   :  { %1277 = vadd.xlane.f32.xlu0 %v1276_v45  ;;  %v1164_v28 = vmul.f32 %v4525_v17, %v1004_v62  ;;  %v4814_v2 = vsub.f32 %v4506_v35, %v1316_v20  ;;  %v1005_v35 = vmul.f32 %v4293_v37, %v6555_v42 }
 0x31f   :  { %3393 = vrsqrt.f32 %v4746_v16  ;;  %v1433_v44 = vsel %vm164_vm0, %v1377_v27, 0.0  ;;  %v1282_v46 = vsel %vm164_vm0, %v4785_v10, 0.0  ;;  %v1379_v3 = vmul.f32 %v4799_v31, %v4799_v31 }
 0x320   :  { %vm1563_vm3 = vweird.f32 %v4746_v16 }
 0x321   :  { %1431 = vadd.xlane.f32.xlu2 %v1430_v54  ;;  %v1163_v54 = vmul.f32 %v4514_v13, %v1003_v47  ;;  %v971_v13 = vadd.f32 %v4299_v21, %v938_v9  ;;  %v1317_v9 = vmul.f32 %v4522_v25, %v1248_v23  ;;  %v1439_v42 = vsel %vm164_vm0, %v1379_v3, 0.0 }
 0x322   :  { %v4778_v6 = vpop.xlane.xlu0 %1250 }
 0x323   :  { %1280 = vadd.xlane.f32.xlu1 %v1279_v15  ;;  %v1402_v22 = vpop.xlane.xlu1 %1401  ;;  %v4808_v27 = vsub.f32 %v970_v40, %v1163_v54  ;;  %v1436_v15 = vsel %vm164_vm0, %v1378_v60, 0.0  ;;  %v4828_v60 = vsub.f32 %v971_v13, %v1164_v28  ;;  %v1318_v28 = vmul.f32 %v4522_v25, %v4778_v6  ;;  %v4862_v6 = vld [vmem:[%s6408_s3 + $0x2] ss:$0 sm:$0xff] }
 0x324   :  { %v1494_v45 = vmul.f32 %v1402_v22, %v4522_v25  ;;  %v939_v22 = vsub.f32 %v6581_v57, %v907_v7 }
 0x325   :  { %v3394_v24 = vpop.eup %3393 }
 0x326   :  { %v1558_v36 = vmul.f32 %v3394_v24, %v4746_v16  ;;  %v4793_v41 = vadd.f32 1e-05, %v1494_v45  ;;  %1434 = vadd.xlane.f32.xlu0 %v1433_v44  ;;  %vm1564_vm2 = vweird.f32 %v3394_v24  ;;  %v4844_v16 = vsub.f32 %v4518_v39, %v1317_v9 }
 0x327   :  { %vm4834_vm4 = vmor %vm1563_vm3, %vm1564_vm2  ;;  %v972_v13 = vadd.f32 %v4299_v21, %v939_v22  ;;  %v1288_v39 = vsel %vm164_vm0, %v4828_v60, 0.0 }
 0x328   :  { %v1559_v59 = vmul.f32 %v3394_v24, %v1558_v36  ;;  %3395 = vrsqrt.f32 %v4793_v41  ;;  %v1285_v36 = vsel %vm164_vm0, %v4808_v27, 0.0  ;;  %vm1573_vm6 = vweird.f32 %v4793_v41 }
 0x329   :  { %1283 = vadd.xlane.f32.xlu2 %v1282_v46 }
 0x32a   :  { %v1560_v18 = vmul.f32 0.5, %v1559_v59  ;;  %v1408_v55 = vpop.xlane.xlu0 %1407  ;;  %v1380_v59 = vmul.f32 %v4814_v2, %v4814_v2 }
 0x32b   :  { %v1496_v48 = vmul.f32 %v1408_v55, %v4522_v25  ;;  %1437 = vadd.xlane.f32.xlu1 %v1436_v15  ;;  %v1405_v45 = vpop.xlane.xlu2 %1404  ;;  %v1254_v47 = vpop.xlane.xlu1 %1253  ;;  %v1165_v55 = vmul.f32 %v4538_v38, %v1005_v35 }
 0x32c   :  { %v1561_v17 = vsub.f32 1.5, %v1560_v18  ;;  %v1495_v44 = vmul.f32 %v1405_v45, %v4522_v25  ;;  %v1319_v23 = vmul.f32 %v4522_v25, %v1254_v47  ;;  %v1381_v47 = vmul.f32 %v4844_v16, %v4844_v16 }
 0x32d   :  { %v4824_v40 = vadd.f32 1e-05, %v1496_v48  ;;  %v4866_v22 = vsub.f32 %v972_v13, %v1165_v55 }
 0x32e   :  { %v3396_v54 = vpop.eup %3395  ;;  %v1562_v20 = vmul.f32 %v3394_v24, %v1561_v17  ;;  %v4831_v7 = vadd.f32 1e-05, %v1495_v44  ;;  %1286 = vadd.xlane.f32.xlu0 %v1285_v36  ;;  %v4854_v15 = vsub.f32 %v4571_v63, %v1319_v23  ;;  %v1442_v63 = vsel %vm164_vm0, %v1380_v59, 0.0 }
 0x32f   :  { %v1568_v37 = vmul.f32 %v3396_v54, %v4793_v41  ;;  %3397 = vrsqrt.f32 %v4824_v40  ;;  %vm1574_vm5 = vweird.f32 %v3396_v54  ;;  %v1291_v59 = vsel %vm164_vm0, %v4866_v22, 0.0 }
 0x330   :  { %v1566_v46 = vsel %vm4834_vm4, %v3394_v24, %v1562_v20  ;;  %3399 = vrsqrt.f32 %v4831_v7  ;;  %v1383_v20 = vmul.f32 %v4854_v15, %v4854_v15  ;;  %vm1575_vm7 = vmor %vm1573_vm6, %vm1574_vm5  ;;  %v1445_v41 = vsel %vm164_vm0, %v1381_v47, 0.0 }
 0x331   :  { %v1569_v18 = vmul.f32 %v3396_v54, %v1568_v37  ;;  %1440 = vadd.xlane.f32.xlu2 %v1439_v42  ;;  %v1877_v24 = vmul.f32 %v1566_v46, %v4530_v0  ;;  %v4873_v0 = vsub.f32 %v4544_v53, %v1318_v28  ;;  %v4891_v37 = vld [vmem:[%s6408_s3 + $0x3] ss:$0 sm:$0xff]  ;;  %vm1593_vm8 = vweird.f32 %v4824_v40 }
 0x332   :  { %v1260_v57 = vpop.xlane.xlu0 %1259  ;;  %vm1583_vm12 = vweird.f32 %v4831_v7 }
 0x333   :  { %v1570_v48 = vmul.f32 0.5, %v1569_v18  ;;  %1289 = vadd.xlane.f32.xlu1 %v1288_v39  ;;  %v1257_v45 = vpop.xlane.xlu2 %1256  ;;  %v1411_v21 = vpop.xlane.xlu1 %1410  ;;  %v1910_v62 = vmul.f32 %v4862_v6, %v1877_v24  ;;  %v1382_v18 = vmul.f32 %v4873_v0, %v4873_v0  ;;  %v1451_v24 = vsel %vm164_vm0, %v1383_v20, 0.0 }
 0x334   :  { %v1497_v38 = vmul.f32 %v1411_v21, %v4522_v25  ;;  %v1320_v17 = vmul.f32 %v4522_v25, %v1257_v45 }
 0x335   :  { %v4870_v3 = vpop.eup %3397  ;;  %v1571_v9 = vsub.f32 1.5, %v1570_v48  ;;  %v1943_v21 = vadd.f32 %v4891_v37, %v1910_v62 }
 0x336   :  { %v4876_v44 = vpop.eup %3399  ;;  %v1588_v35 = vmul.f32 %v4870_v3, %v4824_v40  ;;  %v4880_v36 = vadd.f32 1e-05, %v1497_v38  ;;  %1443 = vadd.xlane.f32.xlu0 %v1442_v63  ;;  %v4900_v28 = vsub.f32 %v4597_v43, %v1320_v17  ;;  %vm1594_vm9 = vweird.f32 %v4870_v3 }
 0x337   :  { %v1572_v23 = vmul.f32 %v3396_v54, %v1571_v9  ;;  %v1578_v53 = vmul.f32 %v4876_v44, %v4831_v7  ;;  %vm1584_vm10 = vweird.f32 %v4876_v44  ;;  %vm4930_vm11 = vmor %vm1593_vm8, %vm1594_vm9  ;;  %v1448_v40 = vsel %vm164_vm0, %v1382_v18, 0.0 }
 0x338   :  { %v1589_v42 = vmul.f32 %v4870_v3, %v1588_v35  ;;  %3401 = vrsqrt.f32 %v4880_v36  ;;  %vm4941_vm13 = vmor %vm1583_vm12, %vm1584_vm10  ;;  %vm1603_vm3 = vweird.f32 %v4880_v36 }
 0x339   :  { %v1576_v46 = vsel %vm1575_vm7, %v3396_v54, %v1572_v23  ;;  %v1579_v13 = vmul.f32 %v4876_v44, %v1578_v53  ;;  %1292 = vadd.xlane.f32.xlu2 %v1291_v59  ;;  %v1321_v54 = vmul.f32 %v4522_v25, %v1260_v57  ;;  %v1384_v57 = vmul.f32 %v4900_v28, %v4900_v28 }
 0x33a   :  { %v1878_v55 = vmul.f32 %v1576_v46, %v4548_v34  ;;  %v1590_v39 = vmul.f32 0.5, %v1589_v42 }
 0x33b   :  { %v1580_v48 = vmul.f32 0.5, %v1579_v13  ;;  %1446 = vadd.xlane.f32.xlu1 %v1445_v41  ;;  %v1414_v45 = vpop.xlane.xlu2 %1413  ;;  %v1263_v43 = vpop.xlane.xlu1 %1262  ;;  %v4937_v46 = vsub.f32 %v4592_v11, %v1321_v54  ;;  %v1454_v18 = vsel %vm164_vm0, %v1384_v57, 0.0 }
 0x33c   :  { %v1591_v38 = vsub.f32 1.5, %v1590_v39  ;;  %v1498_v63 = vmul.f32 %v1414_v45, %v4522_v25  ;;  %v1417_v47 = vpop.xlane.xlu0 %1416  ;;  %v1322_v34 = vmul.f32 %v4522_v25, %v1263_v43  ;;  %v1911_v9 = vmul.f32 %v4862_v6, %v1878_v55 }
 0x33d   :  { %v1581_v17 = vsub.f32 1.5, %v1580_v48  ;;  %v1499_v35 = vmul.f32 %v1417_v47, %v4522_v25 }
 0x33e   :  { %v4917_v20 = vpop.eup %3401  ;;  %v1592_v23 = vmul.f32 %v4870_v3, %v1591_v38  ;;  %v4920_v53 = vadd.f32 1e-05, %v1498_v63  ;;  %v4923_v62 = vsub.f32 %v4617_v50, %v1322_v34  ;;  %1452 = vadd.xlane.f32.xlu0 %v1451_v24  ;;  %v1944_v42 = vadd.f32 %v4891_v37, %v1911_v9 }
 0x33f   :  { %v1582_v41 = vmul.f32 %v4876_v44, %v1581_v17  ;;  %v1598_v50 = vmul.f32 %v4917_v20, %v4880_v36  ;;  %v4954_v24 = vadd.f32 1e-05, %v1499_v35  ;;  %vm1604_vm15 = vweird.f32 %v4917_v20  ;;  %v2758_v36 = vld [vmem:[%s6411_s1 + $0xe0] sm:$0xff] }
 0x340   :  { %3403 = vrsqrt.f32 %v4920_v53  ;;  %v1975_v55 = vpack.c.bf16 %v1944_v42, %v1943_v21  ;;  %v1596_v39 = vsel %vm4930_vm11, %v4870_v3, %v1592_v23  ;;  %v1386_v48 = vmul.f32 %v4923_v62, %v4923_v62  ;;  %vm1605_vm4 = vmor %vm1603_vm3, %vm1604_vm15 }
 0x341   :  { %v1586_v11 = vsel %vm4941_vm13, %v4876_v44, %v1582_v41  ;;  %1449 = vadd.xlane.f32.xlu2 %v1448_v40  ;;  %v1599_v7 = vmul.f32 %v4917_v20, %v1598_v50  ;;  %v1385_v44 = vmul.f32 %v4937_v46, %v4937_v46  ;;  %v1880_v45 = vmul.f32 %v1596_v39, %v4553_v49 }
 0x342   :  { %3311 = vmatmul.msk.bf16.vlgmr.msrb.gmra.mxu3 %vm164_vm0, %v1975_v55  ;;  %3327 = vmatmul.msk.bf16.vlgmr.msrb.gmra.mxu0 %vm164_vm0, %v1975_v55  ;;  %v1879_v38 = vmul.f32 %v1586_v11, %v4569_v26  ;;  %v1460_v63 = vsel %vm164_vm0, %v1386_v48, 0.0  ;;  %3405 = vrsqrt.f32 %v4954_v24  ;;  %vm1613_vm1 = vweird.f32 %v4920_v53 }
 0x343   :  { %1455 = vadd.xlane.f32.xlu1 %v1454_v18  ;;  %v1266_v3 = vpop.xlane.xlu2 %1265  ;;  %v1420_v54 = vpop.xlane.xlu1 %1419  ;;  %v1600_v34 = vmul.f32 0.5, %v1599_v7  ;;  %v1457_v57 = vsel %vm164_vm0, %v1385_v44, 0.0  ;;  %v1913_v26 = vmul.f32 %v4862_v6, %v1880_v45  ;;  %vm1623_vm9 = vweird.f32 %v4954_v24 }
 0x344   :  { %v1323_v43 = vmul.f32 %v4522_v25, %v1266_v3  ;;  %v1500_v21 = vmul.f32 %v1420_v54, %v4522_v25  ;;  %v1912_v23 = vmul.f32 %v4862_v6, %v1879_v38 }
 0x345   :  { %v1601_v41 = vsub.f32 1.5, %v1600_v34  ;;  %v1946_v11 = vadd.f32 %v4891_v37, %v1913_v26 }
 0x346   :  { %v3404_v47 = vpop.eup %3403  ;;  %v4970_v9 = vsub.f32 %v4637_v58, %v1323_v43  ;;  %v1532_v17 = vadd.f32 1e-05, %v1500_v21  ;;  %1461 = vadd.xlane.f32.xlu0 %v1460_v63  ;;  %v1945_v39 = vadd.f32 %v4891_v37, %v1912_v23 }
 0x347   :  { %v1608_v35 = vmul.f32 %v3404_v47, %v4920_v53  ;;  %vm1614_vm14 = vweird.f32 %v3404_v47  ;;  %v1602_v3 = vmul.f32 %v4917_v20, %v1601_v41 }
 0x348   :  { %3407 = vrsqrt.f32 %v1532_v17  ;;  %v1269_v49 = vpop.xlane.xlu0 %1268  ;;  %v1387_v58 = vmul.f32 %v4970_v9, %v4970_v9  ;;  %v3406_v55 = vpop.eup %3405  ;;  %vm1615_vm2 = vmor %vm1613_vm1, %vm1614_vm14  ;;  %v1976_v43 = vpack.c.bf16 %v1946_v11, %v1945_v39  ;;  %vm1633_vm7 = vweird.f32 %v1532_v17 }
 0x349   :  { %v1609_v42 = vmul.f32 %v3404_v47, %v1608_v35  ;;  %v1324_v59 = vmul.f32 %v4522_v25, %v1269_v49  ;;  %1458 = vadd.xlane.f32.xlu2 %v1457_v57  ;;  %v1618_v54 = vmul.f32 %v3406_v55, %v4954_v24  ;;  %v1606_v53 = vsel %vm1605_vm4, %v4917_v20, %v1602_v3  ;;  %v2757_v24 = vld [vmem:[%s6411_s1 + $0xd8] sm:$0xff] }
 0x34a   :  { %v1463_v40 = vsel %vm164_vm0, %v1387_v58, 0.0  ;;  %v1881_v49 = vmul.f32 %v1606_v53, %v4583_v56  ;;  %vm1624_vm6 = vweird.f32 %v3406_v55 }
 0x34b   :  { %v1610_v50 = vmul.f32 0.5, %v1609_v42  ;;  %v4980_v13 = vsub.f32 %v4650_v33, %v1324_v59  ;;  %1464 = vadd.xlane.f32.xlu1 %v1463_v40  ;;  %v1619_v63 = vmul.f32 %v3406_v55, %v1618_v54  ;;  %vm1625_vm10 = vmor %vm1623_vm9, %vm1624_vm6 }
 0x34c   :  { %v1914_v26 = vmul.f32 %v4862_v6, %v1881_v49 }
 0x34d   :  { %v1611_v7 = vsub.f32 1.5, %v1610_v50  ;;  %v1388_v18 = vmul.f32 %v4980_v13, %v4980_v13  ;;  %v1620_v57 = vmul.f32 0.5, %v1619_v63  ;;  %v2756_v50 = vld [vmem:[%s6411_s1 + $0xd0] sm:$0xff] }
 0x34e   :  { %v3408_v48 = vpop.eup %3407 }
 0x34f   :  { %v1612_v33 = vmul.f32 %v3404_v47, %v1611_v7  ;;  %v1628_v44 = vmul.f32 %v3408_v48, %v1532_v17  ;;  %v1466_v45 = vsel %vm164_vm0, %v1388_v18, 0.0  ;;  %v1621_v42 = vsub.f32 1.5, %v1620_v57 }
 0x350   :  { %vm1634_vm5 = vweird.f32 %v3408_v48 }
 0x351   :  { %v1616_v21 = vsel %vm1615_vm2, %v3404_v47, %v1612_v33  ;;  %v1629_v38 = vmul.f32 %v3408_v48, %v1628_v44  ;;  %1467 = vadd.xlane.f32.xlu2 %v1466_v45  ;;  %v1622_v58 = vmul.f32 %v3406_v55, %v1621_v42  ;;  %vm1635_vm8 = vmor %vm1633_vm7, %vm1634_vm5  ;;  %v5023_v33 = vpop.permute.xlu2 %2835 }
 0x352   :  { %3312 = vmatmul.msk.bf16.gmra.mxu3 %vm164_vm0, %v1976_v43  ;;  %3328 = vmatmul.msk.bf16.gmra.mxu0 %vm164_vm0, %v1976_v43  ;;  %v1882_v34 = vmul.f32 %v1616_v21, %v4606_v19  ;;  %v1947_v19 = vadd.f32 %v4891_v37, %v1914_v26 }
 0x353   :  { %v1630_v35 = vmul.f32 0.5, %v1629_v38  ;;  %v1626_v40 = vsel %vm1625_vm10, %v3406_v55, %v1622_v58  ;;  %v1426_v18 = vpop.xlane.xlu0 %1425 }
 0x354   :  { %v1915_v47 = vmul.f32 %v4862_v6, %v1882_v34  ;;  %v1883_v17 = vmul.f32 %v1626_v40, %v4615_v8  ;;  %v1502_v55 = vmul.f32 %v1426_v18, %v4522_v25 }
 0x355   :  { %v1631_v23 = vsub.f32 1.5, %v1630_v35 }
 0x356   :  { %v1948_v20 = vadd.f32 %v4891_v37, %v1915_v47  ;;  %v1916_v7 = vmul.f32 %v4862_v6, %v1883_v17  ;;  %v1534_v8 = vadd.f32 1e-05, %v1502_v55 }
 0x357   :  { %v1632_v59 = vmul.f32 %v3408_v48, %v1631_v23 }
 0x358   :  { %v1977_v56 = vpack.c.bf16 %v1948_v20, %v1947_v19  ;;  %v1949_v3 = vadd.f32 %v4891_v37, %v1916_v7  ;;  %3409 = vrsqrt.f32 %v1534_v8  ;;  %vm1653_vm12 = vweird.f32 %v1534_v8 }
 0x359   :  { %v1636_v41 = vsel %vm1635_vm8, %v3408_v48, %v1632_v59 }
 0x35a   :  { %2847 = vperm.xlu0 %3385, %v2758_v36   ;;  %v1884_v39 = vmul.f32 %v1636_v41, %v4635_v5 }
 0x35b   :  { %v5025_v44 = vpop.permute.xlu1 %2832 }
 0x35c   :  { %v1917_v11 = vmul.f32 %v4862_v6, %v1884_v39 }
 0x35e   :  { %v1950_v48 = vadd.f32 %v4891_v37, %v1917_v11  ;;  %v3410_v54 = vpop.eup %3409 }
 0x35f   :  { %v1648_v45 = vmul.f32 %v3410_v54, %v1534_v8  ;;  %vm1654_vm11 = vweird.f32 %v3410_v54 }
 0x360   :  { %v1978_v5 = vpack.c.bf16 %v1950_v48, %v1949_v3  ;;  %vm1655_vm13 = vmor %vm1653_vm12, %vm1654_vm11 }
 0x361   :  { %v1649_v43 = vmul.f32 %v3410_v54, %v1648_v45 }
 0x362   :  { %3313 = vmatmul.msk.bf16.gmra.mxu3 %vm164_vm0, %v1977_v56  ;;  %3329 = vmatmul.msk.bf16.gmra.mxu0 %vm164_vm0, %v1977_v56 }
 0x363   :  { %v1650_v35 = vmul.f32 0.5, %v1649_v43 }
 0x364   :  { %2841 = vperm.xlu1 %3383, %v2756_v50  }
 0x365   :  { %v1651_v47 = vsub.f32 1.5, %v1650_v35 }
 0x366   :  { %v5029_v49 = vpop.permute.xlu0 %2838 }
 0x367   :  { %v1652_v56 = vmul.f32 %v3410_v54, %v1651_v47 }
 0x369   :  { %2844 = vperm.xlu2 %3384, %v2757_v24   ;;  %v1656_v24 = vsel %vm1655_vm13, %v3410_v54, %v1652_v56 }
 0x36a   :  { %v1886_v8 = vmul.f32 %v1656_v24, %v4656_v52 }
 0x36c   :  { %v1919_v47 = vmul.f32 %v4862_v6, %v1886_v8 }
 0x372   :  { %3314 = vmatmul.msk.bf16.gmra.mxu3 %vm164_vm0, %v1978_v5  ;;  %3330 = vmatmul.msk.bf16.gmra.mxu0 %vm164_vm0, %v1978_v5 }
 0x384   :  { %v1423_v21 = vpop.xlane.xlu2 %1422 }
 0x385   :  { %v1501_v38 = vmul.f32 %v1423_v21, %v4522_v25 }
 0x386   :  { %v1272_v53 = vpop.xlane.xlu1 %1271 }
 0x387   :  { %v1533_v63 = vadd.f32 1e-05, %v1501_v38  ;;  %v1325_v34 = vmul.f32 %v4522_v25, %v1272_v53 }
 0x389   :  { %3411 = vrsqrt.f32 %v1533_v63  ;;  %v5032_v57 = vsub.f32 %v4686_v29, %v1325_v34  ;;  %vm1643_vm15 = vweird.f32 %v1533_v63 }
 0x38b   :  { %v1389_v36 = vmul.f32 %v5032_v57, %v5032_v57 }
 0x38c   :  { %v1275_v23 = vpop.xlane.xlu2 %1274 }
 0x38d   :  { %v1326_v26 = vmul.f32 %v4522_v25, %v1275_v23  ;;  %v1469_v42 = vsel %vm164_vm0, %v1389_v36, 0.0 }
 0x38e   :  { %1470 = vadd.xlane.f32.xlu0 %v1469_v42  ;;  %v1429_v20 = vpop.xlane.xlu1 %1428 }
 0x38f   :  { %v3412_v59 = vpop.eup %3411  ;;  %v5039_v19 = vsub.f32 %v4703_v32, %v1326_v26  ;;  %v1503_v58 = vmul.f32 %v1429_v20, %v4522_v25 }
 0x390   :  { %v1638_v29 = vmul.f32 %v3412_v59, %v1533_v63  ;;  %vm1644_vm14 = vweird.f32 %v3412_v59 }
 0x391   :  { %v5042_v41 = vadd.f32 1e-05, %v1503_v58  ;;  %v1278_v50 = vpop.xlane.xlu0 %1277  ;;  %v1390_v40 = vmul.f32 %v5039_v19, %v5039_v19  ;;  %vm1645_vm1 = vmor %vm1643_vm15, %vm1644_vm14 }
 0x392   :  { %v1639_v39 = vmul.f32 %v3412_v59, %v1638_v29  ;;  %v1327_v17 = vmul.f32 %v4522_v25, %v1278_v50 }
 0x393   :  { %3413 = vrsqrt.f32 %v5042_v41  ;;  %v1472_v32 = vsel %vm164_vm0, %v1390_v40, 0.0  ;;  %vm1663_vm3 = vweird.f32 %v5042_v41 }
 0x394   :  { %v1640_v11 = vmul.f32 0.5, %v1639_v39  ;;  %v5050_v7 = vsub.f32 %v4719_v14, %v1327_v17  ;;  %1473 = vadd.xlane.f32.xlu1 %v1472_v32  ;;  %v1432_v18 = vpop.xlane.xlu2 %1431  ;;  %v1952_v39 = vadd.f32 %v4891_v37, %v1919_v47 }
 0x395   :  { %v1504_v48 = vmul.f32 %v1432_v18, %v4522_v25 }
 0x396   :  { %v1641_v3 = vsub.f32 1.5, %v1640_v11  ;;  %v1281_v55 = vpop.xlane.xlu1 %1280  ;;  %v1391_v5 = vmul.f32 %v5050_v7, %v5050_v7 }
 0x397   :  { %v5056_v45 = vadd.f32 1e-05, %v1504_v48  ;;  %v1328_v54 = vmul.f32 %v4522_v25, %v1281_v55 }
 0x398   :  { %v1642_v43 = vmul.f32 %v3412_v59, %v1641_v3  ;;  %v1475_v14 = vsel %vm164_vm0, %v1391_v5, 0.0 }
 0x399   :  { %v3414_v21 = vpop.eup %3413  ;;  %3415 = vrsqrt.f32 %v5056_v45  ;;  %v5062_v38 = vsub.f32 %v4751_v12, %v1328_v54  ;;  %1476 = vadd.xlane.f32.xlu2 %v1475_v14  ;;  %v1435_v53 = vpop.xlane.xlu0 %1434  ;;  %vm1673_vm6 = vweird.f32 %v5056_v45 }
 0x39a   :  { %v1646_v34 = vsel %vm1645_vm1, %v3412_v59, %v1642_v43  ;;  %v1658_v52 = vmul.f32 %v3414_v21, %v5042_v41  ;;  %v1505_v35 = vmul.f32 %v1435_v53, %v4522_v25  ;;  %vm1664_vm2 = vweird.f32 %v3414_v21 }
 0x39b   :  { %v1885_v36 = vmul.f32 %v1646_v34, %v4674_v51  ;;  %v1392_v63 = vmul.f32 %v5062_v38, %v5062_v38  ;;  %vm5089_vm4 = vmor %vm1663_vm3, %vm1664_vm2 }
 0x39c   :  { %v1659_v23 = vmul.f32 %v3414_v21, %v1658_v52  ;;  %v5070_v26 = vadd.f32 1e-05, %v1505_v35  ;;  %v1284_v42 = vpop.xlane.xlu2 %1283 }
 0x39d   :  { %v1329_v12 = vmul.f32 %v4522_v25, %v1284_v42  ;;  %v1478_v20 = vsel %vm164_vm0, %v1392_v63, 0.0  ;;  %v1918_v59 = vmul.f32 %v4862_v6, %v1885_v36 }
 0x39e   :  { %v1660_v58 = vmul.f32 0.5, %v1659_v23  ;;  %3417 = vrsqrt.f32 %v5070_v26  ;;  %1479 = vadd.xlane.f32.xlu0 %v1478_v20  ;;  %v1438_v51 = vpop.xlane.xlu1 %1437  ;;  %vm1683_vm10 = vweird.f32 %v5070_v26 }
 0x39f   :  { %v3416_v56 = vpop.eup %3415  ;;  %v5077_v29 = vsub.f32 %v4785_v10, %v1329_v12  ;;  %v1506_v50 = vmul.f32 %v1438_v51, %v4522_v25  ;;  %v1951_v40 = vadd.f32 %v4891_v37, %v1918_v59 }
 0x3a0   :  { %v1661_v17 = vsub.f32 1.5, %v1660_v58  ;;  %v1668_v32 = vmul.f32 %v3416_v56, %v5056_v45  ;;  %vm1674_vm5 = vweird.f32 %v3416_v56 }
 0x3a1   :  { %v5083_v24 = vadd.f32 1e-05, %v1506_v50  ;;  %v1287_v11 = vpop.xlane.xlu0 %1286  ;;  %v1979_v18 = vpack.c.bf16 %v1952_v39, %v1951_v40  ;;  %v1393_v48 = vmul.f32 %v5077_v29, %v5077_v29  ;;  %vm1675_vm7 = vmor %vm1673_vm6, %vm1674_vm5 }
 0x3a2   :  { %v1662_v3 = vmul.f32 %v3414_v21, %v1661_v17  ;;  %v1669_v10 = vmul.f32 %v3416_v56, %v1668_v32  ;;  %v1330_v55 = vmul.f32 %v4522_v25, %v1287_v11 }
 0x3a3   :  { %3419 = vrsqrt.f32 %v5083_v24  ;;  %3315 = vmatmul.msk.bf16.gmra.mxu3 %vm164_vm0, %v1979_v18  ;;  %3331 = vmatmul.msk.bf16.gmra.mxu0 %vm164_vm0, %v1979_v18  ;;  %v1481_v8 = vsel %vm164_vm0, %v1393_v48, 0.0  ;;  %vm1693_vm12 = vweird.f32 %v5083_v24 }
 0x3a4   :  { %v5097_v54 = vpop.eup %3417  ;;  %v1666_v41 = vsel %vm5089_vm4, %v3414_v21, %v1662_v3  ;;  %v1670_v43 = vmul.f32 0.5, %v1669_v10  ;;  %v5102_v14 = vsub.f32 %v4808_v27, %v1330_v55  ;;  %1482 = vadd.xlane.f32.xlu1 %v1481_v8  ;;  %v1441_v53 = vpop.xlane.xlu2 %1440 }
 0x3a5   :  { %v1678_v34 = vmul.f32 %v5097_v54, %v5070_v26  ;;  %v1507_v52 = vmul.f32 %v1441_v53, %v4522_v25  ;;  %v1887_v47 = vmul.f32 %v1666_v41, %v4695_v61  ;;  %vm1684_vm8 = vweird.f32 %v5097_v54 }
 0x3a6   :  { %v1671_v35 = vsub.f32 1.5, %v1670_v43  ;;  %v1290_v36 = vpop.xlane.xlu1 %1289  ;;  %v1394_v63 = vmul.f32 %v5102_v14, %v5102_v14  ;;  %vm5149_vm11 = vmor %vm1683_vm10, %vm1684_vm8 }
 0x3a7   :  { %v1679_v21 = vmul.f32 %v5097_v54, %v1678_v34  ;;  %v5111_v23 = vadd.f32 1e-05, %v1507_v52  ;;  %v1331_v27 = vmul.f32 %v4522_v25, %v1290_v36  ;;  %v1920_v17 = vmul.f32 %v4862_v6, %v1887_v47 }
 0x3a8   :  { %v1672_v42 = vmul.f32 %v3416_v56, %v1671_v35  ;;  %v1484_v12 = vsel %vm164_vm0, %v1394_v63, 0.0 }
 0x3a9   :  { %v3420_v20 = vpop.eup %3419  ;;  %v1680_v59 = vmul.f32 0.5, %v1679_v21  ;;  %3421 = vrsqrt.f32 %v5111_v23  ;;  %v5118_v58 = vsub.f32 %v4828_v60, %v1331_v27  ;;  %1485 = vadd.xlane.f32.xlu2 %v1484_v12  ;;  %v1444_v61 = vpop.xlane.xlu0 %1443  ;;  %v1953_v41 = vadd.f32 %v4891_v37, %v1920_v17 }
 0x3aa   :  { %v1676_v51 = vsel %vm1675_vm7, %v3416_v56, %v1672_v42  ;;  %v1688_v50 = vmul.f32 %v3420_v20, %v5083_v24  ;;  %v1508_v40 = vmul.f32 %v1444_v61, %v4522_v25  ;;  %vm1694_vm9 = vweird.f32 %v3420_v20 }
 0x3ab   :  { %v1888_v39 = vmul.f32 %v1676_v51, %v4713_v4  ;;  %v1395_v45 = vmul.f32 %v5118_v58, %v5118_v58  ;;  %v1681_v32 = vsub.f32 1.5, %v1680_v59  ;;  %vm1695_vm13 = vmor %vm1693_vm12, %vm1694_vm9  ;;  %vm1703_vm3 = vweird.f32 %v5111_v23 }
 0x3ac   :  { %v1689_v11 = vmul.f32 %v3420_v20, %v1688_v50  ;;  %v5126_v18 = vadd.f32 1e-05, %v1508_v40  ;;  %v1293_v60 = vpop.xlane.xlu2 %1292 }
 0x3ad   :  { %v1332_v48 = vmul.f32 %v4522_v25, %v1293_v60  ;;  %v1487_v56 = vsel %vm164_vm0, %v1395_v45, 0.0  ;;  %v1921_v3 = vmul.f32 %v4862_v6, %v1888_v39  ;;  %v1682_v53 = vmul.f32 %v5097_v54, %v1681_v32 }
 0x3ae   :  { %v1690_v10 = vmul.f32 0.5, %v1689_v11  ;;  %3423 = vrsqrt.f32 %v5126_v18  ;;  %1488 = vadd.xlane.f32.xlu0 %v1487_v56  ;;  %v1447_v4 = vpop.xlane.xlu1 %1446  ;;  %vm1713_vm15 = vweird.f32 %v5126_v18 }
 0x3af   :  { %v5133_v55 = vpop.eup %3421  ;;  %v5136_v5 = vsub.f32 %v4866_v22, %v1332_v48  ;;  %v1509_v8 = vmul.f32 %v1447_v4, %v4522_v25  ;;  %v1954_v43 = vadd.f32 %v4891_v37, %v1921_v3  ;;  %v1686_v27 = vsel %vm5149_vm11, %v5097_v54, %v1682_v53 }
 0x3b0   :  { %v1691_v34 = vsub.f32 1.5, %v1690_v10  ;;  %v1698_v52 = vmul.f32 %v5133_v55, %v5111_v23  ;;  %v1889_v50 = vmul.f32 %v1686_v27, %v4743_v30  ;;  %v2760_v10 = vld [vmem:[%s6411_s1 + $0xf0] sm:$0xff]  ;;  %vm1704_vm1 = vweird.f32 %v5133_v55 }
 0x3b1   :  { %v1980_v35 = vpack.c.bf16 %v1954_v43, %v1953_v41  ;;  %v1396_v22 = vmul.f32 %v5136_v5, %v5136_v5  ;;  %v5154_v47 = vadd.f32 1e-05, %v1509_v8  ;;  %v1453_v60 = vpop.xlane.xlu0 %1452  ;;  %v2761_v43 = vld [vmem:[%s6411_s1 + $0xf8] sm:$0xff]  ;;  %vm1705_vm4 = vmor %vm1703_vm3, %vm1704_vm1 }
 0x3b2   :  { %v1692_v63 = vmul.f32 %v3420_v20, %v1691_v34  ;;  %v1699_v12 = vmul.f32 %v5133_v55, %v1698_v52  ;;  %v1511_v8 = vmul.f32 %v1453_v60, %v4522_v25 }
 0x3b3   :  { %3316 = vmatmul.msk.bf16.gmra.mxu3 %vm164_vm0, %v1980_v35  ;;  %3332 = vmatmul.msk.bf16.gmra.mxu0 %vm164_vm0, %v1980_v35  ;;  %v1490_v26 = vsel %vm164_vm0, %v1396_v22, 0.0  ;;  %3425 = vrsqrt.f32 %v5154_v47  ;;  %vm1723_vm9 = vweird.f32 %v5154_v47 }
 0x3b4   :  { %v3424_v21 = vpop.eup %3423  ;;  %v1696_v42 = vsel %vm1695_vm13, %v3420_v20, %v1692_v63  ;;  %1491 = vadd.xlane.f32.xlu1 %v1490_v26  ;;  %v1450_v59 = vpop.xlane.xlu2 %1449  ;;  %v1700_v45 = vmul.f32 0.5, %v1699_v12  ;;  %v5200_v26 = vadd.f32 1e-05, %v1511_v8 }
 0x3b5   :  { %v1890_v24 = vmul.f32 %v1696_v42, %v4776_v1  ;;  %v1708_v61 = vmul.f32 %v3424_v21, %v5126_v18  ;;  %v1510_v51 = vmul.f32 %v1450_v59, %v4522_v25  ;;  %v1922_v1 = vmul.f32 %v4862_v6, %v1889_v50 }
 0x3b6   :  { %v1456_v17 = vpop.xlane.xlu1 %1455  ;;  %v1701_v11 = vsub.f32 1.5, %v1700_v45  ;;  %vm1714_vm14 = vweird.f32 %v3424_v21 }
 0x3b7   :  { %v1709_v40 = vmul.f32 %v3424_v21, %v1708_v61  ;;  %v5168_v39 = vadd.f32 1e-05, %v1510_v51  ;;  %v1923_v20 = vmul.f32 %v4862_v6, %v1890_v24  ;;  %v1512_v30 = vmul.f32 %v1456_v17, %v4522_v25  ;;  %vm1715_vm2 = vmor %vm1713_vm15, %vm1714_vm14 }
 0x3b8   :  { %v1955_v53 = vadd.f32 %v4891_v37, %v1922_v1  ;;  %v1702_v34 = vmul.f32 %v5133_v55, %v1701_v11  ;;  %vm1743_vm15 = vweird.f32 %v5200_v26 }
 0x3b9   :  { %v1710_v54 = vmul.f32 0.5, %v1709_v40  ;;  %3427 = vrsqrt.f32 %v5168_v39  ;;  %v5173_v48 = vpop.eup %3425  ;;  %v1956_v56 = vadd.f32 %v4891_v37, %v1923_v20  ;;  %v5196_v35 = vadd.f32 1e-05, %v1512_v30  ;;  %v1462_v20 = vpop.xlane.xlu0 %1461 }
 0x3ba   :  { %v1718_v52 = vmul.f32 %v5173_v48, %v5154_v47  ;;  %v1706_v27 = vsel %vm1705_vm4, %v5133_v55, %v1702_v34  ;;  %v1514_v30 = vmul.f32 %v1462_v20, %v4522_v25  ;;  %vm1724_vm6 = vweird.f32 %v5173_v48 }
 0x3bb   :  { %v1711_v32 = vsub.f32 1.5, %v1710_v54  ;;  %v1981_v22 = vpack.c.bf16 %v1956_v56, %v1955_v53  ;;  %3429 = vrsqrt.f32 %v5196_v35  ;;  %v1891_v59 = vmul.f32 %v1706_v27, %v4799_v31  ;;  %vm1725_vm10 = vmor %vm1723_vm9, %vm1724_vm6 }
 0x3bc   :  { %v1719_v42 = vmul.f32 %v5173_v48, %v1718_v52  ;;  %3431 = vrsqrt.f32 %v5200_v26  ;;  %v1459_v55 = vpop.xlane.xlu2 %1458  ;;  %vm1733_vm7 = vweird.f32 %v5168_v39  ;;  %v5243_v52 = vadd.f32 1e-05, %v1514_v30 }
 0x3bd   :  { %v1712_v3 = vmul.f32 %v3424_v21, %v1711_v32  ;;  %v1924_v45 = vmul.f32 %v4862_v6, %v1891_v59  ;;  %v1513_v17 = vmul.f32 %v1459_v55, %v4522_v25  ;;  %vm1753_vm12 = vweird.f32 %v5196_v35 }
 0x3be   :  { %v1720_v24 = vmul.f32 0.5, %v1719_v42 }
 0x3bf   :  { %v5180_v4 = vpop.eup %3427  ;;  %v5184_v41 = vpop.f32.mrf.mxu0  ;;  %v1716_v36 = vsel %vm1715_vm2, %v3424_v21, %v1712_v3  ;;  %v1957_v56 = vadd.f32 %v4891_v37, %v1924_v45  ;;  %v5238_v8 = vadd.f32 1e-05, %v1513_v17  ;;  %v1995_v17 = vld [vmem:[%s6414_s7] sm:$0x3] }
 0x3c0   :  { %v1728_v18 = vmul.f32 %v5180_v4, %v5168_v39  ;;  %v1892_v12 = vmul.f32 %v1716_v36, %v4814_v2  ;;  %v2759_v2 = vld [vmem:[%s6411_s1 + $0xe8] sm:$0xff]  ;;  %v1721_v54 = vsub.f32 1.5, %v1720_v24  ;;  %vm1734_vm5 = vweird.f32 %v5180_v4 }
 0x3c1   :  { %2853 = vperm.xlu2 %3384, %v2760_v10   ;;  %v5218_v40 = vpop.eup %3429  ;;  %vm1735_vm8 = vmor %vm1733_vm7, %vm1734_vm5  ;;  %3433 = vrsqrt.f32 %v5238_v8 }
 0x3c2   :  { %v1729_v63 = vmul.f32 %v5180_v4, %v1728_v18  ;;  %2856 = vperm.xlu0 %3385, %v2761_v43   ;;  %v1925_v51 = vmul.f32 %v4862_v6, %v1892_v12  ;;  %v5221_v31 = vpop.eup %3431  ;;  %v1748_v60 = vmul.f32 %v5218_v40, %v5196_v35  ;;  %v1722_v3 = vmul.f32 %v5173_v48, %v1721_v54 }
 0x3c3   :  { %3317 = vmatmul.msk.bf16.gmra.mxu3 %vm164_vm0, %v1981_v22  ;;  %3333 = vmatmul.msk.bf16.gmra.mxu0 %vm164_vm0, %v1981_v22  ;;  %v1738_v10 = vmul.f32 %v5221_v31, %v5200_v26  ;;  %3435 = vrsqrt.f32 %v5243_v52  ;;  %vm1754_vm11 = vweird.f32 %v5218_v40  ;;  %vm1744_vm13 = vweird.f32 %v5221_v31 }
 0x3c4   :  { %v1730_v21 = vmul.f32 0.5, %v1729_v63  ;;  %v1958_v1 = vadd.f32 %v4891_v37, %v1925_v51  ;;  %v1749_v34 = vmul.f32 %v5218_v40, %v1748_v60  ;;  %v1726_v39 = vsel %vm1725_vm10, %v5173_v48, %v1722_v3  ;;  %v1468_v42 = vpop.xlane.xlu2 %1467  ;;  %v1465_v48 = vpop.xlane.xlu1 %1464  ;;  %vm1755_vm14 = vmor %vm1753_vm12, %vm1754_vm11 }
 0x3c5   :  { %v5208_v23 = vpop.f32.mrf.mxu3  ;;  %v1739_v22 = vmul.f32 %v5221_v31, %v1738_v10  ;;  %v1893_v63 = vmul.f32 %v1726_v39, %v4844_v16  ;;  %v1516_v51 = vmul.f32 %v1468_v42, %v4522_v25  ;;  %v1515_v20 = vmul.f32 %v1465_v48, %v4522_v25  ;;  %vm1745_vm1 = vmor %vm1743_vm15, %vm1744_vm13 }
 0x3c6   :  { %v1731_v50 = vsub.f32 1.5, %v1730_v21  ;;  %v1982_v43 = vpack.c.bf16 %v1958_v1, %v1957_v56  ;;  %v2727_v1 = vlaneseq  ;;  %v5287_v10 = vperm.slane %v1995_v17, 1 }
 0x3c7   :  { %v5212_v61 = vpop.f32.mrf.mxu0  ;;  %v1740_v27 = vmul.f32 0.5, %v1739_v22  ;;  %v5258_v59 = vpop.eup %3433  ;;  %v1926_v24 = vmul.f32 %v4862_v6, %v1893_v63  ;;  %v5285_v3 = vadd.f32 1e-05, %v1516_v51  ;;  %vm1773_vm11 = vweird.f32 %v5243_v52 }
 0x3c8   :  { %v1732_v11 = vmul.f32 %v5180_v4, %v1731_v50  ;;  %v1758_v54 = vmul.f32 %v5258_v59, %v5238_v8  ;;  %v5294_v39 = vand.u32 127, %v2727_v1  ;;  %vm1764_vm6 = vweird.f32 %v5258_v59 }
 0x3c9   :  { %v5262_v50 = vpop.eup %3435  ;;  %v1959_v60 = vadd.f32 %v4891_v37, %v1926_v24  ;;  %3437 = vrsqrt.f32 %v5285_v3 }
 0x3ca   :  { %v1736_v53 = vsel %vm1735_vm8, %v5180_v4, %v1732_v11  ;;  %v1750_v4 = vmul.f32 0.5, %v1749_v34  ;;  %v5278_v11 = vperm.slane %v1995_v17, 0  ;;  %v1768_v56 = vmul.f32 %v5262_v50, %v5243_v52  ;;  %v6593_v17 = vld [vmem:[#allocation10_spill] sm:$0xff] }
 0x3cb   :  { %v1894_v36 = vmul.f32 %v1736_v53, %v4873_v0  ;;  %v1741_v0 = vsub.f32 1.5, %v1740_v27  ;;  %v1759_v53 = vmul.f32 %v5258_v59, %v1758_v54  ;;  %v5292_v34 = vadd.f32 1e-05, %v1515_v20 }
 0x3cc   :  { %v1751_v21 = vsub.f32 1.5, %v1750_v4  ;;  %v5303_v26 = vadd.f32 %v5208_v23, %v5278_v11  ;;  %v5311_v27 = vadd.f32 %v5184_v41, %v5287_v10  ;;  %v5319_v23 = vadd.s32 128, %v5294_v39 }
 0x3cd   :  { %2850 = vperm.xlu1 %3383, %v2759_v2   ;;  %v5224_v32 = vpop.f32.mrf.mxu3  ;;  %v1927_v12 = vmul.f32 %v4862_v6, %v1894_v36  ;;  %v1742_v30 = vmul.f32 %v5221_v31, %v1741_v0  ;;  %v1769_v36 = vmul.f32 %v5262_v50, %v1768_v56  ;;  %v1760_v63 = vmul.f32 0.5, %v1759_v53 }
 0x3ce   :  { %v1752_v45 = vmul.f32 %v5218_v40, %v1751_v21  ;;  %3439 = vrsqrt.f32 %v5292_v34  ;;  %v5323_v21 = vadd.f32 %v5212_v61, %v5287_v10  ;;  %v2247_v48 = vmax.f32 %v5303_v26, %v5311_v27 }
 0x3cf   :  { %v5245_v18 = vpop.f32.mrf.mxu0  ;;  %v1960_v2 = vadd.f32 %v4891_v37, %v1927_v12  ;;  %v1746_v22 = vsel %vm1745_vm1, %v5221_v31, %v1742_v30  ;;  %v5315_v31 = vadd.f32 %v5224_v32, %v5278_v11  ;;  %v5328_v24 = vpop.eup %3437  ;;  %v1761_v32 = vsub.f32 1.5, %v1760_v63 }
 0x3d0   :  { %v1756_v35 = vsel %vm1755_vm14, %v5218_v40, %v1752_v45  ;;  %v1895_v42 = vmul.f32 %v1746_v22, %v4854_v15  ;;  %v1788_v54 = vmul.f32 %v5328_v24, %v5285_v3  ;;  %v5347_v20 = vadd.f32 %v5245_v18, %v5287_v10  ;;  %v6594_v22 = vld [vmem:[#allocation8_spill] sm:$0xff] }
 0x3d1   :  { %v1896_v40 = vmul.f32 %v1756_v35, %v4900_v28  ;;  %v1770_v28 = vmul.f32 0.5, %v1769_v36  ;;  %v2250_v15 = vmax.f32 %v5315_v31, %v5323_v21  ;;  %vm2862_vm4 = vcmp.eq.s32.totalorder %v5294_v39, %v6593_v17  ;;  %v5436_v36 = vld [vmem:[%s6408_s3 + $0x3] ss:$0 sm:$0xff] }
 0x3d2   :  { %v1928_v51 = vmul.f32 %v4862_v6, %v1895_v42  ;;  %vm2863_vm5 = vcmp.eq.s32.totalorder %v5319_v23, %v6593_v17  ;;  %v1762_v1 = vmul.f32 %v5258_v59, %v1761_v32  ;;  %vm1774_vm7 = vweird.f32 %v5262_v50  ;;  %v5409_v17 = vpop.permute.xlu0 %2847 }
 0x3d3   :  { %3318 = vmatmul.msk.bf16.gmra.mxu3 %vm164_vm0, %v1982_v43  ;;  %3334 = vmatmul.msk.bf16.gmra.mxu0 %vm164_vm0, %v1982_v43  ;;  %v1983_v43 = vpack.c.bf16 %v1960_v2, %v1959_v60  ;;  %v1929_v41 = vmul.f32 %v4862_v6, %v1896_v40  ;;  %v6592_v2 = vld [vmem:[#allocation9_spill] sm:$0xff]  ;;  %v1771_v45 = vsub.f32 1.5, %v1770_v28  ;;  %vm1763_vm8 = vweird.f32 %v5238_v8  ;;  %vm1775_vm13 = vmor %vm1773_vm11, %vm1774_vm7  ;;  %6597 = vst [vmem:[#allocation50_spill] sm:$0xff] %v5409_v17 }
 0x3d4   :  { %v5337_v61 = vpop.eup %3439  ;;  %vm2860_vm2 = vcmp.eq.s32.totalorder %v5294_v39, %v6592_v2  ;;  %vm2861_vm3 = vcmp.eq.s32.totalorder %v5319_v23, %v6592_v2  ;;  %v1961_v56 = vadd.f32 %v4891_v37, %v1928_v51  ;;  %vm2858_vm9 = vcmp.eq.s32.totalorder %v5294_v39, %v6594_v22  ;;  %vm5367_vm10 = vmor %vm1763_vm8, %vm1764_vm6 }
 0x3d5   :  { %v5253_v47 = vpop.f32.mrf.mxu3  ;;  %v1962_v6 = vadd.f32 %v4891_v37, %v1929_v41  ;;  %v1778_v60 = vmul.f32 %v5337_v61, %v5292_v34  ;;  %v2925_v18 = vsel %vm2861_vm3, %v5323_v21, 0.0  ;;  %v1772_v35 = vmul.f32 %v5262_v50, %v1771_v45 }
 0x3d6   :  { %v5334_v0 = vadd.f32 %v5253_v47, %v5278_v11  ;;  %v2924_v47 = vsel %vm2860_vm2, %v5315_v31, 0.0  ;;  %v1789_v40 = vmul.f32 %v5328_v24, %v1788_v54  ;;  %v2927_v42 = vsel %vm2863_vm5, %v5347_v20, 0.0 }
 0x3d7   :  { %v5264_v55 = vpop.f32.mrf.mxu0  ;;  %v2989_v53 = vadd.f32 %v2925_v18, %v2924_v47  ;;  %v1984_v37 = vpack.c.bf16 %v1962_v6, %v1961_v56  ;;  %v1766_v8 = vsel %vm5367_vm10, %v5258_v59, %v1762_v1  ;;  %vm2859_vm12 = vcmp.eq.s32.totalorder %v5319_v23, %v6594_v22 }
 0x3d8   :  { %v1779_v41 = vmul.f32 %v5337_v61, %v1778_v60  ;;  %v1776_v52 = vsel %vm1775_vm13, %v5262_v50, %v1772_v35  ;;  %v2923_v32 = vsel %vm2859_vm12, %v5311_v27, 0.0  ;;  %v1790_v51 = vmul.f32 0.5, %v1789_v40 }
 0x3d9   :  { %v5397_v45 = vadd.f32 %v5264_v55, %v5287_v10  ;;  %v1898_v50 = vmul.f32 %v1776_v52, %v4923_v62  ;;  %v5414_v55 = vld [vmem:[%s6408_s3 + $0x2] ss:$0 sm:$0xff]  ;;  %vm1794_vm15 = vweird.f32 %v5328_v24  ;;  %v2253_v35 = vmax.f32 %v5334_v0, %v5347_v20 }
 0x3da   :  { %v1780_v47 = vmul.f32 0.5, %v1779_v41  ;;  %v1791_v6 = vsub.f32 1.5, %v1790_v51  ;;  %vm1784_vm3 = vweird.f32 %v5337_v61  ;;  %v6601_v41 = vld [vmem:[#allocation12_spill] sm:$0xff]  ;;  %vm1783_vm8 = vweird.f32 %v5292_v34 }
 0x3db   :  { %v1931_v56 = vmul.f32 %v5414_v55, %v1898_v50  ;;  %vm2864_vm5 = vcmp.eq.s32.totalorder %v5294_v39, %v6601_v41  ;;  %vm2865_vm10 = vcmp.eq.s32.totalorder %v5319_v23, %v6601_v41  ;;  %v6607_v41 = vld [vmem:[#allocation11_spill] sm:$0xff] }
 0x3dc   :  { %vm2872_vm11 = vcmp.eq.s32.totalorder %v5294_v39, %v6607_v41  ;;  %vm2873_vm12 = vcmp.eq.s32.totalorder %v5319_v23, %v6607_v41 }
 0x3dd   :  { %v5266_v16 = vpop.f32.mrf.mxu3 }
 0x3de   :  { %v5391_v59 = vadd.f32 %v5266_v16, %v5278_v11 }
 0x3df   :  { %v2177_v12 = vpop.f32.mrf.mxu0 }
 0x3e0   :  { %v5405_v16 = vadd.f32 %v2177_v12, %v5287_v10  ;;  %v1781_v12 = vsub.f32 1.5, %v1780_v47  ;;  %v2928_v34 = vsel %vm2864_vm5, %v5391_v59, 0.0 }
 0x3e3   :  { %3319 = vmatmul.msk.bf16.gmra.mxu3 %vm164_vm0, %v1983_v43  ;;  %3335 = vmatmul.msk.bf16.gmra.mxu0 %vm164_vm0, %v1983_v43  ;;  %v2926_v43 = vsel %vm2862_vm4, %v5334_v0, 0.0  ;;  %vm1793_vm4 = vweird.f32 %v5285_v3 }
 0x3e4   :  { %v2992_v28 = vadd.f32 %v2927_v42, %v2926_v43  ;;  %v6598_v43 = vld [vmem:[#allocation13_spill] sm:$0xff]  ;;  %v5446_v42 = vpop.permute.xlu1 %2841  ;;  %vm5457_vm7 = vmor %vm1793_vm4, %vm1794_vm15 }
 0x3e5   :  { %v5306_v4 = vpop.f32.mrf.mxu3  ;;  %vm2866_vm14 = vcmp.eq.s32.totalorder %v5294_v39, %v6598_v43  ;;  %vm2867_vm1 = vcmp.eq.s32.totalorder %v5319_v23, %v6598_v43  ;;  %6600 = vst [vmem:[#allocation2_spill] sm:$0xff] %v5446_v42  ;;  %v2929_v43 = vsel %vm2865_vm10, %v5397_v45, 0.0  ;;  %v6631_v42 = vld [vmem:[#allocation34_spill] sm:$0xff] }
 0x3e6   :  { %v5401_v54 = vadd.f32 %v5306_v4, %v5278_v11 }
 0x3e7   :  { %v2179_v63 = vpop.f32.mrf.mxu0 }
 0x3e8   :  { %v2259_v62 = vmax.f32 %v5401_v54, %v5405_v16  ;;  %v5430_v22 = vadd.f32 %v2179_v63, %v5287_v10  ;;  %v1782_v63 = vmul.f32 %v5337_v61, %v1781_v12 }
 0x3ea   :  { %2248 = vmax.xlane.f32.xlu2 %v2247_v48  ;;  %v2922_v48 = vsel %vm2858_vm9, %v5303_v26, 0.0  ;;  %vm5468_vm9 = vmor %vm1783_vm8, %vm1784_vm3 }
 0x3eb   :  { %v2986_v2 = vadd.f32 %v2923_v32, %v2922_v48 }
 0x3ec   :  { %2251 = vmax.xlane.f32.xlu0 %v2250_v15  ;;  %v1897_v15 = vmul.f32 %v1766_v8, %v4937_v46  ;;  %v2256_v46 = vmax.f32 %v5391_v59, %v5397_v45  ;;  %v2931_v8 = vsel %vm2867_vm1, %v5405_v16, 0.0 }
 0x3ed   :  { %v2090_v30 = vpop.f32.mrf.mxu3 }
 0x3ee   :  { %v1930_v4 = vmul.f32 %v5414_v55, %v1897_v15  ;;  %v5420_v60 = vadd.f32 %v2090_v30, %v5278_v11  ;;  %v2930_v30 = vsel %vm2866_vm14, %v5401_v54, 0.0 }
 0x3ef   :  { %v2182_v18 = vpop.f32.mrf.mxu0  ;;  %v2998_v52 = vadd.f32 %v2931_v8, %v2930_v30 }
 0x3f0   :  { %v1963_v40 = vadd.f32 %v5436_v36, %v1930_v4 }
 0x3f2   :  { %2990 = vadd.xlane.f32.xlu2 %v2989_v53  ;;  %v1792_v53 = vmul.f32 %v5328_v24, %v1791_v6 }
 0x3f3   :  { %3320 = vmatmul.msk.bf16.gmra.mxu3 %vm164_vm0, %v1984_v37  ;;  %3336 = vmatmul.msk.bf16.gmra.mxu0 %vm164_vm0, %v1984_v37  ;;  %v6599_v37 = vld [vmem:[#allocation15_spill] sm:$0xff] }
 0x3f4   :  { %2993 = vadd.xlane.f32.xlu0 %v2992_v28  ;;  %vm2868_vm2 = vcmp.eq.s32.totalorder %v5294_v39, %v6599_v37  ;;  %v1964_v28 = vadd.f32 %v5436_v36, %v1931_v56  ;;  %vm2869_vm6 = vcmp.eq.s32.totalorder %v5319_v23, %v6599_v37  ;;  %v1796_v32 = vsel %vm5457_vm7, %v5328_v24, %v1792_v53 }
 0x3f5   :  { %v2093_v1 = vpop.f32.mrf.mxu3  ;;  %v2932_v48 = vsel %vm2868_vm2, %v5420_v60, 0.0  ;;  %v1786_v24 = vsel %vm5468_vm9, %v5337_v61, %v1782_v63  ;;  %v1900_v4 = vmul.f32 %v1796_v32, %v4980_v13  ;;  %v2995_v53 = vadd.f32 %v2929_v43, %v2928_v34 }
 0x3f6   :  { %v1985_v51 = vpack.c.bf16 %v1964_v28, %v1963_v40  ;;  %v5485_v12 = vadd.f32 %v2093_v1, %v5278_v11  ;;  %v5489_v61 = vadd.f32 %v2182_v18, %v5287_v10  ;;  %v1899_v13 = vmul.f32 %v1786_v24, %v4970_v9 }
 0x3f7   :  { %2987 = vadd.xlane.f32.xlu1 %v2986_v2  ;;  %v2933_v2 = vsel %vm2869_vm6, %v5430_v22, 0.0  ;;  %v1933_v8 = vmul.f32 %v5414_v55, %v1900_v4 }
 0x3f8   :  { %v2265_v63 = vmax.f32 %v5485_v12, %v5489_v61 }
 0x3fa   :  { %2257 = vmax.xlane.f32.xlu2 %v2256_v46  ;;  %v3001_v46 = vadd.f32 %v2933_v2, %v2932_v48  ;;  %v1932_v48 = vmul.f32 %v5414_v55, %v1899_v13 }
 0x3fc   :  { %2260 = vmax.xlane.f32.xlu0 %v2259_v62  ;;  %v5482_v62 = vpop.permute.xlu2 %2844  ;;  %v1965_v34 = vadd.f32 %v5436_v36, %v1932_v48 }
 0x3fd   :  { %v2095_v6 = vpop.f32.mrf.mxu3  ;;  %6606 = vst [vmem:[#allocation28_spill] sm:$0xff] %v5482_v62  ;;  %v6627_v62 = vld [vmem:[#allocation23_spill] sm:$0xff] }
 0x3fe   :  { %v5492_v30 = vadd.f32 %v2095_v6, %v5278_v11  ;;  %v6608_v6 = vld [vmem:[#allocation16_spill] sm:$0xff] }
 0x3ff   :  { %2254 = vmax.xlane.f32.xlu1 %v2253_v35  ;;  %v2184_v35 = vpop.f32.mrf.mxu0  ;;  %vm2870_vm13 = vcmp.eq.s32.totalorder %v5294_v39, %v6608_v6  ;;  %vm2871_vm14 = vcmp.eq.s32.totalorder %v5319_v23, %v6608_v6 }
 0x400   :  { %v5496_v1 = vadd.f32 %v2184_v35, %v5287_v10  ;;  %v2936_v2 = vsel %vm2872_vm11, %v5492_v30, 0.0 }
 0x401   :  { %v1471_v15 = vpop.xlane.xlu0 %1470 }
 0x402   :  { %v1517_v47 = vmul.f32 %v1471_v15, %v4522_v25  ;;  %2999 = vadd.xlane.f32.xlu2 %v2998_v52  ;;  %v2268_v28 = vmax.f32 %v5492_v30, %v5496_v1  ;;  %v1966_v52 = vadd.f32 %v5436_v36, %v1933_v8 }
 0x403   :  { %3321 = vmatmul.msk.bf16.gmra.mxu3 %vm164_vm0, %v1985_v51  ;;  %3337 = vmatmul.msk.bf16.gmra.mxu0 %vm164_vm0, %v1985_v51  ;;  %v2262_v51 = vmax.f32 %v5420_v60, %v5430_v22 }
 0x404   :  { %v1549_v56 = vadd.f32 1e-05, %v1517_v47  ;;  %3002 = vadd.xlane.f32.xlu0 %v3001_v46  ;;  %v2937_v46 = vsel %vm2873_vm12, %v5496_v1, 0.0  ;;  %v1986_v35 = vpack.c.bf16 %v1966_v52, %v1965_v34 }
 0x405   :  { %v3007_v24 = vadd.f32 %v2937_v46, %v2936_v2 }
 0x406   :  { %3441 = vrsqrt.f32 %v1549_v56  ;;  %vm1803_vm1 = vweird.f32 %v1549_v56 }
 0x407   :  { %2996 = vadd.xlane.f32.xlu1 %v2995_v53  ;;  %v1474_v40 = vpop.xlane.xlu1 %1473 }
 0x408   :  { %v1518_v37 = vmul.f32 %v1474_v40, %v4522_v25  ;;  %v2934_v40 = vsel %vm2870_vm13, %v5485_v12, 0.0 }
 0x40a   :  { %v1550_v18 = vadd.f32 1e-05, %v1518_v37  ;;  %2266 = vmax.xlane.f32.xlu2 %v2265_v63 }
 0x40c   :  { %v3442_v9 = vpop.eup %3441  ;;  %3443 = vrsqrt.f32 %v1550_v18  ;;  %v1477_v3 = vpop.xlane.xlu2 %1476  ;;  %2269 = vmax.xlane.f32.xlu0 %v2268_v28  ;;  %v2935_v28 = vsel %vm2871_vm14, %v5489_v61, 0.0  ;;  %vm1813_vm4 = vweird.f32 %v1550_v18 }
 0x40d   :  { %v1798_v32 = vmul.f32 %v3442_v9, %v1549_v56  ;;  %v1519_v15 = vmul.f32 %v1477_v3, %v4522_v25  ;;  %vm1804_vm15 = vweird.f32 %v3442_v9  ;;  %v3004_v3 = vadd.f32 %v2935_v28, %v2934_v40 }
 0x40e   :  { %vm1805_vm2 = vmor %vm1803_vm1, %vm1804_vm15 }
 0x40f   :  { %v1799_v50 = vmul.f32 %v3442_v9, %v1798_v32  ;;  %v5514_v47 = vadd.f32 1e-05, %v1519_v15  ;;  %2263 = vmax.xlane.f32.xlu1 %v2262_v51 }
 0x411   :  { %v1800_v4 = vmul.f32 0.5, %v1799_v50  ;;  %3445 = vrsqrt.f32 %v5514_v47  ;;  %v1480_v43 = vpop.xlane.xlu0 %1479  ;;  %vm1823_vm8 = vweird.f32 %v5514_v47 }
 0x412   :  { %v3444_v53 = vpop.eup %3443  ;;  %v1520_v13 = vmul.f32 %v1480_v43, %v4522_v25  ;;  %3008 = vadd.xlane.f32.xlu2 %v3007_v24 }
 0x413   :  { %v1801_v37 = vsub.f32 1.5, %v1800_v4  ;;  %v1808_v63 = vmul.f32 %v3444_v53, %v1550_v18  ;;  %3322 = vmatmul.msk.bf16.gmra.mxu3 %vm164_vm0, %v1986_v35  ;;  %3338 = vmatmul.msk.bf16.gmra.mxu0 %vm164_vm0, %v1986_v35  ;;  %vm1814_vm3 = vweird.f32 %v3444_v53 }
 0x414   :  { %v1552_v8 = vadd.f32 1e-05, %v1520_v13  ;;  %vm1815_vm5 = vmor %vm1813_vm4, %vm1814_vm3 }
 0x415   :  { %v1802_v48 = vmul.f32 %v3442_v9, %v1801_v37  ;;  %v1809_v41 = vmul.f32 %v3444_v53, %v1808_v63 }
 0x416   :  { %3447 = vrsqrt.f32 %v1552_v8  ;;  %vm1833_vm10 = vweird.f32 %v1552_v8 }
 0x417   :  { %v5528_v52 = vpop.eup %3445  ;;  %v1806_v32 = vsel %vm1805_vm2, %v3442_v9, %v1802_v48  ;;  %v1810_v15 = vmul.f32 0.5, %v1809_v41  ;;  %3005 = vadd.xlane.f32.xlu1 %v3004_v3  ;;  %v1483_v51 = vpop.xlane.xlu1 %1482 }
 0x418   :  { %v1818_v2 = vmul.f32 %v5528_v52, %v5514_v47  ;;  %v1521_v50 = vmul.f32 %v1483_v51, %v4522_v25  ;;  %v1901_v34 = vmul.f32 %v1806_v32, %v5032_v57  ;;  %vm1824_vm6 = vweird.f32 %v5528_v52 }
 0x419   :  { %v1811_v46 = vsub.f32 1.5, %v1810_v15  ;;  %vm5555_vm9 = vmor %vm1823_vm8, %vm1824_vm6 }
 0x41a   :  { %v1819_v56 = vmul.f32 %v5528_v52, %v1818_v2  ;;  %v5535_v24 = vadd.f32 1e-05, %v1521_v50  ;;  %v1934_v57 = vmul.f32 %v5414_v55, %v1901_v34 }
 0x41b   :  { %v1812_v6 = vmul.f32 %v3444_v53, %v1811_v46 }
 0x41c   :  { %v3448_v4 = vpop.eup %3447  ;;  %v1820_v9 = vmul.f32 0.5, %v1819_v56  ;;  %3449 = vrsqrt.f32 %v5535_v24  ;;  %v1486_v43 = vpop.xlane.xlu2 %1485  ;;  %v1967_v51 = vadd.f32 %v5436_v36, %v1934_v57 }
 0x41d   :  { %v1816_v35 = vsel %vm1815_vm5, %v3444_v53, %v1812_v6  ;;  %v1828_v13 = vmul.f32 %v3448_v4, %v1552_v8  ;;  %v1522_v40 = vmul.f32 %v1486_v43, %v4522_v25  ;;  %vm1834_vm7 = vweird.f32 %v3448_v4 }
 0x41e   :  { %v1902_v37 = vmul.f32 %v1816_v35, %v5039_v19  ;;  %v1821_v63 = vsub.f32 1.5, %v1820_v9  ;;  %vm1835_vm11 = vmor %vm1833_vm10, %vm1834_vm7  ;;  %vm1843_vm5 = vweird.f32 %v5535_v24 }
 0x41f   :  { %v1829_v28 = vmul.f32 %v3448_v4, %v1828_v13  ;;  %v5541_v48 = vadd.f32 1e-05, %v1522_v40  ;;  %v6611_v40 = vld [vmem:[#allocation18_spill] sm:$0xff] }
 0x420   :  { %v2187_v41 = vpop.f32.mrf.mxu0  ;;  %v1935_v18 = vmul.f32 %v5414_v55, %v1902_v37  ;;  %v1822_v15 = vmul.f32 %v5528_v52, %v1821_v63  ;;  %vm2874_vm12 = vcmp.eq.s32.totalorder %v5294_v39, %v6611_v40  ;;  %vm2875_vm13 = vcmp.eq.s32.totalorder %v5319_v23, %v6611_v40  ;;  %v6612_v40 = vld [vmem:[#allocation19_spill] sm:$0xff] }
 0x421   :  { %v1830_v3 = vmul.f32 0.5, %v1829_v28  ;;  %3451 = vrsqrt.f32 %v5541_v48  ;;  %v1489_v53 = vpop.xlane.xlu0 %1488  ;;  %v5560_v9 = vadd.f32 %v2187_v41, %v5287_v10  ;;  %vm2876_vm14 = vcmp.eq.s32.totalorder %v5294_v39, %v6612_v40 }
 0x422   :  { %v5546_v32 = vpop.eup %3449  ;;  %v1523_v19 = vmul.f32 %v1489_v53, %v4522_v25  ;;  %v1968_v2 = vadd.f32 %v5436_v36, %v1935_v18  ;;  %v1826_v43 = vsel %vm5555_vm9, %v5528_v52, %v1822_v15  ;;  %vm2877_vm15 = vcmp.eq.s32.totalorder %v5319_v23, %v6612_v40 }
 0x423   :  { %v1831_v50 = vsub.f32 1.5, %v1830_v3  ;;  %v1838_v46 = vmul.f32 %v5546_v32, %v5535_v24  ;;  %v1903_v3 = vmul.f32 %v1826_v43, %v5050_v7  ;;  %v2939_v15 = vsel %vm2875_vm13, %v5560_v9, 0.0 }
 0x424   :  { %v1987_v34 = vpack.c.bf16 %v1968_v2, %v1967_v51  ;;  %v5565_v35 = vadd.f32 1e-05, %v1523_v19  ;;  %vm1853_vm2 = vweird.f32 %v5541_v48  ;;  %vm1844_vm3 = vweird.f32 %v5546_v32 }
 0x425   :  { %v1832_v6 = vmul.f32 %v3448_v4, %v1831_v50  ;;  %v1839_v37 = vmul.f32 %v5546_v32, %v1838_v46  ;;  %v1936_v56 = vmul.f32 %v5414_v55, %v1903_v3  ;;  %vm1845_vm6 = vmor %vm1843_vm5, %vm1844_vm3 }
 0x426   :  { %v2098_v13 = vpop.f32.mrf.mxu3  ;;  %3323 = vmatmul.msk.bf16.gmra.mxu3 %vm164_vm0, %v1987_v34  ;;  %3339 = vmatmul.msk.bf16.gmra.mxu0 %vm164_vm0, %v1987_v34  ;;  %3453 = vrsqrt.f32 %v5565_v35 }
 0x427   :  { %v5569_v47 = vpop.eup %3451  ;;  %v1836_v8 = vsel %vm1835_vm11, %v3448_v4, %v1832_v6  ;;  %v5575_v63 = vadd.f32 %v2098_v13, %v5278_v11  ;;  %v1492_v52 = vpop.xlane.xlu1 %1491  ;;  %v1840_v2 = vmul.f32 0.5, %v1839_v37 }
 0x428   :  { %v1904_v57 = vmul.f32 %v1836_v8, %v5062_v38  ;;  %v1848_v28 = vmul.f32 %v5569_v47, %v5541_v48  ;;  %v1524_v41 = vmul.f32 %v1492_v52, %v4522_v25  ;;  %v2189_v18 = vpop.f32.mrf.mxu0  ;;  %vm1854_vm1 = vweird.f32 %v5569_v47 }
 0x429   :  { %v2271_v4 = vmax.f32 %v5575_v63, %v5560_v9  ;;  %v2938_v53 = vsel %vm2874_vm12, %v5575_v63, 0.0  ;;  %v5595_v50 = vadd.f32 %v2189_v18, %v5287_v10  ;;  %v1841_v6 = vsub.f32 1.5, %v1840_v2  ;;  %vm5626_vm4 = vmor %vm1853_vm2, %vm1854_vm1 }
 0x42a   :  { %v1849_v19 = vmul.f32 %v5569_v47, %v1848_v28  ;;  %v5590_v38 = vadd.f32 1e-05, %v1524_v41  ;;  %v3010_v51 = vadd.f32 %v2939_v15, %v2938_v53  ;;  %v1937_v7 = vmul.f32 %v5414_v55, %v1904_v57 }
 0x42b   :  { %2272 = vmax.xlane.f32.xlu1 %v2271_v4  ;;  %v2941_v41 = vsel %vm2877_vm15, %v5595_v50, 0.0  ;;  %v1969_v4 = vadd.f32 %v5436_v36, %v1936_v56  ;;  %v1842_v53 = vmul.f32 %v5546_v32, %v1841_v6  ;;  %v6615_v6 = vld [vmem:[#allocation14_spill] sm:$0xff]  ;;  %vm1863_vm15 = vweird.f32 %v5565_v35 }
 0x42c   :  { %v1850_v25 = vmul.f32 0.5, %v1849_v19  ;;  %3455 = vrsqrt.f32 %v5590_v38  ;;  %3011 = vadd.xlane.f32.xlu0 %v3010_v51  ;;  %v5601_v13 = vpop.eup %3453  ;;  %v1970_v37 = vadd.f32 %v5436_v36, %v1937_v7  ;;  %vm2878_vm7 = vcmp.eq.s32.totalorder %v5294_v39, %v6615_v6 }
 0x42d   :  { %v1858_v15 = vmul.f32 %v5601_v13, %v5565_v35  ;;  %vm2879_vm8 = vcmp.eq.s32.totalorder %v5319_v23, %v6615_v6  ;;  %vm1864_vm12 = vweird.f32 %v5601_v13  ;;  %vm1873_vm13 = vweird.f32 %v5590_v38 }
 0x42e   :  { %v1851_v46 = vsub.f32 1.5, %v1850_v25  ;;  %v2100_v34 = vpop.f32.mrf.mxu3  ;;  %v1988_v48 = vpack.c.bf16 %v1970_v37, %v1969_v4  ;;  %vm1865_vm1 = vmor %vm1863_vm15, %vm1864_vm12  ;;  %vm2896_vm15 = vcmp.eq.s32.totalorder %v5294_v39, %v6627_v62 }
 0x42f   :  { %v5599_v43 = vadd.f32 %v2100_v34, %v5278_v11  ;;  %v1846_v34 = vsel %vm1845_vm6, %v5546_v32, %v1842_v53  ;;  %v1859_v56 = vmul.f32 %v5601_v13, %v1858_v15 }
 0x430   :  { %v2192_v8 = vpop.f32.mrf.mxu0  ;;  %v1852_v52 = vmul.f32 %v5569_v47, %v1851_v46 }
 0x431   :  { %v2274_v57 = vmax.f32 %v5599_v43, %v5595_v50  ;;  %v2940_v28 = vsel %vm2876_vm14, %v5599_v43, 0.0  ;;  %v5636_v7 = vadd.f32 %v2192_v8, %v5287_v10 }
 0x432   :  { %v5614_v18 = vpop.eup %3455  ;;  %v3013_v3 = vadd.f32 %v2941_v41, %v2940_v28  ;;  %v1856_v2 = vsel %vm5626_vm4, %v5569_v47, %v1852_v52  ;;  %v1860_v41 = vmul.f32 0.5, %v1859_v56 }
 0x433   :  { %v1868_v19 = vmul.f32 %v5614_v18, %v5590_v38  ;;  %2275 = vmax.xlane.f32.xlu2 %v2274_v57  ;;  %v1906_v47 = vmul.f32 %v1856_v2, %v5102_v14  ;;  %v2943_v52 = vsel %vm2879_vm8, %v5636_v7, 0.0  ;;  %v1905_v57 = vmul.f32 %v1846_v34, %v5077_v29 }
 0x434   :  { %3014 = vadd.xlane.f32.xlu1 %v3013_v3  ;;  %vm1874_vm11 = vweird.f32 %v5614_v18 }
 0x435   :  { %v1869_v25 = vmul.f32 %v5614_v18, %v1868_v19  ;;  %v1939_v3 = vmul.f32 %v5414_v55, %v1906_v47  ;;  %v1938_v15 = vmul.f32 %v5414_v55, %v1905_v57  ;;  %v1861_v19 = vsub.f32 1.5, %v1860_v41  ;;  %vm1875_vm14 = vmor %vm1873_vm13, %vm1874_vm11 }
 0x436   :  { %v2103_v46 = vpop.f32.mrf.mxu3  ;;  %3324 = vmatmul.msk.bf16.gmra.mxu3 %vm164_vm0, %v1988_v48  ;;  %3340 = vmatmul.msk.bf16.gmra.mxu0 %vm164_vm0, %v1988_v48  ;;  %v6616_v48 = vld [vmem:[#allocation21_spill] sm:$0xff] }
 0x437   :  { %v5643_v24 = vadd.f32 %v2103_v46, %v5278_v11  ;;  %v1870_v8 = vmul.f32 0.5, %v1869_v25  ;;  %vm2880_vm9 = vcmp.eq.s32.totalorder %v5294_v39, %v6616_v48  ;;  %vm2881_vm10 = vcmp.eq.s32.totalorder %v5319_v23, %v6616_v48 }
 0x438   :  { %v2194_v40 = vpop.f32.mrf.mxu0  ;;  %v1972_v2 = vadd.f32 %v5436_v36, %v1939_v3  ;;  %v1971_v47 = vadd.f32 %v5436_v36, %v1938_v15 }
 0x439   :  { %v2277_v37 = vmax.f32 %v5643_v24, %v5636_v7  ;;  %v2942_v32 = vsel %vm2878_vm7, %v5643_v24, 0.0  ;;  %v1871_v4 = vsub.f32 1.5, %v1870_v8  ;;  %v5657_v14 = vadd.f32 %v2194_v40, %v5287_v10 }
 0x43a   :  { %v3016_v28 = vadd.f32 %v2943_v52, %v2942_v32  ;;  %v1862_v40 = vmul.f32 %v5601_v13, %v1861_v19  ;;  %v1989_v8 = vpack.c.bf16 %v1972_v2, %v1971_v47  ;;  %v6618_v2 = vld [vmem:[#allocation17_spill] sm:$0xff] }
 0x43b   :  { %2278 = vmax.xlane.f32.xlu0 %v2277_v37  ;;  %v1872_v25 = vmul.f32 %v5614_v18, %v1871_v4  ;;  %v2945_v56 = vsel %vm2881_vm10, %v5657_v14, 0.0  ;;  %vm2884_vm4 = vcmp.eq.s32.totalorder %v5294_v39, %v6618_v2  ;;  %vm2885_vm5 = vcmp.eq.s32.totalorder %v5319_v23, %v6618_v2 }
 0x43c   :  { %3017 = vadd.xlane.f32.xlu2 %v3016_v28  ;;  %v1866_v57 = vsel %vm1865_vm1, %v5601_v13, %v1862_v40  ;;  %v6617_v28 = vld [vmem:[#allocation22_spill] sm:$0xff]  ;;  %v5717_v40 = vpop.permute.xlu2 %2853  ;;  %vm2897_vm1 = vcmp.eq.s32.totalorder %v5319_v23, %v6627_v62 }
 0x43d   :  { %v1876_v37 = vsel %vm1875_vm14, %v5614_v18, %v1872_v25  ;;  %vm2882_vm2 = vcmp.eq.s32.totalorder %v5294_v39, %v6617_v28  ;;  %vm2883_vm3 = vcmp.eq.s32.totalorder %v5319_v23, %v6617_v28  ;;  %v1907_v13 = vmul.f32 %v1866_v57, %v5118_v58  ;;  %6619 = vst [vmem:[#allocation25_spill] sm:$0xff] %v5717_v40  ;;  %v6621_v28 = vld [vmem:[#allocation24_spill] sm:$0xff] }
 0x43e   :  { %v2105_v53 = vpop.f32.mrf.mxu3  ;;  %v1908_v35 = vmul.f32 %v1876_v37, %v5136_v5  ;;  %vm2886_vm6 = vcmp.eq.s32.totalorder %v5294_v39, %v6621_v28  ;;  %vm2887_vm7 = vcmp.eq.s32.totalorder %v5319_v23, %v6621_v28 }
 0x43f   :  { %v5661_v51 = vadd.f32 %v2105_v53, %v5278_v11  ;;  %v1940_v5 = vmul.f32 %v5414_v55, %v1907_v13 }
 0x440   :  { %v2197_v29 = vpop.f32.mrf.mxu0  ;;  %v1941_v15 = vmul.f32 %v5414_v55, %v1908_v35 }
 0x441   :  { %v2280_v46 = vmax.f32 %v5661_v51, %v5657_v14  ;;  %v2944_v34 = vsel %vm2880_vm9, %v5661_v51, 0.0  ;;  %v5681_v32 = vadd.f32 %v2197_v29, %v5287_v10 }
 0x442   :  { %v3019_v6 = vadd.f32 %v2945_v56, %v2944_v34  ;;  %v1974_v25 = vadd.f32 %v5436_v36, %v1941_v15 }
 0x443   :  { %2281 = vmax.xlane.f32.xlu1 %v2280_v46  ;;  %v2947_v4 = vsel %vm2883_vm3, %v5681_v32, 0.0  ;;  %vm2899_vm3 = vcmp.eq.s32.totalorder %v5319_v23, %v6631_v42 }
 0x444   :  { %3020 = vadd.xlane.f32.xlu0 %v3019_v6  ;;  %v1973_v6 = vadd.f32 %v5436_v36, %v1940_v5  ;;  %v6622_v5 = vld [vmem:[#allocation26_spill] sm:$0xff] }
 0x445   :  { %vm2889_vm8 = vcmp.eq.s32.totalorder %v5319_v23, %v6622_v5 }
 0x446   :  { %v2108_v52 = vpop.f32.mrf.mxu3  ;;  %3325 = vmatmul.msk.bf16.gmra.mxu3 %vm164_vm0, %v1989_v8  ;;  %3341 = vmatmul.msk.bf16.gmra.mxu0 %vm164_vm0, %v1989_v8  ;;  %v1990_v47 = vpack.c.bf16 %v1974_v25, %v1973_v6 }
 0x447   :  { %v5687_v38 = vadd.f32 %v2108_v52, %v5278_v11  ;;  %v5724_v52 = vpop.permute.xlu0 %2856 }
 0x448   :  { %v2199_v18 = vpop.f32.mrf.mxu0  ;;  %6620 = vst [vmem:[#allocation52_spill] sm:$0xff] %v5724_v52 }
 0x449   :  { %v2283_v41 = vmax.f32 %v5687_v38, %v5681_v32  ;;  %v2946_v3 = vsel %vm2882_vm2, %v5687_v38, 0.0  ;;  %v5701_v19 = vadd.f32 %v2199_v18, %v5287_v10  ;;  %vm2898_vm2 = vcmp.eq.s32.totalorder %v5294_v39, %v6631_v42 }
 0x44a   :  { %v3022_v53 = vadd.f32 %v2947_v4, %v2946_v3 }
 0x44b   :  { %2284 = vmax.xlane.f32.xlu2 %v2283_v41  ;;  %v2949_v56 = vsel %vm2885_vm5, %v5701_v19, 0.0 }
 0x44c   :  { %3023 = vadd.xlane.f32.xlu1 %v3022_v53 }
 0x44e   :  { %v2110_v48 = vpop.f32.mrf.mxu3 }
 0x44f   :  { %v5705_v29 = vadd.f32 %v2110_v48, %v5278_v11 }
 0x450   :  { %v2202_v58 = vpop.f32.mrf.mxu0 }
 0x451   :  { %v2286_v46 = vmax.f32 %v5705_v29, %v5701_v19  ;;  %v2948_v34 = vsel %vm2884_vm4, %v5705_v29, 0.0  ;;  %v5720_v8 = vadd.f32 %v2202_v58, %v5287_v10 }
 0x452   :  { %v3025_v55 = vadd.f32 %v2949_v56, %v2948_v34 }
 0x453   :  { %2287 = vmax.xlane.f32.xlu0 %v2286_v46  ;;  %v2951_v41 = vsel %vm2887_vm7, %v5720_v8, 0.0 }
 0x454   :  { %3026 = vadd.xlane.f32.xlu2 %v3025_v55 }
 0x456   :  { %v2113_v37 = vpop.f32.mrf.mxu3  ;;  %3326 = vmatmul.msk.bf16.gmra.mxu3 %vm164_vm0, %v1990_v47  ;;  %3342 = vmatmul.msk.bf16.gmra.mxu0 %vm164_vm0, %v1990_v47  ;;  %vm2888_vm0 = vcmp.eq.s32.totalorder %v5294_v39, %v6622_v5  ;;  %v5763_v47 = vpop.permute.xlu1 %2850 }
 0x457   :  { %v5727_v57 = vadd.f32 %v2113_v37, %v5278_v11  ;;  %6623 = vst [vmem:[#allocation3_spill] sm:$0xff] %v5763_v47 }
 0x458   :  { %v2204_v36 = vpop.f32.mrf.mxu0 }
 0x459   :  { %v2289_v35 = vmax.f32 %v5727_v57, %v5720_v8  ;;  %v2950_v18 = vsel %vm2886_vm6, %v5727_v57, 0.0  ;;  %v5738_v4 = vadd.f32 %v2204_v36, %v5287_v10 }
 0x45a   :  { %v3028_v3 = vadd.f32 %v2951_v41, %v2950_v18 }
 0x45b   :  { %2290 = vmax.xlane.f32.xlu1 %v2289_v35  ;;  %v2953_v6 = vsel %vm2889_vm8, %v5738_v4, 0.0  ;;  %vm2907_vm8 = vcmp.eq.s32.totalorder %v5319_v23, %v5023_v33 }
 0x45c   :  { %3029 = vadd.xlane.f32.xlu0 %v3028_v3  ;;  %v6624_v3 = vld [vmem:[#allocation20_spill] sm:$0xff] }
 0x45d   :  { %v5740_v13 = vpop.xlane.xlu2 %2248  ;;  %vm2890_vm9 = vcmp.eq.s32.totalorder %v5294_v39, %v6624_v3  ;;  %vm2891_vm10 = vcmp.eq.s32.totalorder %v5319_v23, %v6624_v3 }
 0x45e   :  { %v2343_v53 = vsub.f32 %v5303_v26, %v5740_v13  ;;  %v2344_v15 = vsub.f32 %v5311_v27, %v5740_v13  ;;  %v2115_v48 = vpop.f32.mrf.mxu3 }
 0x45f   :  { %v5749_v2 = vadd.f32 %v2115_v48, %v5278_v11  ;;  %v5751_v58 = vpop.xlane.xlu0 %2251 }
 0x460   :  { %v2407_v25 = vmul.f32 1.442695, %v2343_v53  ;;  %v2409_v46 = vmul.f32 1.442695, %v2344_v15  ;;  %v2345_v26 = vsub.f32 %v5315_v31, %v5751_v58  ;;  %v2207_v34 = vpop.f32.mrf.mxu0  ;;  %v2346_v27 = vsub.f32 %v5323_v21, %v5751_v58 }
 0x461   :  { %v2292_v56 = vmax.f32 %v5749_v2, %v5738_v4  ;;  %v2952_v55 = vsel %vm2888_vm0, %v5749_v2, 0.0  ;;  %v5766_v36 = vadd.f32 %v2207_v34, %v5287_v10  ;;  %vm2906_vm0 = vcmp.eq.s32.totalorder %v5294_v39, %v5023_v33 }
 0x462   :  { %3457 = vpow2.f32 %v2407_v25  ;;  %v3031_v37 = vadd.f32 %v2953_v6, %v2952_v55  ;;  %v2411_v28 = vmul.f32 1.442695, %v2345_v26  ;;  %v2413_v31 = vmul.f32 1.442695, %v2346_v27 }
 0x463   :  { %3459 = vpow2.f32 %v2409_v46  ;;  %2293 = vmax.xlane.f32.xlu2 %v2292_v56  ;;  %v2955_v25 = vsel %vm2891_vm10, %v5766_v36, 0.0  ;;  %vm2909_vm10 = vcmp.eq.s32.totalorder %v5319_v23, %v5029_v49 }
 0x464   :  { %3032 = vadd.xlane.f32.xlu1 %v3031_v37  ;;  %3461 = vpow2.f32 %v2411_v28 }
 0x465   :  { %v5768_v21 = vpop.xlane.xlu2 %2990  ;;  %3463 = vpow2.f32 %v2413_v31 }
 0x466   :  { %v2118_v35 = vpop.f32.mrf.mxu3 }
 0x467   :  { %v5771_v18 = vadd.f32 %v2118_v35, %v5278_v11  ;;  %v5783_v27 = vpop.xlane.xlu0 %2993 }
 0x468   :  { %v3458_v41 = vpop.eup %3457  ;;  %v2209_v53 = vpop.f32.mrf.mxu0 }
 0x469   :  { %v3460_v15 = vpop.eup %3459  ;;  %v2295_v48 = vmax.f32 %v5771_v18, %v5766_v36  ;;  %v2954_v5 = vsel %vm2890_vm9, %v5771_v18, 0.0  ;;  %v5786_v56 = vadd.f32 %v2209_v53, %v5287_v10  ;;  %vm2908_vm9 = vcmp.eq.s32.totalorder %v5294_v39, %v5029_v49 }
 0x46a   :  { %v5781_v46 = vpop.xlane.xlu1 %2987  ;;  %v2535_v26 = vadd.f32 %v3460_v15, %v3458_v41  ;;  %v3034_v34 = vadd.f32 %v2955_v25, %v2954_v5  ;;  %v3462_v6 = vpop.eup %3461  ;;  %v6625_v41 = vld [vmem:[#allocation31_spill] sm:$0xff] }
 0x46b   :  { %2296 = vmax.xlane.f32.xlu0 %v2295_v48  ;;  %v3464_v31 = vpop.eup %3463  ;;  %vm2892_vm11 = vcmp.eq.s32.totalorder %v5294_v39, %v6625_v41  ;;  %vm2893_vm12 = vcmp.eq.s32.totalorder %v5319_v23, %v6625_v41 }
 0x46c   :  { %2536 = vadd.xlane.f32.xlu1 %v2535_v26  ;;  %3035 = vadd.xlane.f32.xlu2 %v3034_v34  ;;  %v2957_v48 = vsel %vm2893_vm12, %v5786_v56, 0.0  ;;  %v2538_v26 = vadd.f32 %v3464_v31, %v3462_v6  ;;  %v6626_v31 = vld [vmem:[#allocation32_spill] sm:$0xff]  ;;  %vm3114_vm12 = vcmask 7168  }
 0x46d   :  { %v5788_v55 = vpop.xlane.xlu2 %2257  ;;  %vm2894_vm13 = vcmp.eq.s32.totalorder %v5294_v39, %v6626_v31  ;;  %vm2895_vm14 = vcmp.eq.s32.totalorder %v5319_v23, %v6626_v31 }
 0x46e   :  { %v2349_v37 = vsub.f32 %v5391_v59, %v5788_v55  ;;  %v2120_v28 = vpop.f32.mrf.mxu3  ;;  %v2350_v53 = vsub.f32 %v5397_v45, %v5788_v55 }
 0x46f   :  { %v5793_v35 = vadd.f32 %v2120_v28, %v5278_v11  ;;  %v5811_v52 = vpop.xlane.xlu0 %2260 }
 0x470   :  { %v2212_v3 = vpop.f32.mrf.mxu0  ;;  %v2419_v5 = vmul.f32 1.442695, %v2349_v37  ;;  %v2421_v45 = vmul.f32 1.442695, %v2350_v53 }
 0x471   :  { %v2298_v15 = vmax.f32 %v5793_v35, %v5786_v56  ;;  %v2956_v59 = vsel %vm2892_vm11, %v5793_v35, 0.0  ;;  %v5814_v17 = vadd.f32 %v2212_v3, %v5287_v10  ;;  %v2352_v3 = vsub.f32 %v5405_v16, %v5811_v52 }
 0x472   :  { %v5805_v25 = vpop.xlane.xlu1 %2254  ;;  %v3037_v34 = vadd.f32 %v2957_v48, %v2956_v59  ;;  %3465 = vpow2.f32 %v2419_v5  ;;  %vm2904_vm11 = vcmp.eq.s32.totalorder %v5294_v39, %v5025_v44 }
 0x473   :  { %v2347_v28 = vsub.f32 %v5334_v0, %v5805_v25  ;;  %v2348_v41 = vsub.f32 %v5347_v20, %v5805_v25  ;;  %v2351_v20 = vsub.f32 %v5401_v54, %v5811_v52  ;;  %v2959_v59 = vsel %vm2895_vm14, %v5814_v17, 0.0 }
 0x474   :  { %2299 = vmax.xlane.f32.xlu1 %v2298_v15  ;;  %2539 = vadd.xlane.f32.xlu2 %v2538_v26 }
 0x475   :  { %v2415_v40 = vmul.f32 1.442695, %v2347_v28  ;;  %v2417_v37 = vmul.f32 1.442695, %v2348_v41  ;;  %3038 = vadd.xlane.f32.xlu0 %v3037_v34  ;;  %v5833_v26 = vpop.xlane.xlu2 %2999  ;;  %v2423_v54 = vmul.f32 1.442695, %v2351_v20 }
 0x476   :  { %v2123_v6 = vpop.f32.mrf.mxu3  ;;  %v2425_v28 = vmul.f32 1.442695, %v2352_v3 }
 0x477   :  { %3467 = vpow2.f32 %v2415_v40  ;;  %v5819_v0 = vadd.f32 %v2123_v6, %v5278_v11 }
 0x478   :  { %3469 = vpow2.f32 %v2417_v37  ;;  %v2214_v53 = vpop.f32.mrf.mxu0  ;;  %v3466_v34 = vpop.eup %3465 }
 0x479   :  { %3471 = vpow2.f32 %v2421_v45  ;;  %v2958_v15 = vsel %vm2894_vm13, %v5819_v0, 0.0  ;;  %v2301_v40 = vmax.f32 %v5819_v0, %v5814_v17  ;;  %v5836_v41 = vadd.f32 %v2214_v53, %v5287_v10 }
 0x47a   :  { %v5831_v48 = vpop.xlane.xlu1 %2996  ;;  %v3040_v5 = vadd.f32 %v2959_v59, %v2958_v15  ;;  %3473 = vpow2.f32 %v2423_v54  ;;  %vm2905_vm13 = vcmp.eq.s32.totalorder %v5319_v23, %v5025_v44 }
 0x47b   :  { %3475 = vpow2.f32 %v2425_v28  ;;  %v2961_v53 = vsel %vm2897_vm1, %v5836_v41, 0.0 }
 0x47c   :  { %3041 = vadd.xlane.f32.xlu1 %v3040_v5  ;;  %2302 = vmax.xlane.f32.xlu2 %v2301_v40  ;;  %v5849_v5 = vpop.xlane.xlu0 %3002 }
 0x47d   :  { %v3468_v16 = vpop.eup %3467  ;;  %6629 = vst [vmem:[#allocation30_spill] sm:$0xff] %v5849_v5 }
 0x47e   :  { %v3470_v45 = vpop.eup %3469  ;;  %v2125_v37 = vpop.f32.mrf.mxu3 }
 0x47f   :  { %v3472_v6 = vpop.eup %3471  ;;  %v5839_v31 = vadd.f32 %v2125_v37, %v5278_v11  ;;  %v2541_v47 = vadd.f32 %v3470_v45, %v3468_v16  ;;  %v5851_v16 = vpop.xlane.xlu2 %2266 }
 0x480   :  { %v2217_v20 = vpop.f32.mrf.mxu0  ;;  %v2544_v59 = vadd.f32 %v3472_v6, %v3466_v34  ;;  %6630 = vst [vmem:[#allocation54_spill] sm:$0xff] %v5851_v16  ;;  %v3474_v54 = vpop.eup %3473 }
 0x481   :  { %2542 = vadd.xlane.f32.xlu0 %v2541_v47  ;;  %v2960_v3 = vsel %vm2896_vm15, %v5839_v31, 0.0  ;;  %v3476_v45 = vpop.eup %3475  ;;  %v5858_v37 = vadd.f32 %v2217_v20, %v5287_v10  ;;  %v2304_v6 = vmax.f32 %v5839_v31, %v5836_v41 }
 0x482   :  { %v5847_v15 = vpop.xlane.xlu1 %2263  ;;  %v3043_v40 = vadd.f32 %v2961_v53, %v2960_v3  ;;  %v2355_v3 = vsub.f32 %v5485_v12, %v5851_v16 }
 0x483   :  { %6628 = vst [vmem:[#allocation29_spill] sm:$0xff] %v5847_v15  ;;  %v2353_v62 = vsub.f32 %v5420_v60, %v5847_v15  ;;  %v2354_v47 = vsub.f32 %v5430_v22, %v5847_v15  ;;  %v2356_v60 = vsub.f32 %v5489_v61, %v5851_v16  ;;  %v6634_v15 = vld [vmem:[#allocation27_spill] sm:$0xff] }
 0x484   :  { %2545 = vadd.xlane.f32.xlu1 %v2544_v59  ;;  %3044 = vadd.xlane.f32.xlu2 %v3043_v40  ;;  %v2547_v40 = vadd.f32 %v3476_v45, %v3474_v54  ;;  %v5876_v61 = vpop.xlane.xlu0 %2269  ;;  %v6633_v45 = vld [vmem:[#allocation35_spill] sm:$0xff]  ;;  %vm2902_vm6 = vcmp.eq.s32.totalorder %v5294_v39, %v6634_v15  ;;  %vm2903_vm7 = vcmp.eq.s32.totalorder %v5319_v23, %v6634_v15 }
 0x485   :  { %v2427_v59 = vmul.f32 1.442695, %v2353_v62  ;;  %v2429_v20 = vmul.f32 1.442695, %v2354_v47  ;;  %v2433_v12 = vmul.f32 1.442695, %v2356_v60  ;;  %vm2900_vm4 = vcmp.eq.s32.totalorder %v5294_v39, %v6633_v45 }
 0x486   :  { %v2128_v28 = vpop.f32.mrf.mxu3  ;;  %6632 = vst [vmem:[#allocation4_spill] sm:$0xff] %v5876_v61  ;;  %v2963_v47 = vsel %vm2899_vm3, %v5858_v37, 0.0  ;;  %vm2901_vm5 = vcmp.eq.s32.totalorder %v5319_v23, %v6633_v45  ;;  %v2357_v42 = vsub.f32 %v5492_v30, %v5876_v61 }
 0x487   :  { %v5861_v34 = vadd.f32 %v2128_v28, %v5278_v11  ;;  %v2431_v28 = vmul.f32 1.442695, %v2355_v3  ;;  %3477 = vpow2.f32 %v2427_v59 }
 0x488   :  { %v2219_v53 = vpop.f32.mrf.mxu0  ;;  %3479 = vpow2.f32 %v2429_v20 }
 0x489   :  { %2305 = vmax.xlane.f32.xlu0 %v2304_v6  ;;  %v2307_v22 = vmax.f32 %v5861_v34, %v5858_v37  ;;  %v2962_v5 = vsel %vm2898_vm2, %v5861_v34, 0.0  ;;  %v5879_v62 = vadd.f32 %v2219_v53, %v5287_v10  ;;  %3481 = vpow2.f32 %v2431_v28 }
 0x48a   :  { %v3046_v3 = vadd.f32 %v2963_v47, %v2962_v5  ;;  %v2358_v53 = vsub.f32 %v5496_v1, %v5876_v61  ;;  %3483 = vpow2.f32 %v2433_v12  ;;  %v2435_v28 = vmul.f32 1.442695, %v2357_v42  ;;  %v5900_v12 = vpop.xlane.xlu1 %3005 }
 0x48c   :  { %2308 = vmax.xlane.f32.xlu1 %v2307_v22  ;;  %2548 = vadd.xlane.f32.xlu2 %v2547_v40  ;;  %v2965_v22 = vsel %vm2901_vm5, %v5879_v62, 0.0  ;;  %v2437_v30 = vmul.f32 1.442695, %v2358_v53  ;;  %3485 = vpow2.f32 %v2435_v28 }
 0x48d   :  { %v3478_v40 = vpop.eup %3477 }
 0x48e   :  { %v2130_v54 = vpop.f32.mrf.mxu3  ;;  %3487 = vpow2.f32 %v2437_v30 }
 0x48f   :  { %v5885_v6 = vadd.f32 %v2130_v54, %v5278_v11  ;;  %v3480_v54 = vpop.eup %3479 }
 0x490   :  { %v2222_v60 = vpop.f32.mrf.mxu0  ;;  %v3482_v1 = vpop.eup %3481  ;;  %v2550_v16 = vadd.f32 %v3480_v54, %v3478_v40 }
 0x491   :  { %3047 = vadd.xlane.f32.xlu0 %v3046_v3  ;;  %v2964_v59 = vsel %vm2900_vm4, %v5885_v6, 0.0  ;;  %v2310_v5 = vmax.f32 %v5885_v6, %v5879_v62  ;;  %v5898_v47 = vadd.f32 %v2222_v60, %v5287_v10  ;;  %v3484_v3 = vpop.eup %3483 }
 0x492   :  { %v3049_v20 = vadd.f32 %v2965_v22, %v2964_v59  ;;  %v2553_v60 = vadd.f32 %v3484_v3, %v3482_v1 }
 0x493   :  { %v2967_v53 = vsel %vm2903_vm7, %v5898_v47, 0.0 }
 0x494   :  { %3050 = vadd.xlane.f32.xlu1 %v3049_v20  ;;  %2311 = vmax.xlane.f32.xlu2 %v2310_v5  ;;  %v5911_v5 = vpop.xlane.xlu2 %3008  ;;  %v3486_v20 = vpop.eup %3485 }
 0x495   :  { %v3488_v28 = vpop.eup %3487 }
 0x496   :  { %v2133_v45 = vpop.f32.mrf.mxu3 }
 0x497   :  { %v5903_v61 = vadd.f32 %v2133_v45, %v5278_v11 }
 0x498   :  { %v2224_v22 = vpop.f32.mrf.mxu0 }
 0x499   :  { %2551 = vadd.xlane.f32.xlu0 %v2550_v16  ;;  %v2966_v42 = vsel %vm2902_vm6, %v5903_v61, 0.0  ;;  %v5914_v40 = vadd.f32 %v2224_v22, %v5287_v10  ;;  %v2313_v45 = vmax.f32 %v5903_v61, %v5898_v47 }
 0x49a   :  { %v3052_v59 = vadd.f32 %v2967_v53, %v2966_v42 }
 0x49c   :  { %2554 = vadd.xlane.f32.xlu1 %v2553_v60  ;;  %3053 = vadd.xlane.f32.xlu2 %v3052_v59  ;;  %v2556_v60 = vadd.f32 %v3488_v28, %v3486_v20 }
 0x49e   :  { %v2135_v54 = vpop.f32.mrf.mxu3  ;;  %v5916_v15 = vpop.xlane.xlu1 %2272 }
 0x49f   :  { %6635 = vst [vmem:[#allocation33_spill] sm:$0xff] %v5916_v15  ;;  %v5919_v16 = vadd.f32 %v2135_v54, %v5278_v11  ;;  %v2359_v30 = vsub.f32 %v5575_v63, %v5916_v15  ;;  %v2360_v1 = vsub.f32 %v5560_v9, %v5916_v15  ;;  %v5929_v22 = vpop.xlane.xlu0 %3011 }
 0x4a1   :  { %v2439_v3 = vmul.f32 1.442695, %v2359_v30  ;;  %v2441_v42 = vmul.f32 1.442695, %v2360_v1  ;;  %2314 = vmax.xlane.f32.xlu0 %v2313_v45  ;;  %v2316_v53 = vmax.f32 %v5919_v16, %v5914_v40 }
 0x4a3   :  { %3489 = vpow2.f32 %v2439_v3  ;;  %v2227_v59 = vpop.f32.mrf.mxu0 }
 0x4a4   :  { %3491 = vpow2.f32 %v2441_v42  ;;  %2317 = vmax.xlane.f32.xlu1 %v2316_v53  ;;  %2557 = vadd.xlane.f32.xlu2 %v2556_v60  ;;  %v5938_v28 = vadd.f32 %v2227_v59, %v5287_v10 }
 0x4a6   :  { %v5931_v63 = vpop.xlane.xlu2 %2275 }
 0x4a7   :  { %v2361_v9 = vsub.f32 %v5599_v43, %v5931_v63  ;;  %v2362_v54 = vsub.f32 %v5595_v50, %v5931_v63  ;;  %v5945_v50 = vpop.xlane.xlu1 %3014 }
 0x4a8   :  { %6636 = vst [vmem:[#allocation55_spill] sm:$0xff] %v5945_v50 }
 0x4a9   :  { %v3490_v30 = vpop.eup %3489  ;;  %v2443_v1 = vmul.f32 1.442695, %v2361_v9  ;;  %v2445_v45 = vmul.f32 1.442695, %v2362_v54  ;;  %v2138_v15 = vpop.f32.mrf.mxu3 }
 0x4aa   :  { %v3492_v20 = vpop.eup %3491  ;;  %v5941_v3 = vadd.f32 %v2138_v15, %v5278_v11 }
 0x4ab   :  { %3493 = vpow2.f32 %v2443_v1  ;;  %v2229_v42 = vpop.f32.mrf.mxu0  ;;  %v2559_v53 = vadd.f32 %v3492_v20, %v3490_v30 }
 0x4ac   :  { %3495 = vpow2.f32 %v2445_v45  ;;  %v2319_v43 = vmax.f32 %v5941_v3, %v5938_v28  ;;  %v5954_v20 = vadd.f32 %v2229_v42, %v5287_v10 }
 0x4ad   :  { %2560 = vadd.xlane.f32.xlu0 %v2559_v53 }
 0x4ae   :  { %v5947_v60 = vpop.xlane.xlu0 %2278  ;;  %2320 = vmax.xlane.f32.xlu2 %v2319_v43 }
 0x4af   :  { %6637 = vst [vmem:[#allocation5_spill] sm:$0xff] %v5947_v60  ;;  %v2363_v59 = vsub.f32 %v5643_v24, %v5947_v60  ;;  %v2364_v15 = vsub.f32 %v5636_v7, %v5947_v60  ;;  %v5961_v7 = vpop.xlane.xlu2 %3017 }
 0x4b0   :  { %6638 = vst [vmem:[#allocation36_spill] sm:$0xff] %v5961_v7 }
 0x4b1   :  { %v3494_v9 = vpop.eup %3493  ;;  %v2447_v54 = vmul.f32 1.442695, %v2363_v59  ;;  %v2449_v1 = vmul.f32 1.442695, %v2364_v15  ;;  %v2140_v30 = vpop.f32.mrf.mxu3 }
 0x4b2   :  { %v3496_v45 = vpop.eup %3495  ;;  %v5957_v53 = vadd.f32 %v2140_v30, %v5278_v11 }
 0x4b3   :  { %3497 = vpow2.f32 %v2447_v54  ;;  %v2232_v50 = vpop.f32.mrf.mxu0  ;;  %v2562_v43 = vadd.f32 %v3496_v45, %v3494_v9 }
 0x4b4   :  { %3499 = vpow2.f32 %v2449_v1  ;;  %v2322_v24 = vmax.f32 %v5957_v53, %v5954_v20  ;;  %v5970_v45 = vadd.f32 %v2232_v50, %v5287_v10 }
 0x4b5   :  { %2563 = vadd.xlane.f32.xlu1 %v2562_v43 }
 0x4b6   :  { %2323 = vmax.xlane.f32.xlu0 %v2322_v24  ;;  %v5963_v59 = vpop.xlane.xlu1 %2281 }
 0x4b7   :  { %6639 = vst [vmem:[#allocation56_spill] sm:$0xff] %v5963_v59  ;;  %v2365_v42 = vsub.f32 %v5661_v51, %v5963_v59  ;;  %v2366_v15 = vsub.f32 %v5657_v14, %v5963_v59  ;;  %v5977_v14 = vpop.xlane.xlu0 %3020 }
 0x4b8   :  { %6640 = vst [vmem:[#allocation6_spill] sm:$0xff] %v5977_v14 }
 0x4b9   :  { %v3498_v30 = vpop.eup %3497  ;;  %v2451_v54 = vmul.f32 1.442695, %v2365_v42  ;;  %v2453_v60 = vmul.f32 1.442695, %v2366_v15  ;;  %v2143_v9 = vpop.f32.mrf.mxu3 }
 0x4ba   :  { %v3500_v1 = vpop.eup %3499  ;;  %v5973_v43 = vadd.f32 %v2143_v9, %v5278_v11 }
 0x4bb   :  { %3501 = vpow2.f32 %v2451_v54  ;;  %v2234_v24 = vpop.f32.mrf.mxu0  ;;  %v2565_v7 = vadd.f32 %v3500_v1, %v3498_v30 }
 0x4bc   :  { %3503 = vpow2.f32 %v2453_v60  ;;  %v2325_v51 = vmax.f32 %v5973_v43, %v5970_v45  ;;  %v5986_v1 = vadd.f32 %v2234_v24, %v5287_v10 }
 0x4bd   :  { %2566 = vadd.xlane.f32.xlu2 %v2565_v7 }
 0x4be   :  { %v5979_v42 = vpop.xlane.xlu2 %2284  ;;  %2326 = vmax.xlane.f32.xlu1 %v2325_v51 }
 0x4bf   :  { %6641 = vst [vmem:[#allocation37_spill] sm:$0xff] %v5979_v42  ;;  %v2367_v50 = vsub.f32 %v5687_v38, %v5979_v42  ;;  %v2368_v15 = vsub.f32 %v5681_v32, %v5979_v42  ;;  %v5993_v32 = vpop.xlane.xlu1 %3023 }
 0x4c0   :  { %6642 = vst [vmem:[#allocation7_spill] sm:$0xff] %v5993_v32 }
 0x4c1   :  { %v3502_v9 = vpop.eup %3501  ;;  %v2455_v54 = vmul.f32 1.442695, %v2367_v50  ;;  %v2457_v59 = vmul.f32 1.442695, %v2368_v15  ;;  %v2145_v30 = vpop.f32.mrf.mxu3 }
 0x4c2   :  { %v3504_v60 = vpop.eup %3503  ;;  %v5989_v7 = vadd.f32 %v2145_v30, %v5278_v11 }
 0x4c3   :  { %3505 = vpow2.f32 %v2455_v54  ;;  %v2237_v14 = vpop.f32.mrf.mxu0  ;;  %v2568_v51 = vadd.f32 %v3504_v60, %v3502_v9 }
 0x4c4   :  { %3507 = vpow2.f32 %v2457_v59  ;;  %v2328_v38 = vmax.f32 %v5989_v7, %v5986_v1  ;;  %v6002_v60 = vadd.f32 %v2237_v14, %v5287_v10 }
 0x4c5   :  { %2569 = vadd.xlane.f32.xlu0 %v2568_v51 }
 0x4c6   :  { %v5995_v50 = vpop.xlane.xlu0 %2287  ;;  %2329 = vmax.xlane.f32.xlu2 %v2328_v38 }
 0x4c7   :  { %6643 = vst [vmem:[#allocation57_spill] sm:$0xff] %v5995_v50  ;;  %v2369_v24 = vsub.f32 %v5705_v29, %v5995_v50  ;;  %v2370_v15 = vsub.f32 %v5701_v19, %v5995_v50  ;;  %v6009_v19 = vpop.xlane.xlu2 %3026 }
 0x4c8   :  { %6644 = vst [vmem:[#allocation38_spill] sm:$0xff] %v6009_v19 }
 0x4c9   :  { %v3506_v30 = vpop.eup %3505  ;;  %v2459_v54 = vmul.f32 1.442695, %v2369_v24  ;;  %v2461_v42 = vmul.f32 1.442695, %v2370_v15  ;;  %v2148_v9 = vpop.f32.mrf.mxu3 }
 0x4ca   :  { %v3508_v59 = vpop.eup %3507  ;;  %v6005_v51 = vadd.f32 %v2148_v9, %v5278_v11 }
 0x4cb   :  { %3509 = vpow2.f32 %v2459_v54  ;;  %v2239_v32 = vpop.f32.mrf.mxu0  ;;  %v2571_v38 = vadd.f32 %v3508_v59, %v3506_v30 }
 0x4cc   :  { %3511 = vpow2.f32 %v2461_v42  ;;  %v2331_v29 = vmax.f32 %v6005_v51, %v6002_v60  ;;  %v6018_v59 = vadd.f32 %v2239_v32, %v5287_v10 }
 0x4cd   :  { %2572 = vadd.xlane.f32.xlu1 %v2571_v38 }
 0x4ce   :  { %2332 = vmax.xlane.f32.xlu0 %v2331_v29  ;;  %v6011_v24 = vpop.xlane.xlu1 %2290 }
 0x4cf   :  { %6645 = vst [vmem:[#allocation39_spill] sm:$0xff] %v6011_v24  ;;  %v2371_v14 = vsub.f32 %v5727_v57, %v6011_v24  ;;  %v2372_v15 = vsub.f32 %v5720_v8, %v6011_v24  ;;  %v6025_v8 = vpop.xlane.xlu0 %3029 }
 0x4d0   :  { %6646 = vst [vmem:[#allocation40_spill] sm:$0xff] %v6025_v8 }
 0x4d1   :  { %v3510_v9 = vpop.eup %3509  ;;  %v2463_v54 = vmul.f32 1.442695, %v2371_v14  ;;  %v2465_v50 = vmul.f32 1.442695, %v2372_v15  ;;  %v2150_v30 = vpop.f32.mrf.mxu3 }
 0x4d2   :  { %v3512_v42 = vpop.eup %3511  ;;  %v6021_v38 = vadd.f32 %v2150_v30, %v5278_v11 }
 0x4d3   :  { %3513 = vpow2.f32 %v2463_v54  ;;  %v2574_v29 = vadd.f32 %v3512_v42, %v3510_v9  ;;  %v2242_v19 = vpop.f32.mrf.mxu0 }
 0x4d4   :  { %3515 = vpow2.f32 %v2465_v50  ;;  %v2334_v57 = vmax.f32 %v6021_v38, %v6018_v59 }
 0x4d5   :  { %2575 = vadd.xlane.f32.xlu2 %v2574_v29  ;;  %v2970_v29 = vsel %vm2906_vm0, %v5941_v3, 0.0 }
 0x4d6   :  { %v6027_v14 = vpop.xlane.xlu2 %2293  ;;  %2335 = vmax.xlane.f32.xlu1 %v2334_v57 }
 0x4d7   :  { %6647 = vst [vmem:[#allocation41_spill] sm:$0xff] %v6027_v14  ;;  %v2373_v32 = vsub.f32 %v5749_v2, %v6027_v14  ;;  %v2374_v15 = vsub.f32 %v5738_v4, %v6027_v14  ;;  %v6033_v30 = vpop.xlane.xlu1 %3032  ;;  %v6041_v2 = vadd.f32 %v2242_v19, %v5287_v10 }
 0x4d8   :  { %6648 = vst [vmem:[#allocation42_spill] sm:$0xff] %v6033_v30  ;;  %v2971_v30 = vsel %vm2907_vm8, %v5938_v28, 0.0 }
 0x4d9   :  { %v3514_v50 = vpop.eup %3513  ;;  %v2467_v9 = vmul.f32 1.442695, %v2373_v32  ;;  %v2469_v54 = vmul.f32 1.442695, %v2374_v15  ;;  %v2153_v42 = vpop.f32.mrf.mxu3  ;;  %v3058_v32 = vadd.f32 %v2971_v30, %v2970_v29  ;;  %v2972_v29 = vsel %vm2908_vm9, %v5957_v53, 0.0 }
 0x4da   :  { %v3516_v8 = vpop.eup %3515  ;;  %v6044_v4 = vadd.f32 %v2153_v42, %v5278_v11 }
 0x4db   :  { %3517 = vpow2.f32 %v2467_v9  ;;  %v2577_v57 = vadd.f32 %v3516_v8, %v3514_v50  ;;  %v2244_v14 = vpop.f32.mrf.mxu0 }
 0x4dc   :  { %3519 = vpow2.f32 %v2469_v54  ;;  %v2337_v15 = vmax.f32 %v6044_v4, %v6041_v2 }
 0x4dd   :  { %2578 = vadd.xlane.f32.xlu0 %v2577_v57 }
 0x4de   :  { %v6049_v24 = vpop.xlane.xlu0 %2296  ;;  %3059 = vadd.xlane.f32.xlu1 %v3058_v32  ;;  %2338 = vmax.xlane.f32.xlu2 %v2337_v15  ;;  %v2973_v32 = vsel %vm2909_vm10, %v5954_v20, 0.0 }
 0x4df   :  { %v2375_v33 = vsub.f32 %v5771_v18, %v6049_v24  ;;  %v2376_v19 = vsub.f32 %v5766_v36, %v6049_v24  ;;  %v6055_v8 = vpop.xlane.xlu2 %3035  ;;  %v2537_v50 = vpop.xlane.xlu1 %2536  ;;  %v6063_v18 = vadd.f32 %v2244_v14, %v5287_v10 }
 0x4e0   :  { %6649 = vst [vmem:[#allocation43_spill] sm:$0xff] %v6055_v8  ;;  %3521 = vlog2.f32 %v2537_v50 }
 0x4e1   :  { %v3518_v30 = vpop.eup %3517  ;;  %v2471_v9 = vmul.f32 1.442695, %v2375_v33  ;;  %v2473_v54 = vmul.f32 1.442695, %v2376_v19  ;;  %v2155_v42 = vpop.f32.mrf.mxu3  ;;  %v3061_v33 = vadd.f32 %v2973_v32, %v2972_v29 }
 0x4e2   :  { %v3520_v57 = vpop.eup %3519  ;;  %v6066_v36 = vadd.f32 %v2155_v42, %v5278_v11 }
 0x4e3   :  { %3523 = vpow2.f32 %v2471_v9  ;;  %v2580_v15 = vadd.f32 %v3520_v57, %v3518_v30  ;;  %v2968_v57 = vsel %vm2904_vm11, %v5919_v16, 0.0 }
 0x4e4   :  { %3525 = vpow2.f32 %v2473_v54  ;;  %v2340_v19 = vmax.f32 %v6066_v36, %v6063_v18 }
 0x4e6   :  { %v3522_v50 = vpop.eup %3521  ;;  %2581 = vadd.xlane.f32.xlu1 %v2580_v15  ;;  %3062 = vadd.xlane.f32.xlu2 %v3061_v33  ;;  %v2969_v15 = vsel %vm2905_vm13, %v5914_v40, 0.0 }
 0x4e7   :  { %v2632_v8 = vmul.f32 0.6931472, %v3522_v50  ;;  %2341 = vmax.xlane.f32.xlu0 %v2340_v19  ;;  %v2540_v49 = vpop.xlane.xlu2 %2539  ;;  %v6071_v10 = vpop.xlane.xlu1 %2299 }
 0x4e8   :  { %3527 = vlog2.f32 %v2540_v49  ;;  %v2377_v11 = vsub.f32 %v5793_v35, %v6071_v10  ;;  %v2378_v14 = vsub.f32 %v5786_v56, %v6071_v10  ;;  %v6084_v32 = vpop.xlane.xlu0 %3038 }
 0x4e9   :  { %v3524_v30 = vpop.eup %3523  ;;  %v2695_v9 = vadd.f32 %v2632_v8, %v5740_v13  ;;  %v3055_v13 = vadd.f32 %v2969_v15, %v2968_v57 }
 0x4ea   :  { %v3526_v54 = vpop.eup %3525  ;;  %v2475_v42 = vmul.f32 1.442695, %v2377_v11  ;;  %v2477_v29 = vmul.f32 1.442695, %v2378_v14 }
 0x4eb   :  { %v3082_v35 = vsub.f32 %v2695_v9, %v5781_v46  ;;  %v2583_v56 = vadd.f32 %v3526_v54, %v3524_v30 }
 0x4ec   :  { %3529 = vpow2.f32 %v2475_v42 }
 0x4ed   :  { %3115 = vst.msk [vmem:[%s6415_s8] sm:$0xff] %vm3114_vm12, %v3082_v35  ;;  %3531 = vpow2.f32 %v2477_v29 }
 0x4ee   :  { %v3528_v8 = vpop.eup %3527  ;;  %2584 = vadd.xlane.f32.xlu2 %v2583_v56 }
 0x4ef   :  { %v2634_v33 = vmul.f32 0.6931472, %v3528_v8  ;;  %3056 = vadd.xlane.f32.xlu0 %v3055_v13  ;;  %v6091_v44 = vpop.xlane.xlu2 %2302  ;;  %v6093_v46 = vpop.xlane.xlu1 %3041 }
 0x4f0   :  { %v2379_v19 = vsub.f32 %v5819_v0, %v6091_v44  ;;  %v2380_v50 = vsub.f32 %v5814_v17, %v6091_v44 }
 0x4f1   :  { %v2696_v49 = vadd.f32 %v2634_v33, %v5751_v58 }
 0x4f2   :  { %v3530_v11 = vpop.eup %3529  ;;  %v2479_v14 = vmul.f32 1.442695, %v2379_v19  ;;  %v2481_v30 = vmul.f32 1.442695, %v2380_v50 }
 0x4f3   :  { %v3532_v9 = vpop.eup %3531  ;;  %v3083_v54 = vsub.f32 %v2696_v49, %v5768_v21 }
 0x4f4   :  { %3533 = vpow2.f32 %v2479_v14  ;;  %v2543_v42 = vpop.xlane.xlu0 %2542  ;;  %v2586_v29 = vadd.f32 %v3532_v9, %v3530_v11 }
 0x4f5   :  { %3116 = vst.msk [vmem:[%s6415_s8 + $0x8] sm:$0xff] %vm3114_vm12, %v3083_v54  ;;  %3535 = vpow2.f32 %v2481_v30 }
 0x4f6   :  { %3537 = vlog2.f32 %v2543_v42 }
 0x4f7   :  { %2587 = vadd.xlane.f32.xlu0 %v2586_v29  ;;  %v6105_v17 = vpop.xlane.xlu2 %3044  ;;  %v2546_v58 = vpop.xlane.xlu1 %2545 }
 0x4f8   :  { %3539 = vlog2.f32 %v2546_v58 }
 0x4fa   :  { %v3534_v0 = vpop.eup %3533 }
 0x4fb   :  { %v3536_v57 = vpop.eup %3535 }
 0x4fc   :  { %v3538_v35 = vpop.eup %3537  ;;  %v6107_v56 = vpop.xlane.xlu0 %2305  ;;  %v2589_v21 = vadd.f32 %v3536_v57, %v3534_v0 }
 0x4fd   :  { %v2636_v15 = vmul.f32 0.6931472, %v3538_v35  ;;  %v2381_v13 = vsub.f32 %v5839_v31, %v6107_v56  ;;  %v2382_v8 = vsub.f32 %v5836_v41, %v6107_v56 }
 0x4fe   :  { %v3540_v33 = vpop.eup %3539  ;;  %2590 = vadd.xlane.f32.xlu1 %v2589_v21 }
 0x4ff   :  { %v2697_v19 = vadd.f32 %v2636_v15, %v5805_v25  ;;  %v2638_v50 = vmul.f32 0.6931472, %v3540_v33  ;;  %v2483_v49 = vmul.f32 1.442695, %v2381_v13  ;;  %v2485_v11 = vmul.f32 1.442695, %v2382_v8  ;;  %v2549_v14 = vpop.xlane.xlu2 %2548  ;;  %v6114_v30 = vpop.xlane.xlu1 %2308 }
 0x500   :  { %3541 = vlog2.f32 %v2549_v14  ;;  %v2383_v9 = vsub.f32 %v5861_v34, %v6114_v30  ;;  %v2384_v31 = vsub.f32 %v5858_v37, %v6114_v30 }
 0x501   :  { %v3084_v54 = vsub.f32 %v2697_v19, %v5783_v27  ;;  %v2698_v41 = vadd.f32 %v2638_v50, %v5788_v55  ;;  %3543 = vpow2.f32 %v2483_v49 }
 0x502   :  { %3545 = vpow2.f32 %v2485_v11  ;;  %v2487_v25 = vmul.f32 1.442695, %v2383_v9  ;;  %v2489_v42 = vmul.f32 1.442695, %v2384_v31 }
 0x503   :  { %3117 = vst.msk [vmem:[%s6415_s8 + $0x10] sm:$0xff] %vm3114_vm12, %v3084_v54  ;;  %v3085_v29 = vsub.f32 %v2698_v41, %v5831_v48 }
 0x504   :  { %3547 = vpow2.f32 %v2487_v25  ;;  %v6127_v34 = vpop.xlane.xlu0 %3047 }
 0x505   :  { %3118 = vst.msk [vmem:[%s6415_s8 + $0x18] sm:$0xff] %vm3114_vm12, %v3085_v29  ;;  %3549 = vpow2.f32 %v2489_v42  ;;  %v6650_v29 = vld [vmem:[#allocation29_spill] sm:$0xff] }
 0x506   :  { %v3542_v27 = vpop.eup %3541 }
 0x507   :  { %v3544_v55 = vpop.eup %3543  ;;  %v2640_v37 = vmul.f32 0.6931472, %v3542_v27  ;;  %v6133_v58 = vpop.xlane.xlu2 %2311 }
 0x508   :  { %v6135_v0 = vpop.xlane.xlu1 %3050  ;;  %v3546_v57 = vpop.eup %3545  ;;  %v2385_v48 = vsub.f32 %v5885_v6, %v6133_v58  ;;  %v2386_v35 = vsub.f32 %v5879_v62, %v6133_v58 }
 0x509   :  { %v2699_v21 = vadd.f32 %v2640_v37, %v5811_v52  ;;  %v2592_v15 = vadd.f32 %v3546_v57, %v3544_v55 }
 0x50a   :  { %v3548_v13 = vpop.eup %3547  ;;  %v2491_v8 = vmul.f32 1.442695, %v2385_v48  ;;  %v2493_v33 = vmul.f32 1.442695, %v2386_v35 }
 0x50b   :  { %v3550_v19 = vpop.eup %3549  ;;  %v3086_v50 = vsub.f32 %v2699_v21, %v5833_v26  ;;  %2593 = vadd.xlane.f32.xlu2 %v2592_v15  ;;  %v6651_v15 = vld [vmem:[#allocation30_spill] sm:$0xff] }
 0x50c   :  { %3551 = vpow2.f32 %v2491_v8  ;;  %v2552_v49 = vpop.xlane.xlu0 %2551  ;;  %v2595_v11 = vadd.f32 %v3550_v19, %v3548_v13 }
 0x50d   :  { %3119 = vst.msk [vmem:[%s6415_s8 + $0x20] sm:$0xff] %vm3114_vm12, %v3086_v50  ;;  %3553 = vpow2.f32 %v2493_v33 }
 0x50e   :  { %3555 = vlog2.f32 %v2552_v49  ;;  %2596 = vadd.xlane.f32.xlu0 %v2595_v11 }
 0x50f   :  { %v6147_v52 = vpop.xlane.xlu2 %3053 }
 0x510   :  { %v2555_v62 = vpop.xlane.xlu1 %2554 }
 0x511   :  { %3557 = vlog2.f32 %v2555_v62 }
 0x512   :  { %v3552_v6 = vpop.eup %3551 }
 0x513   :  { %v3554_v14 = vpop.eup %3553 }
 0x514   :  { %v3556_v9 = vpop.eup %3555  ;;  %v6149_v26 = vpop.xlane.xlu0 %2314  ;;  %v2598_v31 = vadd.f32 %v3554_v14, %v3552_v6  ;;  %v6653_v6 = vld [vmem:[#allocation4_spill] sm:$0xff] }
 0x515   :  { %v2642_v54 = vmul.f32 0.6931472, %v3556_v9  ;;  %v2387_v41 = vsub.f32 %v5903_v61, %v6149_v26  ;;  %v2388_v25 = vsub.f32 %v5898_v47, %v6149_v26  ;;  %v6652_v47 = vld [vmem:[#allocation54_spill] sm:$0xff] }
 0x516   :  { %2599 = vadd.xlane.f32.xlu1 %v2598_v31 }
 0x517   :  { %v3558_v42 = vpop.eup %3557  ;;  %v2700_v27 = vadd.f32 %v2642_v54, %v6650_v29  ;;  %v2495_v37 = vmul.f32 1.442695, %v2387_v41  ;;  %v2497_v57 = vmul.f32 1.442695, %v2388_v25  ;;  %v2558_v48 = vpop.xlane.xlu2 %2557 }
 0x518   :  { %v2644_v55 = vmul.f32 0.6931472, %v3558_v42  ;;  %v6156_v35 = vpop.xlane.xlu1 %2317  ;;  %3559 = vlog2.f32 %v2558_v48  ;;  %v6654_v48 = vld [vmem:[#allocation33_spill] sm:$0xff] }
 0x519   :  { %v2389_v21 = vsub.f32 %v5919_v16, %v6156_v35  ;;  %v2390_v61 = vsub.f32 %v5914_v40, %v6156_v35  ;;  %v3087_v13 = vsub.f32 %v2700_v27, %v6651_v15  ;;  %3561 = vpow2.f32 %v2495_v37 }
 0x51a   :  { %v2701_v8 = vadd.f32 %v2644_v55, %v6652_v47  ;;  %3563 = vpow2.f32 %v2497_v57 }
 0x51b   :  { %v2499_v33 = vmul.f32 1.442695, %v2389_v21  ;;  %v2501_v19 = vmul.f32 1.442695, %v2390_v61  ;;  %3120 = vst.msk [vmem:[%s6415_s8 + $0x28] sm:$0xff] %vm3114_vm12, %v3087_v13 }
 0x51c   :  { %v3088_v50 = vsub.f32 %v2701_v8, %v5900_v12 }
 0x51d   :  { %3565 = vpow2.f32 %v2499_v33 }
 0x51e   :  { %3121 = vst.msk [vmem:[%s6415_s8 + $0x30] sm:$0xff] %vm3114_vm12, %v3088_v50  ;;  %3567 = vpow2.f32 %v2501_v19  ;;  %v3560_v40 = vpop.eup %3559 }
 0x51f   :  { %v3562_v16 = vpop.eup %3561  ;;  %v2646_v49 = vmul.f32 0.6931472, %v3560_v40 }
 0x520   :  { %v3564_v11 = vpop.eup %3563  ;;  %v2561_v62 = vpop.xlane.xlu0 %2560 }
 0x521   :  { %v2702_v14 = vadd.f32 %v2646_v49, %v6653_v6  ;;  %3569 = vlog2.f32 %v2561_v62  ;;  %v6174_v9 = vpop.xlane.xlu2 %2320  ;;  %v2601_v31 = vadd.f32 %v3564_v11, %v3562_v16  ;;  %v6655_v62 = vld [vmem:[#allocation55_spill] sm:$0xff] }
 0x522   :  { %v2391_v12 = vsub.f32 %v5941_v3, %v6174_v9  ;;  %v2392_v41 = vsub.f32 %v5938_v28, %v6174_v9 }
 0x523   :  { %v3566_v54 = vpop.eup %3565  ;;  %v3089_v42 = vsub.f32 %v2702_v14, %v5911_v5  ;;  %2602 = vadd.xlane.f32.xlu2 %v2601_v31 }
 0x524   :  { %v3568_v25 = vpop.eup %3567  ;;  %v2503_v29 = vmul.f32 1.442695, %v2391_v12  ;;  %v2505_v27 = vmul.f32 1.442695, %v2392_v41 }
 0x525   :  { %v2604_v55 = vadd.f32 %v3568_v25, %v3566_v54  ;;  %3122 = vst.msk [vmem:[%s6415_s8 + $0x38] sm:$0xff] %vm3114_vm12, %v3089_v42 }
 0x526   :  { %3571 = vpow2.f32 %v2503_v29  ;;  %v6656_v29 = vld [vmem:[#allocation5_spill] sm:$0xff] }
 0x527   :  { %2605 = vadd.xlane.f32.xlu0 %v2604_v55  ;;  %v3570_v37 = vpop.eup %3569  ;;  %3573 = vpow2.f32 %v2505_v27 }
 0x528   :  { %v2648_v3 = vmul.f32 0.6931472, %v3570_v37  ;;  %v2564_v57 = vpop.xlane.xlu1 %2563 }
 0x529   :  { %3575 = vlog2.f32 %v2564_v57  ;;  %v6185_v28 = vpop.xlane.xlu0 %2323  ;;  %v6657_v57 = vld [vmem:[#allocation36_spill] sm:$0xff] }
 0x52a   :  { %v2703_v5 = vadd.f32 %v2648_v3, %v6654_v48  ;;  %v2393_v21 = vsub.f32 %v5957_v53, %v6185_v28  ;;  %v2394_v61 = vsub.f32 %v5954_v20, %v6185_v28 }
 0x52c   :  { %v3572_v15 = vpop.eup %3571  ;;  %v3090_v13 = vsub.f32 %v2703_v5, %v5929_v22  ;;  %v2507_v47 = vmul.f32 1.442695, %v2393_v21  ;;  %v2509_v8 = vmul.f32 1.442695, %v2394_v61 }
 0x52d   :  { %v3574_v33 = vpop.eup %3573 }
 0x52e   :  { %3123 = vst.msk [vmem:[%s6415_s8 + $0x40] sm:$0xff] %vm3114_vm12, %v3090_v13  ;;  %3577 = vpow2.f32 %v2507_v47  ;;  %v2607_v19 = vadd.f32 %v3574_v33, %v3572_v15 }
 0x52f   :  { %v3576_v50 = vpop.eup %3575  ;;  %3579 = vpow2.f32 %v2509_v8 }
 0x530   :  { %v2650_v40 = vmul.f32 0.6931472, %v3576_v50  ;;  %v2567_v53 = vpop.xlane.xlu2 %2566  ;;  %2608 = vadd.xlane.f32.xlu1 %v2607_v19  ;;  %v6658_v19 = vld [vmem:[#allocation56_spill] sm:$0xff] }
 0x531   :  { %3581 = vlog2.f32 %v2567_v53  ;;  %v6197_v20 = vpop.xlane.xlu1 %2326 }
 0x532   :  { %v2704_v22 = vadd.f32 %v2650_v40, %v5931_v63  ;;  %v2395_v16 = vsub.f32 %v5973_v43, %v6197_v20  ;;  %v2396_v49 = vsub.f32 %v5970_v45, %v6197_v20 }
 0x534   :  { %v3578_v11 = vpop.eup %3577  ;;  %v3091_v6 = vsub.f32 %v2704_v22, %v6655_v62  ;;  %v2511_v14 = vmul.f32 1.442695, %v2395_v16  ;;  %v2513_v31 = vmul.f32 1.442695, %v2396_v49  ;;  %v6659_v16 = vld [vmem:[#allocation6_spill] sm:$0xff] }
 0x535   :  { %v3580_v54 = vpop.eup %3579 }
 0x536   :  { %3124 = vst.msk [vmem:[%s6415_s8 + $0x48] sm:$0xff] %vm3114_vm12, %v3091_v6  ;;  %3583 = vpow2.f32 %v2511_v14  ;;  %v2610_v12 = vadd.f32 %v3580_v54, %v3578_v11 }
 0x537   :  { %v3582_v63 = vpop.eup %3581  ;;  %3585 = vpow2.f32 %v2513_v31 }
 0x538   :  { %v2652_v41 = vmul.f32 0.6931472, %v3582_v63  ;;  %2611 = vadd.xlane.f32.xlu2 %v2610_v12  ;;  %v2570_v25 = vpop.xlane.xlu0 %2569 }
 0x539   :  { %3587 = vlog2.f32 %v2570_v25  ;;  %v6209_v42 = vpop.xlane.xlu2 %2329 }
 0x53a   :  { %v2705_v27 = vadd.f32 %v2652_v41, %v6656_v29  ;;  %v2397_v55 = vsub.f32 %v5989_v7, %v6209_v42  ;;  %v2398_v37 = vsub.f32 %v5986_v1, %v6209_v42  ;;  %v6660_v41 = vld [vmem:[#allocation37_spill] sm:$0xff] }
 0x53c   :  { %v3584_v3 = vpop.eup %3583  ;;  %v3092_v48 = vsub.f32 %v2705_v27, %v6657_v57  ;;  %v2515_v5 = vmul.f32 1.442695, %v2397_v55  ;;  %v2517_v21 = vmul.f32 1.442695, %v2398_v37  ;;  %v6661_v37 = vld [vmem:[#allocation7_spill] sm:$0xff] }
 0x53d   :  { %v3586_v61 = vpop.eup %3585 }
 0x53e   :  { %3125 = vst.msk [vmem:[%s6415_s8 + $0x50] sm:$0xff] %vm3114_vm12, %v3092_v48  ;;  %3589 = vpow2.f32 %v2515_v5  ;;  %v2613_v15 = vadd.f32 %v3586_v61, %v3584_v3 }
 0x53f   :  { %v3588_v13 = vpop.eup %3587  ;;  %3591 = vpow2.f32 %v2517_v21 }
 0x540   :  { %v2654_v47 = vmul.f32 0.6931472, %v3588_v13  ;;  %2614 = vadd.xlane.f32.xlu0 %v2613_v15  ;;  %v2573_v8 = vpop.xlane.xlu1 %2572 }
 0x541   :  { %3593 = vlog2.f32 %v2573_v8  ;;  %v6221_v33 = vpop.xlane.xlu0 %2332 }
 0x542   :  { %v2706_v50 = vadd.f32 %v2654_v47, %v6658_v19  ;;  %v2399_v40 = vsub.f32 %v6005_v51, %v6221_v33  ;;  %v2400_v53 = vsub.f32 %v6002_v60, %v6221_v33  ;;  %v6662_v19 = vld [vmem:[#allocation57_spill] sm:$0xff] }
 0x544   :  { %v3590_v22 = vpop.eup %3589  ;;  %v3093_v49 = vsub.f32 %v2706_v50, %v6659_v16  ;;  %v2519_v11 = vmul.f32 1.442695, %v2399_v40  ;;  %v2521_v62 = vmul.f32 1.442695, %v2400_v53  ;;  %v6663_v16 = vld [vmem:[#allocation38_spill] sm:$0xff] }
 0x545   :  { %v3592_v6 = vpop.eup %3591 }
 0x546   :  { %3126 = vst.msk [vmem:[%s6415_s8 + $0x58] sm:$0xff] %vm3114_vm12, %v3093_v49  ;;  %3595 = vpow2.f32 %v2519_v11  ;;  %v2616_v14 = vadd.f32 %v3592_v6, %v3590_v22 }
 0x547   :  { %v3594_v31 = vpop.eup %3593  ;;  %3597 = vpow2.f32 %v2521_v62 }
 0x548   :  { %v2656_v54 = vmul.f32 0.6931472, %v3594_v31  ;;  %v2576_v12 = vpop.xlane.xlu2 %2575  ;;  %2617 = vadd.xlane.f32.xlu1 %v2616_v14 }
 0x549   :  { %3599 = vlog2.f32 %v2576_v12  ;;  %v6233_v63 = vpop.xlane.xlu1 %2335 }
 0x54a   :  { %v2707_v25 = vadd.f32 %v2656_v54, %v6660_v41  ;;  %v2401_v29 = vsub.f32 %v6021_v38, %v6233_v63  ;;  %v2402_v27 = vsub.f32 %v6018_v59, %v6233_v63 }
 0x54c   :  { %v3596_v55 = vpop.eup %3595  ;;  %v3094_v3 = vsub.f32 %v2707_v25, %v6661_v37  ;;  %v2523_v57 = vmul.f32 1.442695, %v2401_v29  ;;  %v2525_v48 = vmul.f32 1.442695, %v2402_v27  ;;  %v6664_v25 = vld [vmem:[#allocation2_spill] sm:$0xff]  ;;  %v6665_v29 = vld [vmem:[#allocation39_spill] sm:$0xff] }
 0x54d   :  { %v3598_v5 = vpop.eup %3597  ;;  %vm2910_vm14 = vcmp.eq.s32.totalorder %v5294_v39, %v6664_v25  ;;  %vm2911_vm15 = vcmp.eq.s32.totalorder %v5319_v23, %v6664_v25 }
 0x54e   :  { %3127 = vst.msk [vmem:[%s6415_s8 + $0x60] sm:$0xff] %vm3114_vm12, %v3094_v3  ;;  %3601 = vpow2.f32 %v2523_v57  ;;  %v2619_v21 = vadd.f32 %v3598_v5, %v3596_v55  ;;  %v2974_v57 = vsel %vm2910_vm14, %v5973_v43, 0.0  ;;  %v6666_v5 = vld [vmem:[#allocation40_spill] sm:$0xff] }
 0x54f   :  { %v3600_v61 = vpop.eup %3599  ;;  %3603 = vpow2.f32 %v2525_v48 }
 0x550   :  { %v2658_v15 = vmul.f32 0.6931472, %v3600_v61  ;;  %2620 = vadd.xlane.f32.xlu2 %v2619_v21  ;;  %v2579_v13 = vpop.xlane.xlu0 %2578 }
 0x551   :  { %3605 = vlog2.f32 %v2579_v13  ;;  %v6245_v47 = vpop.xlane.xlu2 %2338  ;;  %v6247_v8 = vpop.xlane.xlu1 %3059 }
 0x552   :  { %v2708_v50 = vadd.f32 %v2658_v15, %v6662_v19  ;;  %v2403_v40 = vsub.f32 %v6044_v4, %v6245_v47  ;;  %v2404_v53 = vsub.f32 %v6041_v2, %v6245_v47  ;;  %v2975_v19 = vsel %vm2911_vm15, %v5970_v45, 0.0 }
 0x554   :  { %v3602_v22 = vpop.eup %3601  ;;  %v3095_v49 = vsub.f32 %v2708_v50, %v6663_v16  ;;  %v2527_v11 = vmul.f32 1.442695, %v2403_v40  ;;  %v2529_v62 = vmul.f32 1.442695, %v2404_v53  ;;  %v3064_v40 = vadd.f32 %v2975_v19, %v2974_v57  ;;  %v6667_v16 = vld [vmem:[#allocation28_spill] sm:$0xff] }
 0x555   :  { %v3604_v6 = vpop.eup %3603  ;;  %vm2912_vm1 = vcmp.eq.s32.totalorder %v5294_v39, %v6667_v16  ;;  %vm2913_vm3 = vcmp.eq.s32.totalorder %v5319_v23, %v6667_v16 }
 0x556   :  { %3128 = vst.msk [vmem:[%s6415_s8 + $0x68] sm:$0xff] %vm3114_vm12, %v3095_v49  ;;  %3607 = vpow2.f32 %v2527_v11  ;;  %v2622_v14 = vadd.f32 %v3604_v6, %v3602_v22  ;;  %v6668_v49 = vld [vmem:[#allocation3_spill] sm:$0xff]  ;;  %v6669_v11 = vld [vmem:[#allocation41_spill] sm:$0xff]  ;;  %v2976_v6 = vsel %vm2912_vm1, %v5989_v7, 0.0  ;;  %v2977_v25 = vsel %vm2913_vm3, %v5986_v1, 0.0 }
 0x557   :  { %v3606_v31 = vpop.eup %3605  ;;  %3609 = vpow2.f32 %v2529_v62  ;;  %vm2916_vm2 = vcmp.eq.s32.totalorder %v5294_v39, %v6668_v49  ;;  %vm2917_vm4 = vcmp.eq.s32.totalorder %v5319_v23, %v6668_v49 }
 0x558   :  { %v2660_v54 = vmul.f32 0.6931472, %v3606_v31  ;;  %2623 = vadd.xlane.f32.xlu0 %v2622_v14  ;;  %v2980_v14 = vsel %vm2916_vm2, %v6021_v38, 0.0 }
 0x559   :  { %v6259_v12 = vpop.xlane.xlu2 %3062  ;;  %v2582_v41 = vpop.xlane.xlu1 %2581 }
 0x55a   :  { %v2709_v27 = vadd.f32 %v2660_v54, %v6665_v29  ;;  %v6264_v55 = vpop.xlane.xlu0 %2341  ;;  %3611 = vlog2.f32 %v2582_v41  ;;  %v6670_v54 = vld [vmem:[#allocation42_spill] sm:$0xff]  ;;  %v2981_v29 = vsel %vm2917_vm4, %v6018_v59, 0.0 }
 0x55b   :  { %v2405_v37 = vsub.f32 %v6066_v36, %v6264_v55  ;;  %v2406_v3 = vsub.f32 %v6063_v18, %v6264_v55 }
 0x55c   :  { %v3608_v48 = vpop.eup %3607  ;;  %v3096_v21 = vsub.f32 %v2709_v27, %v6666_v5  ;;  %v6672_v5 = vld [vmem:[#allocation50_spill] sm:$0xff] }
 0x55d   :  { %v3610_v61 = vpop.eup %3609  ;;  %v2531_v15 = vmul.f32 1.442695, %v2405_v37  ;;  %v2533_v13 = vmul.f32 1.442695, %v2406_v3  ;;  %v3067_v37 = vadd.f32 %v2977_v25, %v2976_v6  ;;  %v3073_v3 = vadd.f32 %v2981_v29, %v2980_v14 }
 0x55e   :  { %3129 = vst.msk [vmem:[%s6415_s8 + $0x70] sm:$0xff] %vm3114_vm12, %v3096_v21  ;;  %v2625_v50 = vadd.f32 %v3610_v61, %v3608_v48  ;;  %v6671_v48 = vld [vmem:[#allocation25_spill] sm:$0xff]  ;;  %vm2914_vm6 = vcmp.eq.s32.totalorder %v5294_v39, %v6672_v5  ;;  %vm2915_vm0 = vcmp.eq.s32.totalorder %v5319_v23, %v6672_v5 }
 0x55f   :  { %3613 = vpow2.f32 %v2531_v15  ;;  %vm2918_vm5 = vcmp.eq.s32.totalorder %v5294_v39, %v6671_v48  ;;  %vm2919_vm7 = vcmp.eq.s32.totalorder %v5319_v23, %v6671_v48  ;;  %v2978_v61 = vsel %vm2914_vm6, %v6005_v51, 0.0  ;;  %v6673_v15 = vld [vmem:[#allocation43_spill] sm:$0xff] }
 0x560   :  { %v3612_v43 = vpop.eup %3611  ;;  %3615 = vpow2.f32 %v2533_v13  ;;  %2626 = vadd.xlane.f32.xlu1 %v2625_v50  ;;  %3065 = vadd.xlane.f32.xlu0 %v3064_v40  ;;  %v2982_v21 = vsel %vm2918_vm5, %v6044_v4, 0.0  ;;  %v2983_v19 = vsel %vm2919_vm7, %v6041_v2, 0.0  ;;  %v2979_v40 = vsel %vm2915_vm0, %v6002_v60, 0.0 }
 0x561   :  { %v2662_v53 = vmul.f32 0.6931472, %v3612_v43  ;;  %v2585_v22 = vpop.xlane.xlu2 %2584  ;;  %v3076_v50 = vadd.f32 %v2983_v19, %v2982_v21 }
 0x562   :  { %3617 = vlog2.f32 %v2585_v22  ;;  %v6283_v45 = vpop.xlane.xlu0 %3056 }
 0x563   :  { %v2710_v62 = vadd.f32 %v2662_v53, %v6669_v11  ;;  %v6674_v53 = vld [vmem:[#allocation52_spill] sm:$0xff] }
 0x564   :  { %vm2920_vm8 = vcmp.eq.s32.totalorder %v5294_v39, %v6674_v53  ;;  %vm2921_vm9 = vcmp.eq.s32.totalorder %v5319_v23, %v6674_v53 }
 0x565   :  { %v3614_v31 = vpop.eup %3613  ;;  %v3097_v41 = vsub.f32 %v2710_v62, %v6670_v54  ;;  %v2984_v22 = vsel %vm2920_vm8, %v6066_v36, 0.0  ;;  %v2985_v16 = vsel %vm2921_vm9, %v6063_v18, 0.0 }
 0x566   :  { %v3616_v27 = vpop.eup %3615  ;;  %v3079_v49 = vadd.f32 %v2985_v16, %v2984_v22 }
 0x567   :  { %3130 = vst.msk [vmem:[%s6415_s8 + $0x78] sm:$0xff] %vm3114_vm12, %v3097_v41  ;;  %v2628_v7 = vadd.f32 %v3616_v27, %v3614_v31 }
 0x568   :  { %v3618_v38 = vpop.eup %3617  ;;  %3068 = vadd.xlane.f32.xlu1 %v3067_v37  ;;  %3074 = vadd.xlane.f32.xlu0 %v3073_v3 }
 0x569   :  { %v2664_v57 = vmul.f32 0.6931472, %v3618_v38  ;;  %2629 = vadd.xlane.f32.xlu2 %v2628_v7 }
 0x56a   :  { %v2588_v1 = vpop.xlane.xlu0 %2587 }
 0x56b   :  { %v2711_v59 = vadd.f32 %v2664_v57, %v6049_v24  ;;  %3619 = vlog2.f32 %v2588_v1  ;;  %v3070_v24 = vadd.f32 %v2979_v40, %v2978_v61 }
 0x56d   :  { %v3098_v13 = vsub.f32 %v2711_v59, %v6673_v15 }
 0x56f   :  { %3131 = vst.msk [vmem:[%s6415_s8 + $0x80] sm:$0xff] %vm3114_vm12, %v3098_v13 }
 0x570   :  { %3077 = vadd.xlane.f32.xlu1 %v3076_v50 }
 0x571   :  { %v3620_v4 = vpop.eup %3619  ;;  %3071 = vadd.xlane.f32.xlu2 %v3070_v24  ;;  %v2591_v51 = vpop.xlane.xlu1 %2590 }
 0x572   :  { %v2666_v43 = vmul.f32 0.6931472, %v3620_v4  ;;  %3621 = vlog2.f32 %v2591_v51 }
 0x574   :  { %v2712_v2 = vadd.f32 %v2666_v43, %v6071_v10 }
 0x576   :  { %v3099_v60 = vsub.f32 %v2712_v2, %v6084_v32 }
 0x578   :  { %v3622_v11 = vpop.eup %3621  ;;  %3132 = vst.msk [vmem:[%s6415_s8 + $0x88] sm:$0xff] %vm3114_vm12, %v3099_v60 }
 0x579   :  { %v2668_v62 = vmul.f32 0.6931472, %v3622_v11  ;;  %3080 = vadd.xlane.f32.xlu2 %v3079_v49 }
 0x57b   :  { %v2713_v39 = vadd.f32 %v2668_v62, %v6091_v44 }
 0x57d   :  { %v3100_v36 = vsub.f32 %v2713_v39, %v6093_v46 }
 0x57e   :  { %v2594_v10 = vpop.xlane.xlu2 %2593 }
 0x57f   :  { %3133 = vst.msk [vmem:[%s6415_s8 + $0x90] sm:$0xff] %vm3114_vm12, %v3100_v36  ;;  %3623 = vlog2.f32 %v2594_v10 }
 0x581   :  { %v2597_v23 = vpop.xlane.xlu0 %2596 }
 0x582   :  { %3625 = vlog2.f32 %v2597_v23 }
 0x585   :  { %v3624_v18 = vpop.eup %3623 }
 0x586   :  { %v2670_v32 = vmul.f32 0.6931472, %v3624_v18 }
 0x588   :  { %v3626_v6 = vpop.eup %3625  ;;  %v2714_v14 = vadd.f32 %v2670_v32, %v6107_v56 }
 0x589   :  { %v2672_v31 = vmul.f32 0.6931472, %v3626_v6  ;;  %v2600_v54 = vpop.xlane.xlu1 %2599 }
 0x58a   :  { %v3101_v44 = vsub.f32 %v2714_v14, %v6105_v17  ;;  %3627 = vlog2.f32 %v2600_v54 }
 0x58b   :  { %v2715_v46 = vadd.f32 %v2672_v31, %v6114_v30 }
 0x58c   :  { %3134 = vst.msk [vmem:[%s6415_s8 + $0x98] sm:$0xff] %vm3114_vm12, %v3101_v44 }
 0x58d   :  { %v3102_v41 = vsub.f32 %v2715_v46, %v6127_v34 }
 0x58f   :  { %3135 = vst.msk [vmem:[%s6415_s8 + $0xa0] sm:$0xff] %vm3114_vm12, %v3102_v41 }
 0x590   :  { %v3628_v56 = vpop.eup %3627 }
 0x591   :  { %v2674_v25 = vmul.f32 0.6931472, %v3628_v56 }
 0x593   :  { %v2716_v29 = vadd.f32 %v2674_v25, %v6133_v58 }
 0x595   :  { %v3103_v17 = vsub.f32 %v2716_v29, %v6135_v0 }
 0x596   :  { %v2603_v27 = vpop.xlane.xlu2 %2602 }
 0x597   :  { %3136 = vst.msk [vmem:[%s6415_s8 + $0xa8] sm:$0xff] %vm3114_vm12, %v3103_v17  ;;  %3629 = vlog2.f32 %v2603_v27 }
 0x59a   :  { %v2606_v30 = vpop.xlane.xlu0 %2605 }
 0x59b   :  { %3631 = vlog2.f32 %v2606_v30 }
 0x59d   :  { %v3630_v34 = vpop.eup %3629 }
 0x59e   :  { %v2676_v37 = vmul.f32 0.6931472, %v3630_v34 }
 0x5a0   :  { %v2717_v7 = vadd.f32 %v2676_v37, %v6149_v26 }
 0x5a1   :  { %v3632_v3 = vpop.eup %3631 }
 0x5a2   :  { %v2678_v38 = vmul.f32 0.6931472, %v3632_v3  ;;  %v3104_v57 = vsub.f32 %v2717_v7, %v6147_v52 }
 0x5a3   :  { %v2609_v0 = vpop.xlane.xlu1 %2608 }
 0x5a4   :  { %v2718_v58 = vadd.f32 %v2678_v38, %v6156_v35  ;;  %3137 = vst.msk [vmem:[%s6415_s8 + $0xb0] sm:$0xff] %vm3114_vm12, %v3104_v57  ;;  %3633 = vlog2.f32 %v2609_v0 }
 0x5a6   :  { %v3105_v48 = vsub.f32 %v2718_v58, %v6283_v45 }
 0x5a8   :  { %3138 = vst.msk [vmem:[%s6415_s8 + $0xb8] sm:$0xff] %vm3114_vm12, %v3105_v48 }
 0x5aa   :  { %v3634_v26 = vpop.eup %3633 }
 0x5ab   :  { %v2680_v1 = vmul.f32 0.6931472, %v3634_v26  ;;  %v2612_v5 = vpop.xlane.xlu2 %2611 }
 0x5ac   :  { %3635 = vlog2.f32 %v2612_v5 }
 0x5ad   :  { %v2719_v52 = vadd.f32 %v2680_v1, %v6174_v9 }
 0x5af   :  { %v3106_v35 = vsub.f32 %v2719_v52, %v6247_v8 }
 0x5b1   :  { %3139 = vst.msk [vmem:[%s6415_s8 + $0xc0] sm:$0xff] %vm3114_vm12, %v3106_v35 }
 0x5b2   :  { %v3636_v59 = vpop.eup %3635 }
 0x5b3   :  { %v2682_v45 = vmul.f32 0.6931472, %v3636_v59  ;;  %v2615_v15 = vpop.xlane.xlu0 %2614 }
 0x5b4   :  { %3637 = vlog2.f32 %v2615_v15 }
 0x5b5   :  { %v2720_v21 = vadd.f32 %v2682_v45, %v6185_v28 }
 0x5b7   :  { %v3107_v61 = vsub.f32 %v2720_v21, %v6259_v12 }
 0x5b9   :  { %3140 = vst.msk [vmem:[%s6415_s8 + $0xc8] sm:$0xff] %vm3114_vm12, %v3107_v61 }
 0x5ba   :  { %v3638_v8 = vpop.eup %3637 }
 0x5bb   :  { %v2618_v9 = vpop.xlane.xlu1 %2617  ;;  %v2684_v19 = vmul.f32 0.6931472, %v3638_v8 }
 0x5bc   :  { %3639 = vlog2.f32 %v2618_v9 }
 0x5bd   :  { %v2721_v24 = vadd.f32 %v2684_v19, %v6197_v20 }
 0x5c2   :  { %v3640_v50 = vpop.eup %3639 }
 0x5c3   :  { %v2621_v40 = vpop.xlane.xlu2 %2620  ;;  %v2686_v43 = vmul.f32 0.6931472, %v3640_v50 }
 0x5c5   :  { %v2722_v22 = vadd.f32 %v2686_v43, %v6209_v42 }
 0x5cb   :  { %v2624_v13 = vpop.xlane.xlu0 %2623 }
 0x5cc   :  { %3641 = vlog2.f32 %v2624_v13 }
 0x5d2   :  { %v3642_v28 = vpop.eup %3641 }
 0x5d3   :  { %v3066_v4 = vpop.xlane.xlu0 %3065  ;;  %v2627_v12 = vpop.xlane.xlu1 %2626  ;;  %v2690_v53 = vmul.f32 0.6931472, %v3642_v28 }
 0x5d4   :  { %v3108_v51 = vsub.f32 %v2721_v24, %v3066_v4  ;;  %3643 = vlog2.f32 %v2627_v12 }
 0x5d5   :  { %3645 = vlog2.f32 %v2621_v40  ;;  %v2724_v2 = vadd.f32 %v2690_v53, %v6233_v63 }
 0x5d6   :  { %3141 = vst.msk [vmem:[%s6415_s8 + $0xd0] sm:$0xff] %vm3114_vm12, %v3108_v51 }
 0x5da   :  { %v3644_v60 = vpop.eup %3643 }
 0x5db   :  { %v3075_v16 = vpop.xlane.xlu0 %3074  ;;  %v3069_v20 = vpop.xlane.xlu1 %3068  ;;  %v2692_v36 = vmul.f32 0.6931472, %v3644_v60 }
 0x5dc   :  { %v3646_v49 = vpop.eup %3645  ;;  %v2630_v11 = vpop.xlane.xlu2 %2629  ;;  %v3111_v62 = vsub.f32 %v2724_v2, %v3075_v16  ;;  %v3109_v39 = vsub.f32 %v2722_v22, %v3069_v20 }
 0x5dd   :  { %3647 = vlog2.f32 %v2630_v11  ;;  %v2688_v10 = vmul.f32 0.6931472, %v3646_v49  ;;  %v2725_v42 = vadd.f32 %v2692_v36, %v6245_v47 }
 0x5de   :  { %3144 = vst.msk [vmem:[%s6415_s8 + $0xe8] sm:$0xff] %vm3114_vm12, %v3111_v62 }
 0x5df   :  { %3142 = vst.msk [vmem:[%s6415_s8 + $0xd8] sm:$0xff] %vm3114_vm12, %v3109_v39  ;;  %v2723_v63 = vadd.f32 %v2688_v10, %v6221_v33 }
 0x5e3   :  { %v3078_v23 = vpop.xlane.xlu1 %3077  ;;  %v3648_v18 = vpop.eup %3647 }
 0x5e4   :  { %v3072_v32 = vpop.xlane.xlu2 %3071  ;;  %v3112_v6 = vsub.f32 %v2725_v42, %v3078_v23  ;;  %v2694_v31 = vmul.f32 0.6931472, %v3648_v18 }
 0x5e5   :  { %v3110_v14 = vsub.f32 %v2723_v63, %v3072_v32 }
 0x5e6   :  { %3145 = vst.msk [vmem:[%s6415_s8 + $0xf0] sm:$0xff] %vm3114_vm12, %v3112_v6  ;;  %v2726_v47 = vadd.f32 %v2694_v31, %v6264_v55 }
 0x5e7   :  { %3143 = vst.msk [vmem:[%s6415_s8 + $0xe0] sm:$0xff] %vm3114_vm12, %v3110_v14 }
 0x5ec   :  { %v3081_v54 = vpop.xlane.xlu2 %3080 }
 0x5ed   :  { %v3113_v33 = vsub.f32 %v2726_v47, %v3081_v54 }
 0x5ef   :  { %3146 = vst.msk [vmem:[%s6415_s8 + $0xf8] sm:$0xff] %vm3114_vm12, %v3113_v33 }

</bundles_post_ra>
